<compile_context>
chip_gen: v7x
topology: tpu7x:2x2x1
jax: 0.10.0
libtpu: 0.0.40
codegen_flags: <defaults>
</compile_context>

<pallas_src>
import functools

import jax
import jax.numpy as jnp
from jax import lax
from jax.experimental import pallas as pl
from jax.experimental.pallas import tpu as pltpu


def _round_up(v, m):
    return ((v + m - 1) // m) * m


def _fold_bn(gamma, beta, mean, var, eps=1e-5):
    s = gamma / jnp.sqrt(var + eps)
    return s, beta - mean * s


def _pick_tile_rows(h, w, target=256):
    """Largest divisor d of h with d*w <= target (at least 1); TM = d*w."""
    best = 1
    for d in range(1, h + 1):
        if h % d == 0 and d * w <= target:
            best = d
    return best


def _vmem_limit_bytes():
    """Generation-aware scoped-VMEM budget (~3/4 of physical, capped)."""
    cap = 0
    try:
        cap = int(pltpu.get_tpu_info().vmem_capacity_bytes)
    except Exception:
        cap = 0
    if cap <= 0:
        cap = 64 * 1024 * 1024
    return int(min(cap * 3 // 4, 100 * 1024 * 1024))


def _bottleneck_kernel(x_ref, w1_ref, s1_ref, b1_ref, w2_ref, s2_ref, b2_ref,
                       o_ref, y1z_ref, *, W, TM, PAD, add):
    HW, C2p = o_ref.shape
    C_p = y1z_ref.shape[1]
    num_tiles = HW // TM
    aligned = (PAD % 8 == 0) and (W % 8 == 0) and (TM % 8 == 0)

    def _hint(i):
        if aligned and not isinstance(i, int):
            return pl.multiple_of(i, 8)
        return i

    # Zero the top/bottom guard rows (the 3x3 conv's vertical zero padding).
    # Done on every grid step: with ("parallel",) megacore sharding each core
    # owns its own scratch instance.
    zpad = jnp.zeros((PAD, C_p), jnp.float32)
    y1z_ref[0:PAD, :] = zpad
    y1z_ref[PAD + HW:PAD + HW + PAD, :] = zpad

    # ---- cv1: 1x1 conv (bf16 MXU) + folded BN + SiLU, tiled over rows -------
    def cv1_tile(t):
        base = t * TM
        xt = x_ref[pl.ds(_hint(base), TM), :]                    # bf16 (TM,C1p)
        y1 = jnp.dot(xt, w1_ref[...], preferred_element_type=jnp.float32)
        y1 = y1 * s1_ref[...] + b1_ref[...]
        y1 = y1 * jax.nn.sigmoid(y1)                             # SiLU, f32
        # Scratch kept f32 so the +-1 sublane rolls below stay on 32-bit data.
        y1z_ref[pl.ds(_hint(PAD + base), TM), :] = y1

    # ---- cv2: 3x3 conv (pad=1) as 9 MXU matmuls + BN + SiLU + shortcut ------
    def cv2_tile(t):
        base = t * TM
        # Column index of each row of this tile. TM is a multiple of W, so the
        # tile always starts at column 0 -> the mask only depends on iota % W.
        col = lax.broadcasted_iota(jnp.int32, (TM, 1), 0) % W
        lmask = col >= 1            # ow = -1 tap valid
        rmask = col <= (W - 2)      # ow = +1 tap valid

        acc = jnp.zeros((TM, C2p), jnp.float32)
        for oh in (-1, 0, 1):
            # One aligned slab read per kernel row; ow = +-1 taps derived via a
            # cheap sublane roll (XLU) instead of unaligned reslices. The
            # wrapped row always lands on a masked output position.
            slab = y1z_ref[pl.ds(_hint(PAD + base + oh * W), TM), :]   # f32
            t0 = (oh + 1) * 3
            acc += jnp.dot(slab.astype(jnp.bfloat16), w2_ref[t0 + 1],
                           preferred_element_type=jnp.float32)
            left = jnp.where(lmask, pltpu.roll(slab, shift=1, axis=0), 0.0)
            acc += jnp.dot(left.astype(jnp.bfloat16), w2_ref[t0 + 0],
                           preferred_element_type=jnp.float32)
            right = jnp.where(rmask, pltpu.roll(slab, shift=TM - 1, axis=0), 0.0)
            acc += jnp.dot(right.astype(jnp.bfloat16), w2_ref[t0 + 2],
                           preferred_element_type=jnp.float32)

        y2 = acc * s2_ref[...] + b2_ref[...]
        y2 = y2 * jax.nn.sigmoid(y2)                             # SiLU, f32
        if add:                                                  # static bool
            y2 = y2 + x_ref[pl.ds(_hint(base), TM), :].astype(jnp.float32)
        o_ref[pl.ds(_hint(base), TM), :] = y2

    if num_tiles <= 4:              # small maps: fully static unroll
        for ti in range(num_tiles):
            cv1_tile(ti)
        for ti in range(num_tiles):
            cv2_tile(ti)
    else:
        def _b1(ti, c):
            cv1_tile(ti)
            return c

        def _b2(ti, c):
            cv2_tile(ti)
            return c

        lax.fori_loop(0, num_tiles, _b1, 0)
        lax.fori_loop(0, num_tiles, _b2, 0)


def bottleneck_forward(x_nchw, params, shortcut=True):
    """Pallas forward of YOLOv5 Bottleneck. Input/output are NCHW like PyTorch."""
    w1, g1, be1, m1, v1, w2, g2, be2, m2, v2 = params
    n, c1, h, w = x_nchw.shape
    c_ = w1.shape[1]
    c2 = w2.shape[3]
    hw = h * w
    add = bool(shortcut and c1 == c2)

    s1, b1 = _fold_bn(g1, be1, m1, v1)
    s2, b2 = _fold_bn(g2, be2, m2, v2)

    # Lane-dense channel padding (multiples of 128).
    c1p = _round_up(c1, 128)
    c_p = _round_up(c_, 128)
    c2p = _round_up(c2, 128)

    # NCHW -> (N, HW, Cpad): channels on the 128-wide lane axis.
    x_flat = jnp.transpose(x_nchw, (0, 2, 3, 1)).reshape(n, hw, c1)
    x_flat = jnp.pad(x_flat.astype(jnp.float32),
                     ((0, 0), (0, 0), (0, c1p - c1))).astype(jnp.bfloat16)

    w1p = jnp.pad(w1.astype(jnp.float32),
                  ((0, c1p - c1), (0, c_p - c_))).astype(jnp.bfloat16)
    w2t = jnp.pad(w2.astype(jnp.float32).reshape(9, c_, c2),
                  ((0, 0), (0, c_p - c_), (0, c2p - c2))).astype(jnp.bfloat16)
    s1p = jnp.pad(s1, (0, c_p - c_)).reshape(1, c_p).astype(jnp.float32)
    b1p = jnp.pad(b1, (0, c_p - c_)).reshape(1, c_p).astype(jnp.float32)
    s2p = jnp.pad(s2, (0, c2p - c2)).reshape(1, c2p).astype(jnp.float32)
    b2p = jnp.pad(b2, (0, c2p - c2)).reshape(1, c2p).astype(jnp.float32)

    rows = _pick_tile_rows(h, w, target=256)
    tm = rows * w                       # row-tile size (multiple of W)
    pad_rows = _round_up(w, 8)          # >= W guard rows each side

    kernel = functools.partial(_bottleneck_kernel,
                               W=w, TM=tm, PAD=pad_rows, add=add)

    grid_spec = pltpu.PrefetchScalarGridSpec(
        num_scalar_prefetch=0,
        grid=(n,),
        in_specs=[
            pl.BlockSpec((None, hw, c1p), lambda b: (b, 0, 0)),   # x (bf16)
            pl.BlockSpec((c1p, c_p), lambda b: (0, 0)),           # w1 (bf16)
            pl.BlockSpec((1, c_p), lambda b: (0, 0)),             # bn1 scale
            pl.BlockSpec((1, c_p), lambda b: (0, 0)),             # bn1 bias
            pl.BlockSpec((9, c_p, c2p), lambda b: (0, 0, 0)),     # w2 taps (bf16)
            pl.BlockSpec((1, c2p), lambda b: (0, 0)),             # bn2 scale
            pl.BlockSpec((1, c2p), lambda b: (0, 0)),             # bn2 bias
        ],
        out_specs=pl.BlockSpec((None, hw, c2p), lambda b: (b, 0, 0)),
        scratch_shapes=[pltpu.VMEM((hw + 2 * pad_rows, c_p), jnp.float32)],
    )

    out_flat = pl.pallas_call(
        kernel,
        out_shape=jax.ShapeDtypeStruct((n, hw, c2p), jnp.float32),
        grid_spec=grid_spec,
        compiler_params=pltpu.CompilerParams(
            dimension_semantics=("parallel",),
            vmem_limit_bytes=_vmem_limit_bytes(),
        ),
    )(x_flat, w1p, s1p, b1p, w2t, s2p, b2p)

    out = out_flat[:, :, :c2].reshape(n, h, w, c2)
    return jnp.transpose(out, (0, 3, 1, 2))        # back to NCHW


def bottleneck_reference(x_nchw, params, shortcut=True):
    """Pure-JAX f32 reference (XLA convs, eval-mode BN folded the same way)."""
    w1, g1, be1, m1, v1, w2, g2, be2, m2, v2 = params
    n, c1, h, w = x_nchw.shape
    c_ = w1.shape[1]
    c2 = w2.shape[3]
    add = bool(shortcut and c1 == c2)
    s1, b1 = _fold_bn(g1, be1, m1, v1)
    s2, b2 = _fold_bn(g2, be2, m2, v2)

    x = jnp.transpose(x_nchw, (0, 2, 3, 1)).astype(jnp.float32)   # NHWC
    dn = ('NHWC', 'HWIO', 'NHWC')
    y = lax.conv_general_dilated(x, w1.reshape(1, 1, c1, c_), (1, 1), 'VALID',
                                 dimension_numbers=dn,
                                 precision=lax.Precision.HIGHEST)
    y = y * s1 + b1
    y = y * jax.nn.sigmoid(y)
    y = lax.conv_general_dilated(y, w2, (1, 1), ((1, 1), (1, 1)),
                                 dimension_numbers=dn,
                                 precision=lax.Precision.HIGHEST)
    y = y * s2 + b2
    y = y * jax.nn.sigmoid(y)
    if add:
        y = x + y
    return jnp.transpose(y, (0, 3, 1, 2))


if __name__ == "__main__":
    def _make_case(key, n, c1, c2, h, w, e=0.5):
        c_ = int(c2 * e)
        ks = jax.random.split(key, 11)
        x = jax.random.normal(ks[0], (n, c1, h, w), dtype=jnp.float32)
        w1 = 0.3 * jax.random.normal(ks[1], (c1, c_), dtype=jnp.float32)
        g1 = 1.0 + 0.1 * jax.random.normal(ks[2], (c_,), dtype=jnp.float32)
        be1 = 0.1 * jax.random.normal(ks[3], (c_,), dtype=jnp.float32)
        m1 = 0.1 * jax.random.normal(ks[4], (c_,), dtype=jnp.float32)
        v1 = jax.random.uniform(ks[5], (c_,), jnp.float32, 0.5, 1.5)
        w2 = 0.3 * jax.random.normal(ks[6], (3, 3, c_, c2), dtype=jnp.float32)
        g2 = 1.0 + 0.1 * jax.random.normal(ks[7], (c2,), dtype=jnp.float32)
        be2 = 0.1 * jax.random.normal(ks[8], (c2,), dtype=jnp.float32)
        m2 = 0.1 * jax.random.normal(ks[9], (c2,), dtype=jnp.float32)
        v2 = jax.random.uniform(ks[10], (c2,), jnp.float32, 0.5, 1.5)
        return x, (w1, g1, be1, m1, v1, w2, g2, be2, m2, v2)

    key = jax.random.PRNGKey(0)
    k1, k2, k3 = jax.random.split(key, 3)

    cases = [
        # (key, n, c1, c2, h, w, shortcut)
        (k1, 2, 4, 4, 16, 16, True),    # Bottleneck(4, 4): residual path
        (k2, 1, 8, 8, 80, 16, True),    # H != W, multi-tile in-kernel loop path
        (k3, 1, 4, 8, 16, 16, True),    # c1 != c2 -> no residual
    ]
    for (k, n, c1, c2, h, w, sc) in cases:
        x, params = _make_case(k, n, c1, c2, h, w)
        out = jax.block_until_ready(bottleneck_forward(x, params, shortcut=sc))
        ref = bottleneck_reference(x, params, shortcut=sc)
        assert out.shape == ref.shape, (out.shape, ref.shape)
        err = float(jnp.max(jnp.abs(out - ref)))
        # bf16 MXU operands vs f32 reference -> widened tolerance.
        assert jnp.allclose(out, ref, rtol=4e-2, atol=4e-2), \
            f"case {(n, c1, c2, h, w, sc)}: max abs err {err}"

    print("KERNEL_OK")
</pallas_src>

<mosaic_0001>
module attributes {stable_mosaic.version = 11 : i64} {
  func.func @_bottleneck_kernel(%arg0: i32, %arg1: memref<1x256x128xbf16, #tpu.memory_space<vmem>>, %arg2: memref<128x128xbf16, #tpu.memory_space<vmem>>, %arg3: memref<1x128xf32, #tpu.memory_space<vmem>>, %arg4: memref<1x128xf32, #tpu.memory_space<vmem>>, %arg5: memref<9x128x128xbf16, #tpu.memory_space<vmem>>, %arg6: memref<1x128xf32, #tpu.memory_space<vmem>>, %arg7: memref<1x128xf32, #tpu.memory_space<vmem>>, %arg8: memref<1x256x128xf32, #tpu.memory_space<vmem>>, %arg9: memref<288x128xf32, #tpu.memory_space<vmem>>) attributes {dimension_semantics = [#tpu.dimension_semantics<parallel>], iteration_bounds = array<i64: 2>, scalar_prefetch = 0 : i64, scratch_operands = 1 : i64, tpu.core_type = #tpu.core_type<tc>, window_params = [{transform_indices = @transform_0, window_bounds = array<i64: 1, 256, 128>}, {pipeline_mode = #tpu.pipeline_mode<synchronous>, transform_indices = @transform_1, window_bounds = array<i64: 128, 128>}, {pipeline_mode = #tpu.pipeline_mode<synchronous>, transform_indices = @transform_2, window_bounds = array<i64: 1, 128>}, {pipeline_mode = #tpu.pipeline_mode<synchronous>, transform_indices = @transform_3, window_bounds = array<i64: 1, 128>}, {pipeline_mode = #tpu.pipeline_mode<synchronous>, transform_indices = @transform_4, window_bounds = array<i64: 9, 128, 128>}, {pipeline_mode = #tpu.pipeline_mode<synchronous>, transform_indices = @transform_5, window_bounds = array<i64: 1, 128>}, {pipeline_mode = #tpu.pipeline_mode<synchronous>, transform_indices = @transform_6, window_bounds = array<i64: 1, 128>}, {transform_indices = @transform_7, window_bounds = array<i64: 1, 256, 128>}]} {
    %cst = arith.constant 0.000000e+00 : f32
    %0 = vector.broadcast %cst : f32 to vector<16x128xf32>
    %c0 = arith.constant 0 : index
    %c0_0 = arith.constant 0 : index
    %1 = vector.load %arg9[%c0, %c0_0] : memref<288x128xf32, #tpu.memory_space<vmem>>, vector<16x128xf32>
    tpu.vector_store %arg9[%c0, %c0_0], %0 {strides = array<i32>} : memref<288x128xf32, #tpu.memory_space<vmem>>, vector<16x128xf32>,
    %c272 = arith.constant 272 : index
    %c0_1 = arith.constant 0 : index
    %2 = vector.load %arg9[%c272, %c0_1] : memref<288x128xf32, #tpu.memory_space<vmem>>, vector<16x128xf32>
    tpu.vector_store %arg9[%c272, %c0_1], %0 {strides = array<i32>} : memref<288x128xf32, #tpu.memory_space<vmem>>, vector<16x128xf32>,
    %c0_2 = arith.constant 0 : index
    %c0_3 = arith.constant 0 : index
    %c0_4 = arith.constant 0 : index
    %3 = vector.load %arg1[%c0_2, %c0_3, %c0_4] : memref<1x256x128xbf16, #tpu.memory_space<vmem>>, vector<1x256x128xbf16>
    %4 = vector.shape_cast %3 : vector<1x256x128xbf16> to vector<256x128xbf16>
    %c0_5 = arith.constant 0 : index
    %c0_6 = arith.constant 0 : index
    %5 = vector.load %arg2[%c0_5, %c0_6] : memref<128x128xbf16, #tpu.memory_space<vmem>>, vector<128x128xbf16>
    %cst_7 = arith.constant dense<0.000000e+00> : vector<256x128xf32>
    %6 = tpu.matmul %4, %5, %cst_7 {dimension_numbers = #tpu.dot_dimension_numbers<[1], [0], [0], [1], [0, 0, 1, 1], [], []>} : vector<256x128xbf16>, vector<128x128xbf16>, vector<256x128xf32> -> vector<256x128xf32>
    %c0_8 = arith.constant 0 : index
    %c0_9 = arith.constant 0 : index
    %7 = vector.load %arg3[%c0_8, %c0_9] : memref<1x128xf32, #tpu.memory_space<vmem>>, vector<1x128xf32>
    %8 = vector.broadcast %7 : vector<1x128xf32> to vector<256x128xf32>
    %9 = arith.mulf %6, %8 : vector<256x128xf32>
    %c0_10 = arith.constant 0 : index
    %c0_11 = arith.constant 0 : index
    %10 = vector.load %arg4[%c0_10, %c0_11] : memref<1x128xf32, #tpu.memory_space<vmem>>, vector<1x128xf32>
    %11 = vector.broadcast %10 : vector<1x128xf32> to vector<256x128xf32>
    %12 = arith.addf %9, %11 : vector<256x128xf32>
    %13 = arith.negf %12 : vector<256x128xf32>
    %14 = math.exp %13 : vector<256x128xf32>
    %cst_12 = arith.constant 1.000000e+00 : f32
    %15 = vector.broadcast %cst_12 : f32 to vector<256x128xf32>
    %16 = arith.addf %15, %14 : vector<256x128xf32>
    %17 = arith.divf %15, %16 : vector<256x128xf32>
    %18 = arith.mulf %12, %17 : vector<256x128xf32>
    %c16 = arith.constant 16 : index
    %c0_13 = arith.constant 0 : index
    %19 = vector.load %arg9[%c16, %c0_13] : memref<288x128xf32, #tpu.memory_space<vmem>>, vector<256x128xf32>
    tpu.vector_store %arg9[%c16, %c0_13], %18 {strides = array<i32>} : memref<288x128xf32, #tpu.memory_space<vmem>>, vector<256x128xf32>,
    %20 = tpu.iota {dimensions = array<i32: 0>} : vector<256x1xi32>
    %c16_i32 = arith.constant 16 : i32
    %c0_i32 = arith.constant 0 : i32
    %21 = arith.cmpi eq, %c16_i32, %c0_i32 : i32
    %c1_i32 = arith.constant 1 : i32
    %22 = arith.select %21, %c1_i32, %c16_i32 : i32
    %23 = vector.broadcast %22 : i32 to vector<256x1xi32>
    %24 = arith.remsi %20, %23 : vector<256x1xi32>
    %c0_i32_14 = arith.constant 0 : i32
    %25 = vector.broadcast %c0_i32_14 : i32 to vector<256x1xi32>
    %26 = arith.cmpi ne, %24, %25 : vector<256x1xi32>
    %c0_i32_15 = arith.constant 0 : i32
    %27 = vector.broadcast %c0_i32_15 : i32 to vector<256x1xi32>
    %28 = arith.cmpi slt, %24, %27 : vector<256x1xi32>
    %c0_i32_16 = arith.constant 0 : i32
    %29 = arith.cmpi slt, %22, %c0_i32_16 : i32
    %30 = vector.broadcast %29 : i1 to vector<256x1xi1>
    %31 = vector.broadcast %30 : vector<256x1xi1> to vector<256x1xi1>
    %32 = arith.xori %28, %31 : vector<256x1xi1>
    %33 = arith.andi %32, %26 : vector<256x1xi1>
    %34 = vector.broadcast %22 : i32 to vector<256x1xi32>
    %35 = arith.addi %24, %34 : vector<256x1xi32>
    %36 = arith.select %33, %35, %24 : vector<256x1xi1>, vector<256x1xi32>
    %c1_i32_17 = arith.constant 1 : i32
    %37 = vector.broadcast %c1_i32_17 : i32 to vector<256x1xi32>
    %38 = arith.cmpi sge, %36, %37 : vector<256x1xi32>
    %c14_i32 = arith.constant 14 : i32
    %39 = vector.broadcast %c14_i32 : i32 to vector<256x1xi32>
    %40 = arith.cmpi sle, %36, %39 : vector<256x1xi32>
    %cst_18 = arith.constant 0.000000e+00 : f32
    %41 = vector.broadcast %cst_18 : f32 to vector<256x128xf32>
    %c0_19 = arith.constant 0 : index
    %c0_20 = arith.constant 0 : index
    %42 = vector.load %arg9[%c0_19, %c0_20] : memref<288x128xf32, #tpu.memory_space<vmem>>, vector<256x128xf32>
    %43 = arith.truncf %42 : vector<256x128xf32> to vector<256x128xbf16>
    %c1 = arith.constant 1 : index
    %c0_21 = arith.constant 0 : index
    %c0_22 = arith.constant 0 : index
    %44 = vector.load %arg5[%c1, %c0_21, %c0_22] : memref<9x128x128xbf16, #tpu.memory_space<vmem>>, vector<1x128x128xbf16>
    %45 = vector.shape_cast %44 : vector<1x128x128xbf16> to vector<128x128xbf16>
    %cst_23 = arith.constant dense<0.000000e+00> : vector<256x128xf32>
    %46 = tpu.matmul %43, %45, %cst_23 {dimension_numbers = #tpu.dot_dimension_numbers<[1], [0], [0], [1], [0, 0, 1, 1], [], []>} : vector<256x128xbf16>, vector<128x128xbf16>, vector<256x128xf32> -> vector<256x128xf32>
    %47 = arith.addf %41, %46 : vector<256x128xf32>
    %c1_i32_24 = arith.constant 1 : i32
    %48 = tpu.dynamic_rotate %42 by %c1_i32_24 dim 0 : vector<256x128xf32>, i32 -> vector<256x128xf32>
    %cst_25 = arith.constant 0.000000e+00 : f32
    %49 = vector.shape_cast %38 : vector<256x1xi1> to vector<256x1xi1>
    %50 = vector.broadcast %49 : vector<256x1xi1> to vector<256x128xi1>
    %51 = vector.broadcast %cst_25 : f32 to vector<256x128xf32>
    %52 = arith.select %50, %48, %51 : vector<256x128xi1>, vector<256x128xf32>
    %53 = arith.truncf %52 : vector<256x128xf32> to vector<256x128xbf16>
    %c0_26 = arith.constant 0 : index
    %c0_27 = arith.constant 0 : index
    %c0_28 = arith.constant 0 : index
    %54 = vector.load %arg5[%c0_26, %c0_27, %c0_28] : memref<9x128x128xbf16, #tpu.memory_space<vmem>>, vector<1x128x128xbf16>
    %55 = vector.shape_cast %54 : vector<1x128x128xbf16> to vector<128x128xbf16>
    %cst_29 = arith.constant dense<0.000000e+00> : vector<256x128xf32>
    %56 = tpu.matmul %53, %55, %cst_29 {dimension_numbers = #tpu.dot_dimension_numbers<[1], [0], [0], [1], [0, 0, 1, 1], [], []>} : vector<256x128xbf16>, vector<128x128xbf16>, vector<256x128xf32> -> vector<256x128xf32>
    %57 = arith.addf %47, %56 : vector<256x128xf32>
    %c255_i32 = arith.constant 255 : i32
    %58 = tpu.dynamic_rotate %42 by %c255_i32 dim 0 : vector<256x128xf32>, i32 -> vector<256x128xf32>
    %cst_30 = arith.constant 0.000000e+00 : f32
    %59 = vector.shape_cast %40 : vector<256x1xi1> to vector<256x1xi1>
    %60 = vector.broadcast %59 : vector<256x1xi1> to vector<256x128xi1>
    %61 = vector.broadcast %cst_30 : f32 to vector<256x128xf32>
    %62 = arith.select %60, %58, %61 : vector<256x128xi1>, vector<256x128xf32>
    %63 = arith.truncf %62 : vector<256x128xf32> to vector<256x128xbf16>
    %c2 = arith.constant 2 : index
    %c0_31 = arith.constant 0 : index
    %c0_32 = arith.constant 0 : index
    %64 = vector.load %arg5[%c2, %c0_31, %c0_32] : memref<9x128x128xbf16, #tpu.memory_space<vmem>>, vector<1x128x128xbf16>
    %65 = vector.shape_cast %64 : vector<1x128x128xbf16> to vector<128x128xbf16>
    %cst_33 = arith.constant dense<0.000000e+00> : vector<256x128xf32>
    %66 = tpu.matmul %63, %65, %cst_33 {dimension_numbers = #tpu.dot_dimension_numbers<[1], [0], [0], [1], [0, 0, 1, 1], [], []>} : vector<256x128xbf16>, vector<128x128xbf16>, vector<256x128xf32> -> vector<256x128xf32>
    %67 = arith.addf %57, %66 : vector<256x128xf32>
    %c16_34 = arith.constant 16 : index
    %c0_35 = arith.constant 0 : index
    %68 = vector.load %arg9[%c16_34, %c0_35] : memref<288x128xf32, #tpu.memory_space<vmem>>, vector<256x128xf32>
    %69 = arith.truncf %68 : vector<256x128xf32> to vector<256x128xbf16>
    %c4 = arith.constant 4 : index
    %c0_36 = arith.constant 0 : index
    %c0_37 = arith.constant 0 : index
    %70 = vector.load %arg5[%c4, %c0_36, %c0_37] : memref<9x128x128xbf16, #tpu.memory_space<vmem>>, vector<1x128x128xbf16>
    %71 = vector.shape_cast %70 : vector<1x128x128xbf16> to vector<128x128xbf16>
    %cst_38 = arith.constant dense<0.000000e+00> : vector<256x128xf32>
    %72 = tpu.matmul %69, %71, %cst_38 {dimension_numbers = #tpu.dot_dimension_numbers<[1], [0], [0], [1], [0, 0, 1, 1], [], []>} : vector<256x128xbf16>, vector<128x128xbf16>, vector<256x128xf32> -> vector<256x128xf32>
    %73 = arith.addf %67, %72 : vector<256x128xf32>
    %c1_i32_39 = arith.constant 1 : i32
    %74 = tpu.dynamic_rotate %68 by %c1_i32_39 dim 0 : vector<256x128xf32>, i32 -> vector<256x128xf32>
    %cst_40 = arith.constant 0.000000e+00 : f32
    %75 = vector.shape_cast %38 : vector<256x1xi1> to vector<256x1xi1>
    %76 = vector.broadcast %75 : vector<256x1xi1> to vector<256x128xi1>
    %77 = vector.broadcast %cst_40 : f32 to vector<256x128xf32>
    %78 = arith.select %76, %74, %77 : vector<256x128xi1>, vector<256x128xf32>
    %79 = arith.truncf %78 : vector<256x128xf32> to vector<256x128xbf16>
    %c3 = arith.constant 3 : index
    %c0_41 = arith.constant 0 : index
    %c0_42 = arith.constant 0 : index
    %80 = vector.load %arg5[%c3, %c0_41, %c0_42] : memref<9x128x128xbf16, #tpu.memory_space<vmem>>, vector<1x128x128xbf16>
    %81 = vector.shape_cast %80 : vector<1x128x128xbf16> to vector<128x128xbf16>
    %cst_43 = arith.constant dense<0.000000e+00> : vector<256x128xf32>
    %82 = tpu.matmul %79, %81, %cst_43 {dimension_numbers = #tpu.dot_dimension_numbers<[1], [0], [0], [1], [0, 0, 1, 1], [], []>} : vector<256x128xbf16>, vector<128x128xbf16>, vector<256x128xf32> -> vector<256x128xf32>
    %83 = arith.addf %73, %82 : vector<256x128xf32>
    %c255_i32_44 = arith.constant 255 : i32
    %84 = tpu.dynamic_rotate %68 by %c255_i32_44 dim 0 : vector<256x128xf32>, i32 -> vector<256x128xf32>
    %cst_45 = arith.constant 0.000000e+00 : f32
    %85 = vector.shape_cast %40 : vector<256x1xi1> to vector<256x1xi1>
    %86 = vector.broadcast %85 : vector<256x1xi1> to vector<256x128xi1>
    %87 = vector.broadcast %cst_45 : f32 to vector<256x128xf32>
    %88 = arith.select %86, %84, %87 : vector<256x128xi1>, vector<256x128xf32>
    %89 = arith.truncf %88 : vector<256x128xf32> to vector<256x128xbf16>
    %c5 = arith.constant 5 : index
    %c0_46 = arith.constant 0 : index
    %c0_47 = arith.constant 0 : index
    %90 = vector.load %arg5[%c5, %c0_46, %c0_47] : memref<9x128x128xbf16, #tpu.memory_space<vmem>>, vector<1x128x128xbf16>
    %91 = vector.shape_cast %90 : vector<1x128x128xbf16> to vector<128x128xbf16>
    %cst_48 = arith.constant dense<0.000000e+00> : vector<256x128xf32>
    %92 = tpu.matmul %89, %91, %cst_48 {dimension_numbers = #tpu.dot_dimension_numbers<[1], [0], [0], [1], [0, 0, 1, 1], [], []>} : vector<256x128xbf16>, vector<128x128xbf16>, vector<256x128xf32> -> vector<256x128xf32>
    %93 = arith.addf %83, %92 : vector<256x128xf32>
    %c32 = arith.constant 32 : index
    %c0_49 = arith.constant 0 : index
    %94 = vector.load %arg9[%c32, %c0_49] : memref<288x128xf32, #tpu.memory_space<vmem>>, vector<256x128xf32>
    %95 = arith.truncf %94 : vector<256x128xf32> to vector<256x128xbf16>
    %c7 = arith.constant 7 : index
    %c0_50 = arith.constant 0 : index
    %c0_51 = arith.constant 0 : index
    %96 = vector.load %arg5[%c7, %c0_50, %c0_51] : memref<9x128x128xbf16, #tpu.memory_space<vmem>>, vector<1x128x128xbf16>
    %97 = vector.shape_cast %96 : vector<1x128x128xbf16> to vector<128x128xbf16>
    %cst_52 = arith.constant dense<0.000000e+00> : vector<256x128xf32>
    %98 = tpu.matmul %95, %97, %cst_52 {dimension_numbers = #tpu.dot_dimension_numbers<[1], [0], [0], [1], [0, 0, 1, 1], [], []>} : vector<256x128xbf16>, vector<128x128xbf16>, vector<256x128xf32> -> vector<256x128xf32>
    %99 = arith.addf %93, %98 : vector<256x128xf32>
    %c1_i32_53 = arith.constant 1 : i32
    %100 = tpu.dynamic_rotate %94 by %c1_i32_53 dim 0 : vector<256x128xf32>, i32 -> vector<256x128xf32>
    %cst_54 = arith.constant 0.000000e+00 : f32
    %101 = vector.shape_cast %38 : vector<256x1xi1> to vector<256x1xi1>
    %102 = vector.broadcast %101 : vector<256x1xi1> to vector<256x128xi1>
    %103 = vector.broadcast %cst_54 : f32 to vector<256x128xf32>
    %104 = arith.select %102, %100, %103 : vector<256x128xi1>, vector<256x128xf32>
    %105 = arith.truncf %104 : vector<256x128xf32> to vector<256x128xbf16>
    %c6 = arith.constant 6 : index
    %c0_55 = arith.constant 0 : index
    %c0_56 = arith.constant 0 : index
    %106 = vector.load %arg5[%c6, %c0_55, %c0_56] : memref<9x128x128xbf16, #tpu.memory_space<vmem>>, vector<1x128x128xbf16>
    %107 = vector.shape_cast %106 : vector<1x128x128xbf16> to vector<128x128xbf16>
    %cst_57 = arith.constant dense<0.000000e+00> : vector<256x128xf32>
    %108 = tpu.matmul %105, %107, %cst_57 {dimension_numbers = #tpu.dot_dimension_numbers<[1], [0], [0], [1], [0, 0, 1, 1], [], []>} : vector<256x128xbf16>, vector<128x128xbf16>, vector<256x128xf32> -> vector<256x128xf32>
    %109 = arith.addf %99, %108 : vector<256x128xf32>
    %c255_i32_58 = arith.constant 255 : i32
    %110 = tpu.dynamic_rotate %94 by %c255_i32_58 dim 0 : vector<256x128xf32>, i32 -> vector<256x128xf32>
    %cst_59 = arith.constant 0.000000e+00 : f32
    %111 = vector.shape_cast %40 : vector<256x1xi1> to vector<256x1xi1>
    %112 = vector.broadcast %111 : vector<256x1xi1> to vector<256x128xi1>
    %113 = vector.broadcast %cst_59 : f32 to vector<256x128xf32>
    %114 = arith.select %112, %110, %113 : vector<256x128xi1>, vector<256x128xf32>
    %115 = arith.truncf %114 : vector<256x128xf32> to vector<256x128xbf16>
    %c8 = arith.constant 8 : index
    %c0_60 = arith.constant 0 : index
    %c0_61 = arith.constant 0 : index
    %116 = vector.load %arg5[%c8, %c0_60, %c0_61] : memref<9x128x128xbf16, #tpu.memory_space<vmem>>, vector<1x128x128xbf16>
    %117 = vector.shape_cast %116 : vector<1x128x128xbf16> to vector<128x128xbf16>
    %cst_62 = arith.constant dense<0.000000e+00> : vector<256x128xf32>
    %118 = tpu.matmul %115, %117, %cst_62 {dimension_numbers = #tpu.dot_dimension_numbers<[1], [0], [0], [1], [0, 0, 1, 1], [], []>} : vector<256x128xbf16>, vector<128x128xbf16>, vector<256x128xf32> -> vector<256x128xf32>
    %119 = arith.addf %109, %118 : vector<256x128xf32>
    %c0_63 = arith.constant 0 : index
    %c0_64 = arith.constant 0 : index
    %120 = vector.load %arg6[%c0_63, %c0_64] : memref<1x128xf32, #tpu.memory_space<vmem>>, vector<1x128xf32>
    %121 = vector.broadcast %120 : vector<1x128xf32> to vector<256x128xf32>
    %122 = arith.mulf %119, %121 : vector<256x128xf32>
    %c0_65 = arith.constant 0 : index
    %c0_66 = arith.constant 0 : index
    %123 = vector.load %arg7[%c0_65, %c0_66] : memref<1x128xf32, #tpu.memory_space<vmem>>, vector<1x128xf32>
    %124 = vector.broadcast %123 : vector<1x128xf32> to vector<256x128xf32>
    %125 = arith.addf %122, %124 : vector<256x128xf32>
    %126 = arith.negf %125 : vector<256x128xf32>
    %127 = math.exp %126 : vector<256x128xf32>
    %cst_67 = arith.constant 1.000000e+00 : f32
    %128 = vector.broadcast %cst_67 : f32 to vector<256x128xf32>
    %129 = arith.addf %128, %127 : vector<256x128xf32>
    %130 = arith.divf %128, %129 : vector<256x128xf32>
    %131 = arith.mulf %125, %130 : vector<256x128xf32>
    %c0_68 = arith.constant 0 : index
    %c0_69 = arith.constant 0 : index
    %c0_70 = arith.constant 0 : index
    %132 = vector.load %arg1[%c0_68, %c0_69, %c0_70] : memref<1x256x128xbf16, #tpu.memory_space<vmem>>, vector<1x256x128xbf16>
    %133 = vector.shape_cast %132 : vector<1x256x128xbf16> to vector<256x128xbf16>
    %134 = arith.extf %133 : vector<256x128xbf16> to vector<256x128xf32>
    %135 = arith.addf %131, %134 : vector<256x128xf32>
    %c0_71 = arith.constant 0 : index
    %c0_72 = arith.constant 0 : index
    %c0_73 = arith.constant 0 : index
    %136 = vector.load %arg8[%c0_71, %c0_72, %c0_73] : memref<1x256x128xf32, #tpu.memory_space<vmem>>, vector<1x256x128xf32>
    %137 = vector.shape_cast %136 : vector<1x256x128xf32> to vector<256x128xf32>
    %138 = vector.shape_cast %135 : vector<256x128xf32> to vector<1x256x128xf32>
    tpu.vector_store %arg8[%c0_71, %c0_72, %c0_73], %138 {strides = array<i32>} : memref<1x256x128xf32, #tpu.memory_space<vmem>>, vector<1x256x128xf32>,
    return
  }
  func.func @transform_0(%arg0: i32) -> (i32, i32, i32) {
    %c0_i32 = arith.constant 0 : i32
    %c0_i32_0 = arith.constant 0 : i32
    %c0_i32_1 = arith.constant 0 : i32
    return %arg0, %c0_i32, %c0_i32_0 : i32, i32, i32
  }
  func.func @transform_1(%arg0: i32) -> (i32, i32) {
    %c0_i32 = arith.constant 0 : i32
    %c0_i32_0 = arith.constant 0 : i32
    %c0_i32_1 = arith.constant 0 : i32
    return %c0_i32, %c0_i32_0 : i32, i32
  }
  func.func @transform_2(%arg0: i32) -> (i32, i32) {
    %c0_i32 = arith.constant 0 : i32
    %c0_i32_0 = arith.constant 0 : i32
    %c0_i32_1 = arith.constant 0 : i32
    return %c0_i32, %c0_i32_0 : i32, i32
  }
  func.func @transform_3(%arg0: i32) -> (i32, i32) {
    %c0_i32 = arith.constant 0 : i32
    %c0_i32_0 = arith.constant 0 : i32
    %c0_i32_1 = arith.constant 0 : i32
    return %c0_i32, %c0_i32_0 : i32, i32
  }
  func.func @transform_4(%arg0: i32) -> (i32, i32, i32) {
    %c0_i32 = arith.constant 0 : i32
    %c0_i32_0 = arith.constant 0 : i32
    %c0_i32_1 = arith.constant 0 : i32
    %c0_i32_2 = arith.constant 0 : i32
    return %c0_i32, %c0_i32_0, %c0_i32_1 : i32, i32, i32
  }
  func.func @transform_5(%arg0: i32) -> (i32, i32) {
    %c0_i32 = arith.constant 0 : i32
    %c0_i32_0 = arith.constant 0 : i32
    %c0_i32_1 = arith.constant 0 : i32
    return %c0_i32, %c0_i32_0 : i32, i32
  }
  func.func @transform_6(%arg0: i32) -> (i32, i32) {
    %c0_i32 = arith.constant 0 : i32
    %c0_i32_0 = arith.constant 0 : i32
    %c0_i32_1 = arith.constant 0 : i32
    return %c0_i32, %c0_i32_0 : i32, i32
  }
  func.func @transform_7(%arg0: i32) -> (i32, i32, i32) {
    %c0_i32 = arith.constant 0 : i32
    %c0_i32_0 = arith.constant 0 : i32
    %c0_i32_1 = arith.constant 0 : i32
    return %arg0, %c0_i32, %c0_i32_0 : i32, i32, i32
  }
}

</mosaic_0001>

<bundles_post_ra>
// kernel: tpu_custom_call.1
= control target key start
LH: loop header
LB: loop body
LE: loop exit
PB: predicated region body
PF: predicated region fallthrough
CT: control target
= control target key end

     0   :  { %12 = vsyncpa [#allocation4], 0  ;;  %s9415_s0 = inlined_call_operand.hbm [shape: bf16[2,256,128], index: 0, kind: input, shape index: {}]   ;;  %s9416_s1 = inlined_call_operand.hbm [shape: bf16[128,128], index: 1, kind: input, shape index: {}]   ;;  %s9417_s2 = inlined_call_operand.vmem [shape: f32[1,128], index: 2, kind: input, shape index: {}]   ;;  %s9418_s3 = inlined_call_operand.vmem [shape: f32[1,128], index: 3, kind: input, shape index: {}]   ;;  %s9419_s4 = inlined_call_operand.hbm [shape: bf16[9,128,128], index: 4, kind: input, shape index: {}]   ;;  %s9420_s5 = inlined_call_operand.vmem [shape: f32[1,128], index: 5, kind: input, shape index: {}]   ;;  %s9421_s6 = inlined_call_operand.vmem [shape: f32[1,128], index: 6, kind: input, shape index: {}]   ;;  %s9422_s7 = inlined_call_operand.hbm [shape: f32[2,256,128], index: 7, kind: output, shape index: {}]  }
   0x1   :  { %14 = vsyncpa [#allocation4 + $0x1], 0 }
   0x2   :  { %15 = vsyncpa [#allocation7], 0 }
   0x3   :  { %16 = vsyncpa [#allocation5], 0 }
   0x4   :  { %18 = vsyncpa [#allocation5 + $0x1], 0  ;;  %s7400_s24 = smov 0   ;;  %s7402_s25 = smov 0  }
   0x5   :  { %s7404_s26 = smov 0   ;;  %s7406_s27 = smov 0  }
   0x6 LB: > { %s7421_s28 = sadd.s32 4294967295, %s7347_s27   ;;  %s5238_s29 = sadd.s32 4294967294, %s7347_s27   ;;  %s7347_s27 = sphi %s7406_s27, %s9772_s27   ;;  %s7343_s26 = sphi %s7404_s26, %s9771_s26   ;;  %s7339_s25 = sphi %s7402_s25, %s9770_s25   ;;  %s7335_s24 = sphi %s7400_s24, %s9769_s24  }
   0x7   : > { %p44_p0 = scmp.ne.s32.totalorder %s7339_s25, %s7335_s24  ;;  %p9423_p1 = scmp.eq.s32.totalorder %s7421_s28, 0 }
   0x8   : > { %p200_p3 = scmp.eq.s32.totalorder %s5238_s29, 1  ;;  %p5239_p5 = scmp.ge.s32.totalorder %s7347_s27, 1 }
   0x9   : > { %p7430_p4 = por %p9423_p1, %p44_p0  ;;  %p207_p7 = scmp.lt.s32.totalorder %s7347_s27, 3 }
   0xa   : > { %p7435_p6 = por %p200_p3, %p44_p0  ;;  %s7349_s10 = smov [#allocation6]  }
   0xb   : > { %s9515_s30 = scalar_select %p7430_p4, 1, 0 }
   0xc   : > { %s9516_s8 = scalar_select %p7435_p6, 1, 0 }
   0xd   : > { %p7440_p8 = pnand %p5239_p5, %p207_p7  ;;  %s219_s11 = sshll.u32 %s7349_s10, 4  ;;  %s7444_s11 = int_to_ptr.vmem [resolvable:$true] %s219_s11 }
   0xe   : > { %s7350_s13 = smov [#allocation8]   ;;  %s7191_s17 = scalar_lea.hbm %s9416_s1, 1024 }
   0xf   : > { %p6777_p9 = pneg %p7440_p8  ;;  %s238_s14 = sshll.u32 %s7350_s13, 4  ;;  %s7455_s14 = int_to_ptr.vmem [resolvable:$true] %s238_s14 }
  0x10   : > { %p7192_p12 = scmp.ne.s32.totalorder %s9416_s1, %s7191_s17  ;;  %p7198_p5 = scmp.lt.u32.totalorder %s7191_s17, %s9416_s1 }
  0x11   : > { %p7451_p11 = pnand %p6777_p9, %p9423_p1 }
  0x13   : > { %p7193_p13 = pneg %p7451_p11 }
  0x15   : > { %p7194_p0 = pnand %p7193_p13, %p7192_p12 }
  0x17   : > { %p7195_p3 = pneg %p7194_p0 }
  0x19   : > { %p7200_p7 = pnand %p7198_p5, %p7195_p3 }
  0x1b   : > { %7203 = shalt.err (!%p7200_p7)
}
  0x1c   : > { %s7204_s22 = scalar_lea.vmem %s7444_s11, 1024  ;;  %p7212_p2 = scmp.lt.s32.totalorder %s7444_s11, %s7444_s11 }
  0x1d   : > { %p7205_p9 = scmp.ne.s32.totalorder %s7444_s11, %s7204_s22  ;;  %p7213_p12 = scmp.lt.s32.totalorder %s7204_s22, %s7204_s22 }
  0x1f   : > { %p7207_p10 = pnand %p7205_p9, %p7193_p13  ;;  %p7214_p0 = por %p7213_p12, %p7212_p2 }
  0x21   : > { %p7208_p1 = pneg %p7207_p10 }
  0x23   : > { %p7215_p6 = pnand %p7214_p0, %p7208_p1 }
  0x25   : > { %7218 = shalt.err (!%p7215_p6)
}
  0x26   : > { %s9424_s23 = smov 64   ;;  %s7352_s29 = smov 4  }
  0x27   : > { %6780 = dma.hbm_to_vmem [thread:$0]  (!%p7451_p11), %s9416_s1, 1024, %s7444_s11, [#allocation7], %s9424_s23, %s9424_s23, %s7352_s29  }
  0x28   : > { %s7219_s17 = scalar_lea.hbm %s9419_s4, 9216 }
  0x29   : > { %p7220_p1 = scmp.ne.s32.totalorder %s9419_s4, %s7219_s17  ;;  %p7226_p10 = scmp.lt.u32.totalorder %s7219_s17, %s9419_s4 }
  0x2b   : > { %p7222_p2 = pnand %p7220_p1, %p7193_p13 }
  0x2d   : > { %p7223_p6 = pneg %p7222_p2 }
  0x2f   : > { %p7228_p3 = pnand %p7226_p10, %p7223_p6 }
  0x31   : > { %7231 = shalt.err (!%p7228_p3)
}
  0x32   : > { %s7232_s11 = scalar_lea.vmem %s7455_s14, 9216  ;;  %p7240_p12 = scmp.lt.s32.totalorder %s7455_s14, %s7455_s14 }
  0x33   : > { %p7233_p5 = scmp.ne.s32.totalorder %s7455_s14, %s7232_s11  ;;  %p7241_p0 = scmp.lt.s32.totalorder %s7232_s11, %s7232_s11 }
  0x35   : > { %p7235_p7 = pnand %p7233_p5, %p7193_p13  ;;  %p7242_p1 = por %p7241_p0, %p7240_p12 }
  0x37   : > { %p7236_p9 = pneg %p7235_p7 }
  0x39   : > { %p7243_p2 = pnand %p7242_p1, %p7236_p9 }
  0x3b   : > { %7246 = shalt.err (!%p7243_p2)
}
  0x3c   : > { %6783 = dma.hbm_to_vmem [thread:$0]  (!%p7451_p11), %s9419_s4, 9216, %s7455_s14, [#allocation7], %s9424_s23, %s9424_s23, %s7352_s29  }
  0x3d   : > { %s7516_s12 = sadd.s32 1, %s7347_s27   ;;  %s31_s13 = sadd.s32 1, %s7343_s26 }
  0x3e   : > { %s28_s15 = ssub.s32 %s7347_s27, %s7516_s12  ;;  %p38_p13 = scmp.ne.s32.totalorder %s7343_s26, %s7339_s25 }
  0x3f   : > { %p29_p6 = scmp.eq.s32.totalorder %s28_s15, 0  ;;  %p39_p10 = scmp.eq.s32.totalorder %s7347_s27, 0 }
  0x40   : > { %p9519_p3 = scmp.eq.s32.totalorder %s7421_s28, 1  ;;  %p6794_p7 = scmp.lt.s32.totalorder %s7347_s27, 2 }
  0x41   : > { %s7532_s17 = scalar_select %p29_p6, %s7343_s26, %s31_s13  }
  0x42   : > { %p7526_p5 = por %p9519_p3, %p38_p13  ;;  %p40_p9 = por %p39_p10, %p38_p13 }
  0x43   : > { %s258_s18 = sand.u32 1, %s7343_s26   ;;  %s5708_s14 = sshll.u32 %s7347_s27, 11 }
  0x44   : > { %s9520_s16 = scalar_select %p7526_p5, 1, 0 }
  0x45   : > { %s5243_s19 = sshll.u32 %s258_s18, 7  ;;  %s7539_s11 = scalar_lea.hbm %s9415_s0, %s5708_s14 }
  0x46   : > { %s262_s22 = scalar_lea.vmem [#allocation3], %s5243_s19  ;;  %p7543_p11 = pnand %p6794_p7, %p40_p9 }
  0x47   : > { %s269_s10 = sshll.u32 %s262_s22, 4  ;;  %s7547_s15 = scalar_lea.sflag [#allocation4], %s258_s18  ;;  %s7541_s10 = int_to_ptr.vmem [resolvable:$true] %s269_s10 }
  0x48   : > { %s7247_s23 = scalar_lea.hbm %s7539_s11, 2048  ;;  %p7249_p0 = pneg %p7543_p11 }
  0x49   : > { %p7248_p12 = scmp.ne.s32.totalorder %s7539_s11, %s7247_s23  ;;  %s7252_s20 = scalar_lea.hbm %s9415_s0, 4096 }
  0x4a   : > { %p7253_p13 = scmp.lt.u32.totalorder %s7539_s11, %s9415_s0  ;;  %p7254_p6 = scmp.lt.u32.totalorder %s7252_s20, %s7247_s23 }
  0x4b   : > { %p7250_p1 = pnand %p7249_p0, %p7248_p12  ;;  %p7256_p3 = scmp.lt.u32.totalorder %s7247_s23, %s7539_s11 }
  0x4c   : > { %p7255_p10 = por %p7254_p6, %p7253_p13 }
  0x4d   : > { %p7251_p2 = pneg %p7250_p1 }
  0x4e   : > { %p7257_p7 = por %p7256_p3, %p7255_p10 }
  0x50   : > { %p7258_p9 = pnand %p7257_p7, %p7251_p2 }
  0x52   : > { %7261 = shalt.err (!%p7258_p9)
}
  0x53   : > { %s7262_s18 = scalar_lea.vmem %s7541_s10, 2048  ;;  %s7353_s19 = smov [#allocation3]  }
  0x54   : > { %p7263_p12 = scmp.ne.s32.totalorder %s7541_s10, %s7262_s18  ;;  %s7267_s14 = sshll.u32 %s7353_s19, 4  ;;  %s7268_s14 = int_to_ptr.vmem [resolvable:$false] %s7267_s14 }
  0x55   : > { %s7269_s21 = scalar_lea.vmem %s7268_s14, 4096  ;;  %p7270_p4 = scmp.lt.s32.totalorder %s7541_s10, %s7268_s14 }
  0x56   : > { %p7265_p1 = pnand %p7263_p12, %p7249_p0  ;;  %p7271_p13 = scmp.lt.s32.totalorder %s7269_s21, %s7262_s18 }
  0x58   : > { %p7266_p5 = pneg %p7265_p1  ;;  %p7272_p6 = por %p7271_p13, %p7270_p4 }
  0x5a   : > { %p7273_p10 = pnand %p7272_p6, %p7266_p5 }
  0x5c   : > { %7276 = shalt.err (!%p7273_p10)
}
  0x5d   : > { %s9522_s23 = smov 64   ;;  %281 = sbr.rel (%p7440_p8) target bundleno = 1045 (0x415), region = 48 }
  0x5e   : > { %6787 = dma.hbm_to_vmem [thread:$0]  (!%p7543_p11), %s7539_s11, 2048, %s7541_s10, %s7547_s15, %s9522_s23, %s9522_s23, %s7352_s29  }
  0x64   : > { %s7581_s20 = sand.u32 1, %s7339_s25   ;;  %p9523_p4 = scmp.ne.s32.totalorder %s9515_s30, 0 }
  0x65   : > { %s5247_s22 = sshll.u32 %s7581_s20, 7  ;;  %s284_s18 = scalar_lea.sflag [#allocation4], %s7581_s20 }
  0x66   : > { %s7585_s19 = scalar_lea.vmem [#allocation3], %s5247_s22 }
  0x67   : > { %7322 = dma.done.wait (%p9523_p4), %s284_s18, 2048  }
  0x68   : > { %7324 = vsyncadd (%p9523_p4), %s284_s18, 4294965248  ;;  %p9524_p5 = scmp.eq.s32.totalorder %s7421_s28, 0 }
  0x6a   : > { %7326 = dma.done.wait (%p9524_p5), [#allocation7], 10240   ;;  %p9525_p8 = pmov %p9524_p5 }
  0x6b   : > { %v6839_v0 = vld [vmem:[#allocation6] sm:$0xff]   ;;  %v6840_v1 = vld [vmem:[#allocation6 + $0x8] sm:$0xff]   ;;  %v6841_v2 = vld [vmem:[#allocation6 + $0x10] sm:$0xff]   ;;  %vm9476_vm6 = vmmov 1   ;;  %s5250_s21 = sshll.u32 %s7581_s20, 8  ;;  %s5709_s22 = sshll.u32 %s7421_s28, 12 }
  0x6c   : > { %7328 = vsyncadd (%p9525_p8), [#allocation7], 4294957056  ;;  %6029 = vmatprep.subr.bf16.mxu0 %v6839_v0  ;;  %v6842_v3 = vld [vmem:[#allocation6 + $0x18] sm:$0xff]   ;;  %v6847_v4 = vld [vmem:[%s7585_s19] sm:$0xff]   ;;  %s9166_s23 = scalar_lea.vmem [#allocation9], %s5250_s21  ;;  %s9367_s9 = scalar_lea.hbm %s9422_s7, %s5709_s22 }
  0x6d   : > { %6030 = vmatpush3.bf16.msra.mxu0 %v6839_v0  ;;  %6045 = vmatprep.mubr.bf16.mxu0 %v6847_v4  ;;  %v6843_v5 = vld [vmem:[#allocation6 + $0x20] sm:$0xff]   ;;  %v6844_v6 = vld [vmem:[#allocation6 + $0x28] sm:$0xff]   ;;  %v6845_v7 = vld [vmem:[#allocation6 + $0x30] sm:$0xff]   ;;  %s5146_s18 = sshll.u32 %s9166_s23, 4  ;;  %s5133_s28 = scalar_lea.sflag [#allocation5], %s7581_s20  ;;  %s9369_s18 = int_to_ptr.vmem [resolvable:$true] %s5146_s18 }
  0x6e   : > { %6031 = vmatprep.subr.bf16.mxu0 %v6840_v1  ;;  %v6846_v8 = vld [vmem:[#allocation6 + $0x38] sm:$0xff]   ;;  %v6848_v9 = vld [vmem:[%s7585_s19 + $0x8] sm:$0xff]   ;;  %v6849_v10 = vld [vmem:[%s7585_s19 + $0x10] sm:$0xff]   ;;  %s7277_s29 = scalar_lea.vmem %s9369_s18, 4096  ;;  %p9766_p0 = scmp.ne.s32.totalorder %s9520_s16, 0 }
  0x6f   : > { %v6850_v11 = vld [vmem:[%s7585_s19 + $0x18] sm:$0xff]   ;;  %v6851_v12 = vld [vmem:[%s7585_s19 + $0x20] sm:$0xff]   ;;  %v6852_v13 = vld [vmem:[%s7585_s19 + $0x28] sm:$0xff]   ;;  %p7278_p11 = scmp.ne.s32.totalorder %s9369_s18, %s7277_s29  ;;  %s7357_s11 = smov [#allocation9]  }
  0x70   : > { %v6853_v14 = vld [vmem:[%s7585_s19 + $0x30] sm:$0xff]   ;;  %v6854_v15 = vld [vmem:[%s7585_s19 + $0x38] sm:$0xff]   ;;  %v6855_v16 = vld [vmem:[%s7585_s19 + $0x40] sm:$0xff]   ;;  %s7281_s10 = sshll.u32 %s7357_s11, 4  ;;  %s7282_s10 = int_to_ptr.vmem [resolvable:$false] %s7281_s10 }
  0x71   : > { %6032 = vmatpush3.bf16.msra.mxu0 %v6840_v1  ;;  %v6856_v17 = vld [vmem:[%s7585_s19 + $0x48] sm:$0xff]   ;;  %v6857_v18 = vld [vmem:[%s7585_s19 + $0x50] sm:$0xff]   ;;  %v6858_v19 = vld [vmem:[%s7585_s19 + $0x58] sm:$0xff]   ;;  %p7279_p2 = pnand %p7278_p11, %p9766_p0  ;;  %s7283_s13 = scalar_lea.vmem %s7282_s10, 8192 }
  0x72   : > { %6033 = vmatprep.subr.bf16.mxu0 %v6841_v2  ;;  %v6859_v20 = vld [vmem:[%s7585_s19 + $0x60] sm:$0xff]   ;;  %v6860_v21 = vld [vmem:[%s7585_s19 + $0x68] sm:$0xff]   ;;  %v6861_v22 = vld [vmem:[%s7585_s19 + $0x70] sm:$0xff]   ;;  %p7284_p7 = scmp.lt.s32.totalorder %s9369_s18, %s7282_s10  ;;  %p7285_p9 = scmp.lt.s32.totalorder %s7283_s13, %s7277_s29 }
  0x73   : > { %v6862_v23 = vld [vmem:[%s7585_s19 + $0x78] sm:$0xff]   ;;  %v6863_v24 = vld [vmem:[#allocation8 + $0xc0] sm:$0xff]   ;;  %v6865_v26 = vld [vmem:[#allocation8 + $0xc8] sm:$0xff]   ;;  %p7280_p3 = pneg %p7279_p2 }
  0x74   : > { %v6864_v25 = vld [vmem:[#allocation8] sm:$0xff]   ;;  %6269 = vmatprep.subr.bf16.mxu1 %v6863_v24  ;;  %v6866_v27 = vld [vmem:[#allocation8 + $0x8] sm:$0xff]   ;;  %v6867_v28 = vld [vmem:[#allocation8 + $0xd0] sm:$0xff]   ;;  %p7286_p12 = por %p7285_p9, %p7284_p7 }
  0x75   : > { %6034 = vmatpush3.bf16.msra.mxu0 %v6841_v2  ;;  %6270 = vmatpush3.bf16.msra.mxu1 %v6863_v24  ;;  %v6868_v29 = vld [vmem:[#allocation8 + $0x10] sm:$0xff]   ;;  %v6869_v30 = vld [vmem:[#allocation8 + $0xd8] sm:$0xff]   ;;  %v6871_v32 = vld [vmem:[#allocation8 + $0xe0] sm:$0xff]  }
  0x76   : > { %6035 = vmatprep.subr.bf16.mxu0 %v6842_v3  ;;  %6271 = vmatprep.subr.bf16.mxu1 %v6865_v26  ;;  %v6870_v31 = vld [vmem:[#allocation8 + $0x18] sm:$0xff]   ;;  %v6872_v33 = vld [vmem:[#allocation8 + $0x20] sm:$0xff]   ;;  %v6873_v34 = vld [vmem:[#allocation8 + $0xe8] sm:$0xff]   ;;  %p7287_p1 = pnand %p7286_p12, %p7280_p3 }
  0x77   : > { %v6874_v35 = vld [vmem:[#allocation8 + $0x28] sm:$0xff]   ;;  %v6875_v36 = vld [vmem:[#allocation8 + $0xf0] sm:$0xff]   ;;  %v6877_v38 = vld [vmem:[#allocation8 + $0xf8] sm:$0xff]  }
  0x78   : > { %v6876_v37 = vld [vmem:[#allocation8 + $0x30] sm:$0xff]   ;;  %v6878_v39 = vld [vmem:[#allocation8 + $0x38] sm:$0xff]   ;;  %v7611_v40 = vld [vmem:[#allocation8 + $0x140] sm:$0xff]  }
  0x79   : > { %6036 = vmatpush3.bf16.msra.mxu0 %v6842_v3  ;;  %6272 = vmatpush3.bf16.msra.mxu1 %v6865_v26  ;;  %v7617_v41 = vld [vmem:[%s9417_s2] ss:$0 sm:$0xff] }
  0x7a   : > { %6037 = vmatprep.subr.bf16.mxu0 %v6843_v5  ;;  %6273 = vmatprep.subr.bf16.mxu1 %v6867_v28  ;;  %v7622_v43 = vld [vmem:[%s9418_s3] ss:$0 sm:$0xff] }
  0x7b   : > { %v7649_v2 = vld [vmem:[#allocation8 + $0x40] sm:$0xff]  }
  0x7c   : > { %9526 = vst [vmem:[#allocation13_spill] sm:$0xff] %v7649_v2 }
  0x7d   : > { %6038 = vmatpush3.bf16.msra.mxu0 %v6843_v5  ;;  %6274 = vmatpush3.bf16.msra.mxu1 %v6867_v28 }
  0x7e   : > { %6039 = vmatprep.subr.bf16.mxu0 %v6844_v6  ;;  %6275 = vmatprep.subr.bf16.mxu1 %v6869_v30 }
  0x81   : > { %6040 = vmatpush3.bf16.msra.mxu0 %v6844_v6  ;;  %6276 = vmatpush3.bf16.msra.mxu1 %v6869_v30 }
  0x82   : > { %6041 = vmatprep.subr.bf16.mxu0 %v6845_v7  ;;  %6277 = vmatprep.subr.bf16.mxu1 %v6871_v32 }
  0x85   : > { %6042 = vmatpush3.bf16.msra.mxu0 %v6845_v7  ;;  %6278 = vmatpush3.bf16.msra.mxu1 %v6871_v32 }
  0x86   : > { %6043 = vmatprep.subr.bf16.mxu0 %v6846_v8  ;;  %6279 = vmatprep.subr.bf16.mxu1 %v6873_v34 }
  0x89   : > { %6044 = vmatpush3.bf16.msra.mxu0 %v6846_v8  ;;  %6280 = vmatpush3.bf16.msra.mxu1 %v6873_v34 }
  0x8a   : > { %6077 = vmatprep.subr.bf16.mxu0 %v6864_v25  ;;  %6281 = vmatprep.subr.bf16.mxu1 %v6875_v36 }
  0x8c   : > { %6046 = vmatmul.mubr.bf16.vlgmr.msra.gmra.mrb[0].mxu0 %v6848_v9 }
  0x8d   : > { %6049 = vmatprep.mubr.bf16.mxu0 %v6849_v10  ;;  %6078 = vmatpush3.bf16.msra.mxu0 %v6864_v25 }
  0x8e   : > { %6079 = vmatprep.subr.bf16.mxu0 %v6866_v27  ;;  %6282 = vmatpush3.bf16.msra.mxu1 %v6875_v36 }
  0x8f   : > { %6283 = vmatprep.subr.bf16.mxu1 %v6877_v38 }
  0x91   : > { %6080 = vmatpush3.bf16.msra.mxu0 %v6866_v27 }
  0x92   : > { %6081 = vmatprep.subr.bf16.mxu0 %v6868_v29  ;;  %6284 = vmatpush3.bf16.msra.mxu1 %v6877_v38 }
  0x93   : > { %6317 = vmatprep.subr.bf16.mxu1 %v7611_v40 }
  0x94   : > { %6050 = vmatmul.mubr.bf16.gmra.mrb[4].mxu0 %v6850_v11 }
  0x95   : > { %6053 = vmatprep.mubr.bf16.mxu0 %v6851_v12  ;;  %6082 = vmatpush3.bf16.msra.mxu0 %v6868_v29 }
  0x96   : > { %6083 = vmatprep.subr.bf16.mxu0 %v6870_v31 }
  0x99   : > { %6084 = vmatpush3.bf16.msra.mxu0 %v6870_v31 }
  0x9a   : > { %6085 = vmatprep.subr.bf16.mxu0 %v6872_v33 }
  0x9c   : > { %6054 = vmatmul.mubr.bf16.gmra.mrb[8].mxu0 %v6852_v13 }
  0x9d   : > { %6057 = vmatprep.mubr.bf16.mxu0 %v6853_v14  ;;  %6086 = vmatpush3.bf16.msra.mxu0 %v6872_v33 }
  0x9e   : > { %6087 = vmatprep.subr.bf16.mxu0 %v6874_v35 }
  0xa1   : > { %6088 = vmatpush3.bf16.msra.mxu0 %v6874_v35 }
  0xa2   : > { %6089 = vmatprep.subr.bf16.mxu0 %v6876_v37 }
  0xa4   : > { %6058 = vmatmul.mubr.bf16.gmra.mrb[12].mxu0 %v6854_v15 }
  0xa5   : > { %6061 = vmatprep.mubr.bf16.mxu0 %v6855_v16  ;;  %6090 = vmatpush3.bf16.msra.mxu0 %v6876_v37 }
  0xa6   : > { %6091 = vmatprep.subr.bf16.mxu0 %v6878_v39 }
  0xa9   : > { %6092 = vmatpush3.bf16.msra.mxu0 %v6878_v39 }
  0xaa   : > { %6125 = vmatprep.subr.bf16.mxu0 %v7649_v2 }
  0xac   : > { %6062 = vmatmul.mubr.bf16.gmra.mrb[16].mxu0 %v6856_v17 }
  0xad   : > { %6065 = vmatprep.mubr.bf16.mxu0 %v6857_v18 }
  0xb4   : > { %6066 = vmatmul.mubr.bf16.gmra.mrb[20].mxu0 %v6858_v19 }
  0xb5   : > { %6069 = vmatprep.mubr.bf16.mxu0 %v6859_v20 }
  0xbc   : > { %6070 = vmatmul.mubr.bf16.gmra.mrb[24].mxu0 %v6860_v21 }
  0xbd   : > { %6073 = vmatprep.mubr.bf16.mxu0 %v6861_v22 }
  0xc4   : > { %6074 = vmatmul.mubr.bf16.gmra.mrb[28].mxu0 %v6862_v23 }
 0x15f   : > { %v6047_v42 = vpop.f32.mrb[0].mxu0 }
 0x160   : > { %v557_v44 = vpop.f32.mrb[1].mxu0  ;;  %v693_v7 = vmul.f32 %v6047_v42, %v7617_v41 }
 0x161   : > { %v691_v45 = vmul.f32 %v7617_v41, %v557_v44  ;;  %v6048_v46 = vpop.f32.mrb[2].mxu0 }
 0x162   : > { %v694_v47 = vmul.f32 %v6048_v46, %v7617_v41  ;;  %v560_v48 = vpop.f32.mrb[3].mxu0  ;;  %v7670_v21 = vadd.f32 %v7622_v43, %v693_v7 }
 0x163   : > { %v7627_v49 = vadd.f32 %v7622_v43, %v691_v45  ;;  %v692_v50 = vmul.f32 %v7617_v41, %v560_v48 }
 0x164   : > { %v7632_v52 = vadd.f32 %v7622_v43, %v694_v47  ;;  %v5279_v30 = vmul.f32 -1.442695, %v7670_v21 }
 0x165   : > { %v5277_v51 = vmul.f32 -1.442695, %v7627_v49  ;;  %v7635_v53 = vadd.f32 %v7622_v43, %v692_v50 }
 0x166   : > { %v5280_v58 = vmul.f32 -1.442695, %v7632_v52 }
 0x167   : > { %6935 = vpow2.f32 %v5277_v51  ;;  %v5278_v54 = vmul.f32 -1.442695, %v7635_v53  ;;  %v6051_v55 = vpop.f32.mrb[4].mxu0 }
 0x168   : > { %v697_v56 = vmul.f32 %v6051_v55, %v7617_v41  ;;  %v573_v57 = vpop.f32.mrb[5].mxu0 }
 0x169   : > { %6937 = vpow2.f32 %v5278_v54  ;;  %v695_v59 = vmul.f32 %v7617_v41, %v573_v57  ;;  %v6052_v60 = vpop.f32.mrb[6].mxu0 }
 0x16a   : > { %v7642_v61 = vadd.f32 %v7622_v43, %v697_v56  ;;  %v698_v62 = vmul.f32 %v6052_v60, %v7617_v41  ;;  %v576_v63 = vpop.f32.mrb[7].mxu0  ;;  %6939 = vpow2.f32 %v5280_v58 }
 0x16b   : > { %v7646_v0 = vadd.f32 %v7622_v43, %v695_v59  ;;  %v696_v1 = vmul.f32 %v7617_v41, %v576_v63 }
 0x16c   : > { %v5283_v3 = vmul.f32 -1.442695, %v7642_v61  ;;  %v7653_v4 = vadd.f32 %v7622_v43, %v698_v62 }
 0x16d   : > { %v7656_v5 = vadd.f32 %v7622_v43, %v696_v1  ;;  %v5281_v6 = vmul.f32 -1.442695, %v7646_v0 }
 0x16e   : > { %v5284_v8 = vmul.f32 -1.442695, %v7653_v4  ;;  %6941 = vpow2.f32 %v5283_v3 }
 0x16f   : > { %v6055_v9 = vpop.f32.mrb[8].mxu0  ;;  %v5282_v13 = vmul.f32 -1.442695, %v7656_v5  ;;  %6943 = vpow2.f32 %v5281_v6 }
 0x170   : > { %v701_v10 = vmul.f32 %v6055_v9, %v7617_v41  ;;  %v589_v11 = vpop.f32.mrb[9].mxu0  ;;  %6945 = vpow2.f32 %v5284_v8 }
 0x171   : > { %v6936_v12 = vpop.eup %6935  ;;  %v699_v14 = vmul.f32 %v7617_v41, %v589_v11  ;;  %v6056_v15 = vpop.f32.mrb[10].mxu0 }
 0x172   : > { %v858_v16 = vadd.f32 1.0, %v6936_v12  ;;  %v7666_v17 = vadd.f32 %v7622_v43, %v701_v10  ;;  %v702_v18 = vmul.f32 %v6056_v15, %v7617_v41  ;;  %v592_v19 = vpop.f32.mrb[11].mxu0 }
 0x173   : > { %v6938_v20 = vpop.eup %6937  ;;  %v7673_v22 = vadd.f32 %v7622_v43, %v699_v14  ;;  %v700_v23 = vmul.f32 %v7617_v41, %v592_v19 }
 0x174   : > { %6947 = vrcp.f32 %v858_v16  ;;  %v859_v24 = vadd.f32 1.0, %v6938_v20  ;;  %v5287_v25 = vmul.f32 -1.442695, %v7666_v17  ;;  %v7678_v26 = vadd.f32 %v7622_v43, %v702_v18  ;;  %v6940_v29 = vpop.eup %6939 }
 0x175   : > { %6949 = vpow2.f32 %v5282_v13  ;;  %v5285_v27 = vmul.f32 -1.442695, %v7673_v22  ;;  %v7682_v28 = vadd.f32 %v7622_v43, %v700_v23  ;;  %v861_v39 = vadd.f32 1.0, %v6940_v29 }
 0x176   : > { %6951 = vrcp.f32 %v859_v24  ;;  %v5288_v32 = vmul.f32 -1.442695, %v7678_v26  ;;  %v1018_v20 = vlaneseq }
 0x177   : > { %6953 = vpow2.f32 %v5287_v25  ;;  %v6059_v31 = vpop.f32.mrb[12].mxu0  ;;  %v5286_v35 = vmul.f32 -1.442695, %v7682_v28 }
 0x178   : > { %6955 = vpow2.f32 %v5285_v27  ;;  %v705_v33 = vmul.f32 %v6059_v31, %v7617_v41  ;;  %v605_v34 = vpop.f32.mrb[13].mxu0  ;;  %v6942_v38 = vpop.eup %6941 }
 0x179   : > { %v703_v36 = vmul.f32 %v7617_v41, %v605_v34  ;;  %v6060_v37 = vpop.f32.mrb[14].mxu0  ;;  %6957 = vpow2.f32 %v5279_v30  ;;  %v6944_v48 = vpop.eup %6943  ;;  %v864_v55 = vadd.f32 1.0, %v6942_v38 }
 0x17a   : > { %v7690_v42 = vadd.f32 %v7622_v43, %v705_v33  ;;  %v706_v44 = vmul.f32 %v6060_v37, %v7617_v41  ;;  %v608_v45 = vpop.f32.mrb[15].mxu0  ;;  %6959 = vpow2.f32 %v5288_v32  ;;  %v6946_v54 = vpop.eup %6945  ;;  %v862_v1 = vadd.f32 1.0, %v6944_v48 }
 0x17b   : > { %v7694_v46 = vadd.f32 %v7622_v43, %v703_v36  ;;  %v704_v47 = vmul.f32 %v7617_v41, %v608_v45  ;;  %6961 = vpow2.f32 %v5286_v35  ;;  %v865_v13 = vadd.f32 1.0, %v6946_v54 }
 0x17c   : > { %v5291_v50 = vmul.f32 -1.442695, %v7690_v42  ;;  %v7699_v51 = vadd.f32 %v7622_v43, %v706_v44  ;;  %6963 = vrcp.f32 %v861_v39  ;;  %v7728_v37 = vshrl.u32 %v1018_v20, 7 }
 0x17d   : > { %v7702_v56 = vadd.f32 %v7622_v43, %v704_v47  ;;  %v5289_v58 = vmul.f32 -1.442695, %v7694_v46 }
 0x17e   : > { %v6948_v57 = vpop.eup %6947  ;;  %6965 = vpow2.f32 %v5291_v50  ;;  %v5292_v60 = vmul.f32 -1.442695, %v7699_v51  ;;  %9528 = vst [vmem:[#allocation15_spill] sm:$0xff] %v7728_v37  ;;  %vm1596_vm0 = vcmp.lt.s32.totalorder %v7728_v37, 1  ;;  %vm9458_vm1 = vcmp.lt.s32.totalorder %v7728_v37, 7 }
 0x17f   : > { %v6950_v59 = vpop.eup %6949  ;;  %v6063_v62 = vpop.f32.mrb[16].mxu0  ;;  %v5290_v3 = vmul.f32 -1.442695, %v7702_v56  ;;  %v7708_v8 = vmul.f32 %v6948_v57, %v7627_v49  ;;  %6967 = vrcp.f32 %v864_v55  ;;  %v9427_v55 = vmov 0.0  }
 0x180   : > { %v6952_v63 = vpop.eup %6951  ;;  %v621_v6 = vpop.f32.mrb[17].mxu0  ;;  %v709_v10 = vmul.f32 %v6063_v62, %v7617_v41  ;;  %6969 = vpow2.f32 %v5289_v58  ;;  %v863_v16 = vadd.f32 1.0, %v6950_v59  ;;  %v7735_v57 = vrot.slane %v9427_v55, 7 }
 0x181   : > { %v6954_v7 = vpop.eup %6953  ;;  %v7711_v9 = vmul.f32 %v6952_v63, %v7635_v53  ;;  %v6064_v11 = vpop.f32.mrb[18].mxu0  ;;  %6971 = vpow2.f32 %v5292_v60  ;;  %v707_v53 = vmul.f32 %v7617_v41, %v621_v6 }
 0x182   : > { %v6956_v12 = vpop.eup %6955  ;;  %v624_v14 = vpop.f32.mrb[19].mxu0  ;;  %v7719_v49 = vadd.f32 %v7622_v43, %v709_v10  ;;  %v868_v18 = vadd.f32 1.0, %v6954_v7  ;;  %6973 = vpow2.f32 %v5290_v3  ;;  %v710_v24 = vmul.f32 %v6064_v11, %v7617_v41  ;;  %9529 = vst [vmem:[#allocation16_spill] sm:$0xff] %v7735_v57 }
 0x183   : > { %v7716_v15 = vpack.c.bf16 %v7711_v9, %v7708_v8  ;;  %v6958_v19 = vpop.eup %6957  ;;  %6975 = vrcp.f32 %v862_v1  ;;  %v866_v23 = vadd.f32 1.0, %v6956_v12  ;;  %v7725_v33 = vadd.f32 %v7622_v43, %v707_v53 }
 0x184   : > { %v6960_v25 = vpop.eup %6959  ;;  %6977 = vrcp.f32 %v865_v13  ;;  %v5295_v27 = vmul.f32 -1.442695, %v7719_v49  ;;  %v860_v32 = vadd.f32 1.0, %v6958_v19  ;;  %v708_v34 = vmul.f32 %v7617_v41, %v624_v14 }
 0x185   : > { %9527 = vst [vmem:[#allocation14_spill] sm:$0xff] %v7716_v15  ;;  %v6962_v29 = vpop.eup %6961  ;;  %6979 = vrcp.f32 %v863_v16  ;;  %v869_v38 = vadd.f32 1.0, %v6960_v25  ;;  %v7731_v39 = vadd.f32 %v7622_v43, %v710_v24  ;;  %v5293_v60 = vmul.f32 -1.442695, %v7725_v33 }
 0x186   : > { %v6964_v31 = vpop.eup %6963  ;;  %6981 = vrcp.f32 %v868_v18  ;;  %v867_v45 = vadd.f32 1.0, %v6962_v29  ;;  %v7742_v62 = vadd.f32 %v7622_v43, %v708_v34  ;;  %v7754_v18 = vadd.s32 16, %v7728_v37 }
 0x187   : > { %v6067_v30 = vpop.f32.mrb[20].mxu0  ;;  %6983 = vrcp.f32 %v866_v23  ;;  %v7738_v59 = vmul.f32 %v6964_v31, %v7632_v52  ;;  %v5296_v1 = vmul.f32 -1.442695, %v7731_v39  ;;  %v7766_v31 = vadd.s32 32, %v7728_v37 }
 0x188   : > { %v637_v35 = vpop.f32.mrb[21].mxu0  ;;  %v6966_v36 = vpop.eup %6965  ;;  %6985 = vpow2.f32 %v5295_v27  ;;  %v713_v3 = vmul.f32 %v6067_v30, %v7617_v41  ;;  %v5294_v10 = vmul.f32 -1.442695, %v7742_v62 }
 0x189   : > { %v6068_v44 = vpop.f32.mrb[22].mxu0  ;;  %v6968_v48 = vpop.eup %6967  ;;  %v872_v50 = vadd.f32 1.0, %v6966_v36  ;;  %6987 = vrcp.f32 %v860_v32  ;;  %9530 = vst [vmem:[#allocation17_spill] sm:$0xff] %v7738_v59  ;;  %v711_v6 = vmul.f32 %v7617_v41, %v637_v35  ;;  %v9429_v34 = vrot.slane %v7738_v59, 7 }
 0x18a   : > { %v640_v47 = vpop.f32.mrb[23].mxu0  ;;  %v6970_v58 = vpop.eup %6969  ;;  %6989 = vrcp.f32 %v869_v38  ;;  %v714_v52 = vmul.f32 %v6068_v44, %v7617_v41  ;;  %v7751_v14 = vadd.f32 %v7622_v43, %v713_v3  ;;  %v7770_v35 = vmul.f32 %v6968_v48, %v7642_v61 }
 0x18b   : > { %v6972_v63 = vpop.eup %6971  ;;  %6991 = vrcp.f32 %v867_v45  ;;  %v712_v11 = vmul.f32 %v7617_v41, %v640_v47  ;;  %v870_v13 = vadd.f32 1.0, %v6970_v58  ;;  %v7757_v20 = vadd.f32 %v7622_v43, %v711_v6 }
 0x18c   : > { %v6974_v7 = vpop.eup %6973  ;;  %6993 = vrcp.f32 %v872_v50  ;;  %v873_v19 = vadd.f32 1.0, %v6972_v63  ;;  %v7760_v23 = vadd.f32 %v7622_v43, %v714_v52  ;;  %9531 = vst [vmem:[#allocation18_spill] sm:$0xff] %v7770_v35  ;;  %v5299_v47 = vmul.f32 -1.442695, %v7751_v14 }
 0x18d   : > { %v6976_v12 = vpop.eup %6975  ;;  %6995 = vpow2.f32 %v5293_v60  ;;  %v871_v27 = vadd.f32 1.0, %v6974_v7  ;;  %v7763_v29 = vadd.f32 %v7622_v43, %v712_v11  ;;  %v7780_v50 = vrot.slane %v7708_v8, 7 }
 0x18e   : > { %v6978_v53 = vpop.eup %6977  ;;  %6997 = vpow2.f32 %v5296_v1  ;;  %v7773_v36 = vmul.f32 %v6976_v12, %v7646_v0  ;;  %v5297_v61 = vmul.f32 -1.442695, %v7757_v20  ;;  %v5300_v0 = vmul.f32 -1.442695, %v7760_v23 }
 0x18f   : > { %v6071_v16 = vpop.f32.mrb[24].mxu0  ;;  %v6980_v25 = vpop.eup %6979  ;;  %6999 = vpow2.f32 %v5294_v10  ;;  %v7776_v45 = vmul.f32 %v6978_v53, %v7653_v4  ;;  %v5298_v48 = vmul.f32 -1.442695, %v7763_v29 }
 0x190   : > { %v653_v24 = vpop.f32.mrb[25].mxu0  ;;  %v6982_v32 = vpop.eup %6981  ;;  %9532 = vst [vmem:[#allocation19_spill] sm:$0xff] %v7773_v36  ;;  %7001 = vrcp.f32 %v870_v13  ;;  %v7783_v60 = vmul.f32 %v6980_v25, %v7656_v5  ;;  %v717_v4 = vmul.f32 %v6071_v16, %v7617_v41  ;;  %v1570_v16 = vrot.slane %v7773_v36, 7 }
 0x191   : > { %v6072_v30 = vpop.f32.mrb[26].mxu0  ;;  %v6984_v44 = vpop.eup %6983  ;;  %9533 = vst [vmem:[#allocation20_spill] sm:$0xff] %v7776_v45  ;;  %7003 = vrcp.f32 %v873_v19  ;;  %v715_v63 = vmul.f32 %v7617_v41, %v653_v24  ;;  %v7793_v3 = vmul.f32 %v6982_v32, %v7666_v17 }
 0x192   : > { %v656_v38 = vpop.f32.mrb[27].mxu0  ;;  %v6986_v58 = vpop.eup %6985  ;;  %7005 = vrcp.f32 %v871_v27  ;;  %v718_v5 = vmul.f32 %v6072_v30, %v7617_v41  ;;  %v7799_v10 = vmul.f32 %v6984_v44, %v7673_v22  ;;  %v7802_v11 = vadd.f32 %v7622_v43, %v717_v4 }
 0x193   : > { %v7790_v1 = vpop.eup %6987  ;;  %7007 = vpow2.f32 %v5299_v47  ;;  %v716_v6 = vmul.f32 %v7617_v41, %v656_v38  ;;  %v876_v52 = vadd.f32 1.0, %v6986_v58  ;;  %v7807_v53 = vadd.f32 %v7622_v43, %v715_v63 }
 0x194   : > { %v6990_v7 = vpop.eup %6989  ;;  %7009 = vpow2.f32 %v5297_v61  ;;  %v1573_v22 = vrot.slane %v7776_v45, 7  ;;  %v7811_v25 = vadd.f32 %v7622_v43, %v718_v5  ;;  %v1571_v38 = vrot.slane %v7783_v60, 7 }
 0x195   : > { %v6992_v13 = vpop.eup %6991  ;;  %7011 = vpow2.f32 %v5300_v0  ;;  %v7814_v27 = vadd.f32 %v7622_v43, %v716_v6  ;;  %v7819_v47 = vmul.f32 %v6990_v7, %v7678_v26  ;;  %v5303_v58 = vmul.f32 -1.442695, %v7802_v11 }
 0x196   : > { %v6994_v24 = vpop.eup %6993  ;;  %7013 = vpow2.f32 %v5298_v48  ;;  %v9428_v63 = vrot.slane %v7711_v9, 7  ;;  %v7825_v6 = vmul.f32 %v6992_v13, %v7682_v28  ;;  %v5301_v54 = vmul.f32 -1.442695, %v7807_v53 }
 0x197   : > { %v6075_v12 = vpop.f32.mrb[28].mxu0  ;;  %v6996_v32 = vpop.eup %6995  ;;  %7015 = vrcp.f32 %v876_v52  ;;  %v5304_v44 = vmul.f32 -1.442695, %v7811_v25  ;;  %v5302_v17 = vmul.f32 -1.442695, %v7814_v27  ;;  %v9542_v2 = vrot.slane %v7793_v3, 7 }
 0x198   : > { %v669_v19 = vpop.f32.mrb[29].mxu0  ;;  %v6998_v0 = vpop.eup %6997  ;;  %v874_v4 = vadd.f32 1.0, %v6996_v32  ;;  %7017 = vpow2.f32 %v5303_v58  ;;  %v721_v52 = vmul.f32 %v6075_v12, %v7617_v41 }
 0x199   : > { %v6076_v30 = vpop.f32.mrb[30].mxu0  ;;  %v7000_v5 = vpop.eup %6999  ;;  %v877_v55 = vadd.f32 1.0, %v6998_v0  ;;  %v719_v32 = vmul.f32 %v7617_v41, %v669_v19 }
 0x19a   : > { %v672_v61 = vpop.f32.mrb[31].mxu0  ;;  %v7002_v26 = vpop.eup %7001  ;;  %7019 = vrcp.f32 %v874_v4  ;;  %v875_v7 = vadd.f32 1.0, %v7000_v5  ;;  %v722_v28 = vmul.f32 %v6076_v30, %v7617_v41  ;;  %v7840_v4 = vsel %vm1596_vm0, %v7780_v50, %v9428_v63 }
 0x19b   : > { %v7004_v48 = vpop.eup %7003  ;;  %7021 = vrcp.f32 %v877_v55  ;;  %v720_v0 = vmul.f32 %v7617_v41, %v672_v61  ;;  %v7844_v19 = vadd.f32 %v7622_v43, %v721_v52  ;;  %v7847_v30 = vadd.f32 %v7622_v43, %v719_v32 }
 0x19c   : > { %v7006_v13 = vpop.eup %7005  ;;  %7023 = vrcp.f32 %v875_v7  ;;  %v7850_v41 = vmul.f32 %v6994_v24, %v7690_v42  ;;  %v7853_v7 = vadd.f32 %v7622_v43, %v722_v28  ;;  %v7856_v58 = vmul.f32 %v7002_v26, %v7694_v46 }
 0x19d   : > { %v7008_v55 = vpop.eup %7007  ;;  %7025 = vpow2.f32 %v5301_v54  ;;  %v7859_v52 = vadd.f32 %v7622_v43, %v720_v0  ;;  %v7862_v12 = vmul.f32 %v7004_v48, %v7699_v51  ;;  %v5307_v24 = vmul.f32 -1.442695, %v7844_v19 }
 0x19e   : > { %v7010_v5 = vpop.eup %7009  ;;  %v880_v61 = vadd.f32 1.0, %v7008_v55  ;;  %7027 = vpow2.f32 %v5304_v44  ;;  %v5305_v28 = vmul.f32 -1.442695, %v7847_v30  ;;  %v7870_v46 = vsel %vm1596_vm0, %v7735_v57, %v7780_v50 }
 0x19f   : > { %v7012_v63 = vpop.eup %7011  ;;  %v878_v54 = vadd.f32 1.0, %v7010_v5  ;;  %7029 = vpow2.f32 %v5302_v17  ;;  %v7873_v17 = vmul.f32 %v7006_v13, %v7702_v56  ;;  %v5308_v51 = vmul.f32 -1.442695, %v7853_v7 }
 0x1a0   : > { %v7014_v32 = vpop.eup %7013  ;;  %7031 = vrcp.f32 %v880_v61  ;;  %v881_v42 = vadd.f32 1.0, %v7012_v63  ;;  %v5306_v26 = vmul.f32 -1.442695, %v7859_v52  ;;  %v1621_v0 = vsel %vm1596_vm0, %v1570_v16, %v1571_v38 }
 0x1a1   : > { %7033 = vrcp.f32 %v878_v54  ;;  %v879_v44 = vadd.f32 1.0, %v7014_v32  ;;  %v7016_v43 = vpop.eup %7015  ;;  %v1622_v56 = vsel %vm1596_vm0, %v9429_v34, %v1570_v16  ;;  %v9534_v61 = vrot.slane %v7770_v35, 7 }
 0x1a2   : > { %7035 = vrcp.f32 %v881_v42  ;;  %v7018_v63 = vpop.eup %7017  ;;  %v7891_v5 = vpack.c.bf16 %v1621_v0, %v1622_v56  ;;  %v1579_v48 = vrot.slane %v7873_v17, 7 }
 0x1a3   : > { %7037 = vrcp.f32 %v879_v44  ;;  %v884_v55 = vadd.f32 1.0, %v7018_v63  ;;  %v1619_v54 = vsel %vm1596_vm0, %v9534_v61, %v1573_v22  ;;  %v9535_v44 = vmov %v9534_v61 }
 0x1a4   : > { %v7020_v13 = vpop.eup %7019  ;;  %7039 = vpow2.f32 %v5307_v24  ;;  %v1620_v16 = vsel %vm1596_vm0, %v1571_v38, %v9535_v44  ;;  %v9536_v24 = vrot.slane %v7825_v6, 7  ;;  %v9537_v63 = vrot.slane %v7799_v10, 7 }
 0x1a5   : > { %v7022_v32 = vpop.eup %7021  ;;  %v7900_v42 = vmul.f32 %v7020_v13, %v7725_v33  ;;  %7041 = vpow2.f32 %v5305_v28  ;;  %v1580_v61 = vrot.slane %v7850_v41, 7  ;;  %v7915_v33 = vpack.c.bf16 %v1619_v54, %v1620_v16 }
 0x1a6   : > { %v1617_v0 = vsel %vm1596_vm0, %v9537_v63, %v9536_v24  ;;  %v7024_v56 = vpop.eup %7023  ;;  %7043 = vrcp.f32 %v884_v55  ;;  %v9539_v28 = vmov %v9537_v63  ;;  %v1578_v44 = vrot.slane %v7856_v58, 7 }
 0x1a7   : > { %9538 = vst [vmem:[#allocation21_spill] sm:$0xff] %v7915_v33  ;;  %v1618_v38 = vsel %vm1596_vm0, %v1573_v22, %v9539_v28  ;;  %v7026_v13 = vpop.eup %7025  ;;  %v7926_v24 = vmul.f32 %v7024_v56, %v7742_v62  ;;  %7045 = vpow2.f32 %v5308_v51  ;;  %v1581_v55 = vrot.slane %v7862_v12, 7 }
 0x1a8   : > { %v7028_v63 = vpop.eup %7027  ;;  %v7930_v54 = vmul.f32 %v7016_v43, %v7719_v49  ;;  %v882_v16 = vadd.f32 1.0, %v7026_v13  ;;  %7047 = vpow2.f32 %v5306_v26  ;;  %v1582_v22 = vrot.slane %v7900_v42, 7 }
 0x1a9   : > { %v7030_v34 = vpop.eup %7029  ;;  %v7934_v28 = vmul.f32 %v7022_v32, %v7731_v39  ;;  %v885_v15 = vadd.f32 1.0, %v7028_v63  ;;  %v7936_v33 = vpack.c.bf16 %v1617_v0, %v1618_v38  ;;  %v9541_v56 = vrot.slane %v7819_v47, 7 }
 0x1aa   : > { %v7032_v62 = vpop.eup %7031  ;;  %7049 = vrcp.f32 %v882_v16  ;;  %v883_v51 = vadd.f32 1.0, %v7030_v34  ;;  %v9543_v43 = vmov %v9542_v2  ;;  %v9544_v26 = vrot.slane %v7825_v6, 7 }
 0x1ab   : > { %9540 = vst [vmem:[#allocation22_spill] sm:$0xff] %v7936_v33  ;;  %v1615_v49 = vsel %vm1596_vm0, %v9542_v2, %v9541_v56  ;;  %v7034_v32 = vpop.eup %7033  ;;  %v1583_v0 = vrot.slane %v7926_v24, 7  ;;  %7051 = vrcp.f32 %v885_v15  ;;  %v1613_v34 = vsel %vm1596_vm0, %v1578_v44, %v1579_v48 }
 0x1ac   : > { %v1616_v39 = vsel %vm1596_vm0, %v9544_v26, %v9543_v43  ;;  %v7036_v13 = vpop.eup %7035  ;;  %v7956_v63 = vmul.f32 %v7034_v32, %v7757_v20  ;;  %7053 = vrcp.f32 %v883_v51  ;;  %v9546_v2 = vmov %v9541_v56 }
 0x1ad   : > { %v7951_v38 = vpack.c.bf16 %v1615_v49, %v1616_v39  ;;  %v1614_v16 = vsel %vm1596_vm0, %v9546_v2, %v1578_v44  ;;  %v1611_v56 = vsel %vm1596_vm0, %v1580_v61, %v1581_v55  ;;  %v7038_v43 = vpop.eup %7037  ;;  %v1585_v15 = vrot.slane %v7934_v28, 7 }
 0x1ae   : > { %v7966_v49 = vmul.f32 %v7032_v62, %v7751_v14  ;;  %v7969_v26 = vmul.f32 %v7036_v13, %v7760_v23  ;;  %v7971_v20 = vpack.c.bf16 %v1613_v34, %v1614_v16  ;;  %v7040_v51 = vpop.eup %7039  ;;  %v7974_v39 = vmul.f32 %v7038_v43, %v7763_v29 }
 0x1af   : > { %9545 = vst [vmem:[#allocation23_spill] sm:$0xff] %v7951_v38  ;;  %v1069_v44 = vand.u32 15, %v7754_v18  ;;  %v7978_v32 = vadd.s32 48, %v7728_v37  ;;  %v1612_v2 = vsel %vm1596_vm0, %v1579_v48, %v1580_v61  ;;  %v7042_v38 = vpop.eup %7041  ;;  %v1584_v14 = vrot.slane %v7930_v54, 7 }
 0x1b0   : > { %9547 = vst [vmem:[#allocation24_spill] sm:$0xff] %v7969_v26  ;;  %9548 = vst [vmem:[#allocation25_spill] sm:$0xff] %v7971_v20  ;;  %v1586_v23 = vrot.slane %v7956_v63, 7  ;;  %v888_v62 = vadd.f32 1.0, %v7040_v51  ;;  %v7984_v34 = vpack.c.bf16 %v1611_v56, %v1612_v2  ;;  %v7044_v13 = vpop.eup %7043  ;;  %v1589_v29 = vrot.slane %v7969_v26, 7 }
 0x1b1   : > { %v1587_v16 = vrot.slane %v7974_v39, 7  ;;  %v886_v18 = vadd.f32 1.0, %v7042_v38  ;;  %v1609_v43 = vsel %vm1596_vm0, %v1582_v22, %v1583_v0  ;;  %v7046_v20 = vpop.eup %7045  ;;  %v1588_v48 = vrot.slane %v7966_v49, 7 }
 0x1b2   : > { %9549 = vst [vmem:[#allocation26_spill] sm:$0xff] %v7984_v34  ;;  %7055 = vrcp.f32 %v888_v62  ;;  %v1610_v61 = vsel %vm1596_vm0, %v1581_v55, %v1582_v22  ;;  %v1607_v56 = vsel %vm1596_vm0, %v1584_v14, %v1585_v15  ;;  %v7048_v51 = vpop.eup %7047  ;;  %v889_v2 = vadd.f32 1.0, %v7046_v20 }
 0x1b3   : > { %7057 = vrcp.f32 %v886_v18  ;;  %v7995_v34 = vpack.c.bf16 %v1609_v43, %v1610_v61  ;;  %v1608_v38 = vsel %vm1596_vm0, %v1583_v0, %v1584_v14  ;;  %v8001_v33 = vmul.f32 %v7790_v1, %v7670_v21 }
 0x1b4   : > { %v8004_v62 = vmul.f32 %v7044_v13, %v7802_v11  ;;  %v887_v26 = vadd.f32 1.0, %v7048_v51  ;;  %v8006_v55 = vpack.c.bf16 %v1607_v56, %v1608_v38  ;;  %v7050_v22 = vpop.eup %7049  ;;  %7059 = vrcp.f32 %v889_v2 }
 0x1b5   : > { %9550 = vst [vmem:[#allocation27_spill] sm:$0xff] %v7995_v34  ;;  %9551 = vst [vmem:[#allocation28_spill] sm:$0xff] %v8001_v33  ;;  %v1605_v20 = vsel %vm1596_vm0, %v1586_v23, %v1587_v16  ;;  %v1606_v18 = vsel %vm1596_vm0, %v1585_v15, %v1586_v23  ;;  %v1603_v0 = vsel %vm1596_vm0, %v1588_v48, %v1589_v29  ;;  %v7052_v14 = vpop.eup %7051  ;;  %v2178_v43 = vrot.slane %v7711_v9, 1 }
 0x1b6   : > { %9552 = vst [vmem:[#allocation29_spill] sm:$0xff] %v8006_v55  ;;  %v8015_v21 = vmul.f32 %v7050_v22, %v7807_v53  ;;  %7061 = vrcp.f32 %v887_v26  ;;  %v8017_v1 = vpack.c.bf16 %v1605_v20, %v1606_v18  ;;  %v1604_v11 = vsel %vm1596_vm0, %v1587_v16, %v1588_v48  ;;  %v7054_v13 = vpop.eup %7053 }
 0x1b7   : > { %v8024_v15 = vmul.f32 %v7052_v14, %v7811_v25  ;;  %v8026_v23 = vpack.c.bf16 %v1603_v0, %v1604_v11  ;;  %v8030_v53 = vmul.f32 %v7054_v13, %v7814_v27  ;;  %v1083_v26 = vand.u32 15, %v7766_v31 }
 0x1b8   : > { %9553 = vst [vmem:[#allocation30_spill] sm:$0xff] %v8017_v1  ;;  %v1590_v61 = vrot.slane %v8015_v21, 7  ;;  %v8034_v56 = vadd.s32 64, %v7728_v37  ;;  %v8037_v16 = vrot.slane %v8001_v33, 1  ;;  %v8040_v48 = vrot.slane %v7708_v8, 1 }
 0x1b9   : > { %9554 = vst [vmem:[#allocation31_spill] sm:$0xff] %v8026_v23  ;;  %v1592_v25 = vrot.slane %v8004_v62, 7  ;;  %v1593_v51 = vrot.slane %v8024_v15, 7  ;;  %v9556_v2 = vand.u32 15, %v7728_v37  ;;  %v2182_v31 = vrot.slane %v7783_v60, 1 }
 0x1ba   : > { %9555 = vst [vmem:[#allocation32_spill] sm:$0xff] %v8037_v16  ;;  %v1591_v38 = vrot.slane %v8030_v53, 7  ;;  %vm8052_vm3 = vcmp.ge.s32.totalorder %v1069_v44, 1  ;;  %v1097_v8 = vand.u32 15, %v7978_v32  ;;  %v1602_v20 = vsel %vm1596_vm0, %v1589_v29, %v1590_v61  ;;  %v6885_v32 = vld [vmem:[#allocation8 + $0x48] sm:$0xff]  }
 0x1bb   : > { %vm8046_vm2 = vcmp.ge.s32.totalorder %v9556_v2, 1  ;;  %v2183_v18 = vrot.slane %v7770_v35, 1  ;;  %v1599_v0 = vsel %vm1596_vm0, %v1592_v25, %v1593_v51  ;;  %v2235_v14 = vsel %vm9458_vm1, %v2178_v43, %v8037_v16  ;;  %vm8172_vm8 = vmpackc.low %vm9476_vm6, %vm8052_vm3 }
 0x1bc   : > { %v2236_v44 = vsel %vm9458_vm1, %v8040_v48, %v2178_v43  ;;  %v7056_v11 = vpop.eup %7055  ;;  %vm8069_vm4 = vcmp.ge.s32.totalorder %v1083_v26, 1  ;;  %v1601_v29 = vsel %vm1596_vm0, %v1590_v61, %v1591_v38  ;;  %v1600_v2 = vsel %vm1596_vm0, %v1591_v38, %v1592_v25  ;;  %vm8149_vm7 = vmpackc.low %vm9476_vm6, %vm8046_vm2 }
 0x1bd   : > { %v8077_v35 = vpack.c.bf16 %v2235_v14, %v2236_v44  ;;  %v7058_v16 = vpop.eup %7057  ;;  %v1111_v23 = vand.u32 15, %v8034_v56  ;;  %v8081_v43 = vadd.s32 80, %v7728_v37  ;;  %v8083_v1 = vpack.c.bf16 %v1601_v29, %v1602_v20  ;;  %vm8193_vm9 = vmpackc.low %vm9476_vm6, %vm8069_vm4 }
 0x1be   : > { %v8085_v26 = vpack.c.bf16 %v1599_v0, %v1600_v2  ;;  %v8088_v13 = vmul.f32 %v7056_v11, %v7844_v19  ;;  %v8091_v61 = vmul.f32 %v7058_v16, %v7847_v30  ;;  %v2231_v25 = vsel %vm9458_vm1, %v2182_v31, %v2183_v18  ;;  %v7060_v14 = vpop.eup %7059 }
 0x1bf   : > { %9563 = vst [vmem:[#allocation33_spill] sm:$0xff] %v8077_v35  ;;  %9564 = vst [vmem:[#allocation34_spill] sm:$0xff] %v8083_v1  ;;  %v9566_v38 = vrot.slane %v7773_v36, 1  ;;  %v8100_v20 = vrot.slane %v8001_v33, 7  ;;  %v2185_v0 = vrot.slane %v7799_v10, 1  ;;  %v8104_v19 = vadd.s32 96, %v7728_v37 }
 0x1c0   : > { %9565 = vst [vmem:[#allocation35_spill] sm:$0xff] %v8085_v26  ;;  %v7062_v30 = vpop.eup %7061  ;;  %v2184_v16 = vrot.slane %v7776_v45, 1  ;;  %v2187_v11 = vrot.slane %v7793_v3, 1  ;;  %v1594_v29 = vrot.slane %v8091_v61, 7  ;;  %v2188_v2 = vrot.slane %v7819_v47, 1 }
 0x1c1   : > { %v2232_v56 = vsel %vm9458_vm1, %v9566_v38, %v2182_v31  ;;  %v8112_v31 = vmul.f32 %v7060_v14, %v7853_v7  ;;  %v8116_v38 = vmul.f32 %v7062_v30, %v7859_v52  ;;  %v9568_v33 = vrot.slane %v7738_v59, 7 }
 0x1c2   : > { %v8106_v44 = vpack.c.bf16 %v2231_v25, %v2232_v56  ;;  %v9569_v56 = vrot.slane %v7711_v9, 7  ;;  %v2186_v7 = vrot.slane %v7825_v6, 1  ;;  %v2946_v14 = vrot.slane %v8088_v13, 7 }
 0x1c3   : > { %v8123_v25 = vsel %vm1596_vm0, %v8100_v20, %v9568_v33  ;;  %v8133_v52 = vrot.slane %v8112_v31, 7  ;;  %vm8135_vm5 = vcmp.ge.s32.totalorder %v1097_v8, 1  ;;  %v1598_v33 = vsel %vm1596_vm0, %v1593_v51, %v1594_v29 }
 0x1c4   : > { %9567 = vst [vmem:[#allocation36_spill] sm:$0xff] %v8106_v44  ;;  %v1624_v45 = vsel %vm1596_vm0, %v9569_v56, %v8100_v20  ;;  %v2189_v44 = vrot.slane %v7856_v58, 1  ;;  %v2190_v9 = vrot.slane %v7873_v17, 1  ;;  %v1595_v56 = vrot.slane %v8116_v38, 7  ;;  %vm8261_vm11 = vmpackc.low %vm9476_vm6, %vm8135_vm5 }
 0x1c5   : > { %v2229_v35 = vsel %vm9458_vm1, %v2184_v16, %v2185_v0  ;;  %v9572_v8 = vmov 0  ;;  %v2979_v51 = vsel %vm1596_vm0, %v8133_v52, %v7780_v50  ;;  %v5324_v59 = vpack.c.bf16 %v8123_v25, %v1624_v45 }
 0x1c6   : > { %v9573_v8 = vsel %vm8149_vm7, 4294967295, %v9572_v8  ;;  %v2948_v26 = vsel %vm1596_vm0, %v2946_v14, %v8133_v52  ;;  %v8163_v1 = vpack.c.bf16 %v7783_v60, %v7773_v36  ;;  %v5446_v27 = vpack.c.bf16 %v7840_v4, %v2979_v51 }
 0x1c7   : > { %v1628_v55 = vsel %vm1596_vm0, %v1595_v56, %v7735_v57  ;;  %v9575_v50 = vmov 0  ;;  %v1597_v45 = vsel %vm1596_vm0, %v1594_v29, %v1595_v56  ;;  %v2949_v60 = vsel %vm1596_vm0, %v1595_v56, %v2946_v14 }
 0x1c8   : > { %9574 = vst [vmem:[#allocation37_spill] sm:$0xff] %v8163_v1  ;;  %v9576_v50 = vsel %vm8172_vm8, 4294967295, %v9575_v50  ;;  %v5318_v1 = vpack.c.bf16 %v7735_v57, %v1628_v55  ;;  %v8181_v51 = vpack.c.bf16 %v1597_v45, %v1598_v33  ;;  %v8183_v36 = vpack.c.bf16 %v2948_v26, %v2949_v60  ;;  %6285 = vmatprep.mubr.msk.bf16.mxu1 %vm8149_vm7, %v5446_v27  ;;  %v6880_v55 = vld [vmem:[#allocation8 + $0x148] sm:$0xff]  }
 0x1c9   : > { %v2230_v22 = vsel %vm9458_vm1, %v2183_v18, %v2184_v16  ;;  %v2191_v34 = vrot.slane %v7850_v41, 1  ;;  %v9579_v29 = vmov 0  ;;  %v2227_v26 = vsel %vm9458_vm1, %v2186_v7, %v2187_v11  ;;  %6286 = vmatmul.mubr.msk.bf16.vlgmr.msra.gmra.mrb[0].mxu1 %vm8172_vm8, %v5324_v59 }
 0x1ca   : > { %9577 = vst [vmem:[#allocation38_spill] sm:$0xff] %v8181_v51  ;;  %9578 = vst [vmem:[#allocation39_spill] sm:$0xff] %v8183_v36  ;;  %v9580_v29 = vsel %vm8193_vm9, 4294967295, %v9579_v29  ;;  %v8197_v14 = vpack.c.bf16 %v2229_v35, %v2230_v22  ;;  %v2228_v18 = vsel %vm9458_vm1, %v2185_v0, %v2186_v7  ;;  %v2192_v16 = vrot.slane %v7862_v12, 1  ;;  %6093 = vmatprep.mubr.msk.bf16.mxu0 %vm8149_vm7, %v5318_v1 }
 0x1cb   : > { %9581 = vst [vmem:[#allocation40_spill] sm:$0xff] %v9580_v29  ;;  %v2193_v33 = vrot.slane %v7900_v42, 1  ;;  %v8209_v56 = vpack.c.bf16 %v2227_v26, %v2228_v18  ;;  %v2225_v35 = vsel %vm9458_vm1, %v2188_v2, %v2189_v44  ;;  %6318 = vmatpush3.bf16.msra.mxu1 %v7611_v40  ;;  %v9582_v0 = vpack.c.bf16 %v7840_v4, %v7870_v46  ;;  %v6881_v4 = vld [vmem:[#allocation8 + $0x150] sm:$0xff]  }
 0x1cc   : > { %vm8219_vm10 = vcmp.ge.s32.totalorder %v1111_v23, 1  ;;  %v1125_v1 = vand.u32 15, %v8081_v43  ;;  %v2226_v27 = vsel %vm9458_vm1, %v2187_v11, %v2188_v2  ;;  %v8228_v45 = vpack.c.bf16 %v7825_v6, %v7799_v10  ;;  %6289 = vmatprep.mubr.msk.bf16.mxu1 %vm8193_vm9, %v7891_v5  ;;  %6319 = vmatprep.subr.bf16.mxu1 %v6880_v55  ;;  %v9585_v11 = vld [vmem:[#allocation13_spill] sm:$0xff]  ;;  %v6887_v26 = vld [vmem:[#allocation8 + $0x50] sm:$0xff]  }
 0x1cd   : > { %6094 = vmatmul.mubr.msk.bf16.vlgmr.msra.gmra.mrb[32].mxu0 %vm8172_vm8, %v9582_v0  ;;  %v2194_v40 = vrot.slane %v7926_v24, 1  ;;  %v8236_v46 = vpack.c.bf16 %v2225_v35, %v2226_v27  ;;  %v2223_v23 = vsel %vm9458_vm1, %v2190_v9, %v2191_v34  ;;  %v2224_v43 = vsel %vm9458_vm1, %v2189_v44, %v2190_v9  ;;  %vm8279_vm13 = vmpackc.low %vm9476_vm6, %vm8219_vm10 }
 0x1ce   : > { %6097 = vmatprep.mubr.msk.bf16.mxu0 %vm8193_vm9, %v5324_v59  ;;  %v2197_v10 = vrot.slane %v7956_v63, 1  ;;  %v1139_v6 = vand.u32 15, %v8104_v19  ;;  %6126 = vmatpush3.bf16.msra.mxu0 %v9585_v11  ;;  %v8245_v2 = vpack.c.bf16 %v2223_v23, %v2224_v43  ;;  %v8249_v59 = vpack.c.bf16 %v7819_v47, %v7793_v3  ;;  %v9595_v43 = vld [vmem:[#allocation21_spill] sm:$0xff] }
 0x1cf   : > { %v2195_v60 = vrot.slane %v7930_v54, 1  ;;  %v2196_v22 = vrot.slane %v7934_v28, 1  ;;  %6127 = vmatprep.subr.bf16.mxu0 %v6885_v32  ;;  %v2221_v44 = vsel %vm9458_vm1, %v2192_v16, %v2193_v33  ;;  %v2222_v19 = vsel %vm9458_vm1, %v2191_v34, %v2192_v16  ;;  %6320 = vmatpush3.bf16.msra.mxu1 %v6880_v55 }
 0x1d0   : > { %v2198_v9 = vrot.slane %v7974_v39, 1  ;;  %v9586_v3 = vmov 0  ;;  %vm8265_vm12 = vcmp.ge.s32.totalorder %v1125_v1, 1  ;;  %v8269_v18 = vpack.c.bf16 %v2221_v44, %v2222_v19  ;;  %6321 = vmatprep.subr.bf16.mxu1 %v6881_v4  ;;  %v6882_v1 = vld [vmem:[#allocation8 + $0x158] sm:$0xff]  }
 0x1d1   : > { %v9587_v3 = vsel %vm8261_vm11, 4294967295, %v9586_v3  ;;  %v8273_v35 = vpack.c.bf16 %v7873_v17, %v7856_v58  ;;  %v2199_v34 = vrot.slane %v7966_v49, 1  ;;  %v9591_v30 = vmov 0  ;;  %v9594_v17 = vld [vmem:[#allocation24_spill] sm:$0xff]  ;;  %6290 = vmatmul.mubr.msk.bf16.gmra.mrb[4].mxu1 %vm8261_vm11, %v9595_v43  ;;  %vm8351_vm15 = vmpackc.low %vm9476_vm6, %vm8265_vm12 }
 0x1d2   : > { %9588 = vst [vmem:[#allocation13_spill] sm:$0xff] %v9587_v3  ;;  %v9592_v30 = vsel %vm8279_vm13, 4294967295, %v9591_v30  ;;  %v2219_v55 = vsel %vm9458_vm1, %v2194_v40, %v2195_v60  ;;  %v2220_v16 = vsel %vm9458_vm1, %v2193_v33, %v2194_v40  ;;  %v8289_v58 = vpack.c.bf16 %v7862_v12, %v7850_v41  ;;  %6128 = vmatpush3.bf16.msra.mxu0 %v6885_v32  ;;  %v6888_v41 = vld [vmem:[#allocation8 + $0x58] sm:$0xff]  }
 0x1d3   : > { %9593 = vst [vmem:[#allocation41_spill] sm:$0xff] %v9592_v30  ;;  %v2200_v0 = vrot.slane %v9594_v17, 1  ;;  %v2201_v7 = vrot.slane %v8015_v21, 1  ;;  %v8293_v27 = vpack.c.bf16 %v2219_v55, %v2220_v16  ;;  %v2217_v23 = vsel %vm9458_vm1, %v2196_v22, %v2197_v10  ;;  %6129 = vmatprep.subr.bf16.mxu0 %v6887_v26  ;;  %6322 = vmatpush3.bf16.msra.mxu1 %v6881_v4 }
 0x1d4   : > { %vm8300_vm14 = vcmp.ge.s32.totalorder %v1139_v6, 1  ;;  %v1033_v12 = vadd.s32 112, %v7728_v37  ;;  %v2218_v32 = vsel %vm9458_vm1, %v2195_v60, %v2196_v22  ;;  %v8309_v40 = vpack.c.bf16 %v7926_v24, %v7900_v42  ;;  %v9598_v6 = vld [vmem:[#allocation22_spill] sm:$0xff]  ;;  %6323 = vmatprep.subr.bf16.mxu1 %v6882_v1 }
 0x1d5   : > { %v2202_v11 = vrot.slane %v8030_v53, 1  ;;  %6098 = vmatmul.mubr.msk.bf16.gmra.mrb[36].mxu0 %vm8261_vm11, %v7891_v5  ;;  %6293 = vmatprep.mubr.msk.bf16.mxu1 %vm8279_vm13, %v9598_v6  ;;  %v1035_v44 = vadd.s32 128, %v7728_v37  ;;  %v8319_v19 = vpack.c.bf16 %v2217_v23, %v2218_v32  ;;  %v2215_v60 = vsel %vm9458_vm1, %v2198_v9, %v2199_v34  ;;  %v6883_v23 = vld [vmem:[#allocation8 + $0x160] sm:$0xff]   ;;  %vm8368_vm2 = vmpackc.low %vm9476_vm6, %vm8300_vm14 }
 0x1d6   : > { %v2203_v42 = vrot.slane %v8004_v62, 1  ;;  %v2205_v24 = vrot.slane %v8091_v61, 1  ;;  %6101 = vmatprep.mubr.msk.bf16.mxu0 %vm8279_vm13, %v9595_v43  ;;  %v2216_v22 = vsel %vm9458_vm1, %v2197_v10, %v2198_v9  ;;  %v8332_v55 = vpack.c.bf16 %v7934_v28, %v7930_v54  ;;  %6130 = vmatpush3.bf16.msra.mxu0 %v6887_v26  ;;  %v6890_v9 = vld [vmem:[#allocation8 + $0x60] sm:$0xff]  }
 0x1d7   : > { %v2204_v16 = vrot.slane %v8024_v15, 1  ;;  %v8335_v32 = vpack.c.bf16 %v2215_v60, %v2216_v22  ;;  %v2213_v3 = vsel %vm9458_vm1, %v2200_v0, %v2201_v7  ;;  %v2214_v4 = vsel %vm9458_vm1, %v2199_v34, %v2200_v0  ;;  %6131 = vmatprep.subr.bf16.mxu0 %v6888_v41  ;;  %6324 = vmatpush3.bf16.msra.mxu1 %v6882_v1  ;;  %v9606_v22 = vld [vmem:[#allocation23_spill] sm:$0xff]  ;;  %v6891_v1 = vld [vmem:[#allocation8 + $0x68] sm:$0xff]  }
 0x1d8   : > { %v2206_v30 = vrot.slane %v8116_v38, 1  ;;  %v1153_v10 = vand.u32 15, %v1033_v12  ;;  %v8342_v54 = vpack.c.bf16 %v2213_v3, %v2214_v4  ;;  %v8346_v28 = vpack.c.bf16 %v7974_v39, %v7956_v63  ;;  %6325 = vmatprep.subr.bf16.mxu1 %v6883_v23 }
 0x1d9   : > { %v9599_v26 = vmov 0  ;;  %v1167_v60 = vand.u32 15, %v1035_v44  ;;  %v2211_v34 = vsel %vm9458_vm1, %v2202_v11, %v2203_v42  ;;  %v2212_v0 = vsel %vm9458_vm1, %v2201_v7, %v2202_v11  ;;  %6294 = vmatmul.mubr.msk.bf16.gmra.mrb[8].mxu1 %vm8351_vm15, %v9606_v22 }
 0x1da   : > { %v9600_v26 = vsel %vm8351_vm15, 4294967295, %v9599_v26  ;;  %v8361_v3 = vpack.c.bf16 %v9594_v17, %v7966_v49  ;;  %v3316_v63 = vrot.slane %v8088_v13, 1  ;;  %v3317_v39 = vrot.slane %v8112_v31, 1  ;;  %v6886_v17 = vld [vmem:[#allocation8 + $0x168] sm:$0xff]   ;;  %6132 = vmatpush3.bf16.msra.mxu0 %v6888_v41 }
 0x1db   : > { %9601 = vst [vmem:[#allocation24_spill] sm:$0xff] %v9600_v26  ;;  %v9602_v47 = vmov 0  ;;  %v8372_v12 = vpack.c.bf16 %v2211_v34, %v2212_v0  ;;  %v2209_v7 = vsel %vm9458_vm1, %v2204_v16, %v2205_v24  ;;  %v9605_v11 = vmov 0.0   ;;  %6133 = vmatprep.subr.bf16.mxu0 %v6890_v9  ;;  %6326 = vmatpush3.bf16.msra.mxu1 %v6883_v23  ;;  %v9671_v26 = vld [vmem:[#allocation37_spill] sm:$0xff] }
 0x1dc   : > { %v9603_v47 = vsel %vm8368_vm2, 4294967295, %v9602_v47  ;;  %v8377_v49 = vrot.slane %v9605_v11, 1  ;;  %v2210_v33 = vsel %vm9458_vm1, %v2203_v42, %v2204_v16  ;;  %v8383_v44 = vpack.c.bf16 %v8030_v53, %v8015_v21  ;;  %v9607_v21 = vld [vmem:[#allocation25_spill] sm:$0xff]  ;;  %6327 = vmatprep.subr.bf16.mxu1 %v6886_v17  ;;  %v6893_v11 = vld [vmem:[#allocation8 + $0x70] sm:$0xff]   ;;  %v6894_v16 = vld [vmem:[#allocation8 + $0x78] sm:$0xff]  }
 0x1dd   : > { %9604 = vst [vmem:[#allocation42_spill] sm:$0xff] %v9603_v47  ;;  %v8388_v4 = vpack.c.bf16 %v2209_v7, %v2210_v33  ;;  %v8392_v34 = vsel %vm9458_vm1, %v2205_v24, %v2206_v30  ;;  %v3319_v41 = vsel %vm9458_vm1, %v2206_v30, %v3316_v63  ;;  %6102 = vmatmul.mubr.msk.bf16.gmra.mrb[40].mxu0 %vm8351_vm15, %v9598_v6  ;;  %vm8402_vm3 = vcmp.ge.s32.totalorder %v1153_v10, 1  ;;  %v6889_v7 = vld [vmem:[#allocation8 + $0x170] sm:$0xff]   ;;  %v9620_v33 = vld [vmem:[#allocation26_spill] sm:$0xff]  ;;  %v9670_v47 = vld [vmem:[#allocation20_spill] sm:$0xff] }
 0x1de   : > { %6297 = vmatprep.mubr.msk.bf16.mxu1 %vm8368_vm2, %v9607_v21  ;;  %v8407_v42 = vpack.c.bf16 %v3319_v41, %v8392_v34  ;;  %v8411_v24 = vpack.c.bf16 %v8024_v15, %v8004_v62  ;;  %6105 = vmatprep.mubr.msk.bf16.mxu0 %vm8368_vm2, %v9606_v22  ;;  %vm8416_vm4 = vcmp.ge.s32.totalorder %v1167_v60, 1  ;;  %v1037_v10 = vadd.s32 144, %v7728_v37  ;;  %vm8457_vm5 = vmpackc.low %vm9476_vm6, %vm8402_vm3  ;;  %v9629_v60 = vld [vmem:[#allocation30_spill] sm:$0xff] }
 0x1df   : > { %v8423_v0 = vsel %vm9458_vm1, %v3316_v63, %v3317_v39  ;;  %v8428_v62 = vsel %vm9458_vm1, %v3317_v39, %v8040_v48  ;;  %v1039_v15 = vadd.s32 160, %v7728_v37  ;;  %6134 = vmatpush3.bf16.msra.mxu0 %v6890_v9  ;;  %v8435_v23 = vpack.c.bf16 %v8116_v38, %v8091_v61  ;;  %vm8483_vm10 = vmpackc.low %vm9476_vm6, %vm8416_vm4  ;;  %6328 = vmatpush3.bf16.msra.mxu1 %v6886_v17  ;;  %v9621_v17 = vld [vmem:[#allocation27_spill] sm:$0xff] }
 0x1e0   : > { %v8441_v63 = vsel %vm9458_vm1, %v8377_v49, %v8040_v48  ;;  %6135 = vmatprep.subr.bf16.mxu0 %v6891_v1  ;;  %v8447_v9 = vpack.c.bf16 %v8112_v31, %v8088_v13  ;;  %v8452_v61 = vsel %vm9458_vm1, %v2206_v30, %v8377_v49  ;;  %v9612_v48 = vmov 0  ;;  %6329 = vmatprep.subr.bf16.mxu1 %v6889_v7 }
 0x1e1   : > { %v9613_v48 = vsel %vm8457_vm5, 4294967295, %v9612_v48  ;;  %v8467_v13 = vsel %vm1596_vm0, %v7735_v57, %v8100_v20  ;;  %v8473_v31 = vsel %vm1596_vm0, %v8133_v52, %v7735_v57  ;;  %v8478_v30 = vsel %vm9458_vm1, %v3317_v39, %v8377_v49  ;;  %v6892_v39 = vld [vmem:[#allocation8 + $0x178] sm:$0xff]   ;;  %6298 = vmatmul.mubr.msk.bf16.gmra.mrb[12].mxu1 %vm8457_vm5, %v9620_v33  ;;  %v8507_v52 = vld [vmem:[#allocation8 + $0x80] sm:$0xff]  }
 0x1e2   : > { %9614 = vst [vmem:[#allocation43_spill] sm:$0xff] %v9613_v48  ;;  %9615 = vst [vmem:[#allocation44_spill] sm:$0xff] %v8473_v31  ;;  %v9617_v41 = vmov 0  ;;  %v1181_v20 = vand.u32 15, %v1037_v10  ;;  %v1195_v38 = vand.u32 15, %v1039_v15  ;;  %6301 = vmatprep.mubr.msk.bf16.mxu1 %vm8483_vm10, %v9621_v17  ;;  %v1043_v10 = vadd.s32 192, %v7728_v37 }
 0x1e3   : > { %9616 = vst [vmem:[#allocation45_spill] sm:$0xff] %v8478_v30  ;;  %v9618_v41 = vsel %vm8483_vm10, 4294967295, %v9617_v41  ;;  %6136 = vmatpush3.bf16.msra.mxu0 %v6891_v1  ;;  %v1041_v1 = vadd.s32 176, %v7728_v37  ;;  %6330 = vmatpush3.bf16.msra.mxu1 %v6889_v7  ;;  %v8505_v15 = vld [vmem:[#allocation8 + $0x1c0] sm:$0xff]   ;;  %v9622_v53 = vmov 0  ;;  %v9636_v31 = vld [vmem:[#allocation31_spill] sm:$0xff] }
 0x1e4   : > { %9619 = vst [vmem:[#allocation46_spill] sm:$0xff] %v9618_v41  ;;  %6137 = vmatprep.subr.bf16.mxu0 %v6893_v11  ;;  %vm1453_vm0 = vcmp.ge.s32.totalorder %v1181_v20, 1  ;;  %vm1455_vm12 = vcmp.ge.s32.totalorder %v1195_v38, 1  ;;  %6331 = vmatprep.subr.bf16.mxu1 %v6892_v39  ;;  %v9625_v20 = vmov 0  ;;  %v1223_v38 = vand.u32 15, %v1043_v10 }
 0x1e5   : > { %6106 = vmatmul.mubr.msk.bf16.gmra.mrb[44].mxu0 %vm8457_vm5, %v9607_v21  ;;  %vm8510_vm14 = vmpackc.low %vm9476_vm6, %vm1453_vm0  ;;  %v1209_v7 = vand.u32 15, %v1041_v1  ;;  %v9630_v1 = vmov 0  ;;  %v9633_v10 = vmov 0  ;;  %v9680_v29 = vmov 0 }
 0x1e6   : > { %6109 = vmatprep.mubr.msk.bf16.mxu0 %vm8483_vm10, %v9620_v33  ;;  %v9623_v53 = vsel %vm8510_vm14, 4294967295, %v9622_v53  ;;  %vm8515_vm3 = vmpackc.low %vm9476_vm6, %vm1455_vm12  ;;  %vm1459_vm0 = vcmp.ge.s32.totalorder %v1223_v38, 1  ;;  %v1049_v38 = vadd.s32 240, %v7728_v37  ;;  %v9682_v43 = vmov 0 }
 0x1e7   : > { %6138 = vmatpush3.bf16.msra.mxu0 %v6893_v11  ;;  %9624 = vst [vmem:[#allocation47_spill] sm:$0xff] %v9623_v53  ;;  %v9626_v20 = vsel %vm8515_vm3, 4294967295, %v9625_v20  ;;  %6332 = vmatpush3.bf16.msra.mxu1 %v6892_v39  ;;  %v9628_v11 = vld [vmem:[#allocation29_spill] sm:$0xff]  ;;  %vm1457_vm4 = vcmp.ge.s32.totalorder %v1209_v7, 1  ;;  %v1045_v39 = vadd.s32 208, %v7728_v37  ;;  %vm8541_vm1 = vmpackc.low %vm9476_vm6, %vm1459_vm0  ;;  %v9637_v7 = vld [vmem:[#allocation34_spill] sm:$0xff] }
 0x1e8   : > { %6139 = vmatprep.subr.bf16.mxu0 %v6894_v16  ;;  %9627 = vst [vmem:[#allocation48_spill] sm:$0xff] %v9626_v20  ;;  %6365 = vmatprep.subr.bf16.mxu1 %v8505_v15  ;;  %vm8536_vm12 = vmpackc.low %vm9476_vm6, %vm1457_vm4  ;;  %v9634_v10 = vsel %vm8541_vm1, 4294967295, %v9633_v10  ;;  %v1265_v20 = vand.u32 15, %v1049_v38  ;;  %v9645_v38 = vmov 0 }
 0x1e9   : > { %6302 = vmatmul.mubr.msk.bf16.gmra.mrb[16].mxu1 %vm8510_vm14, %v9628_v11  ;;  %v9631_v1 = vsel %vm8536_vm12, 4294967295, %v9630_v1  ;;  %9635 = vst [vmem:[#allocation50_spill] sm:$0xff] %v9634_v10  ;;  %v1237_v30 = vand.u32 15, %v1045_v39  ;;  %v1020_v39 = vadd.s32 8, %v7728_v37  ;;  %v9644_v10 = vld [vmem:[#allocation35_spill] sm:$0xff] }
 0x1ea   : > { %6305 = vmatprep.mubr.msk.bf16.mxu1 %vm8515_vm3, %v9629_v60  ;;  %9632 = vst [vmem:[#allocation49_spill] sm:$0xff] %v9631_v1  ;;  %v9641_v1 = vmov 0 }
 0x1eb   : > { %6140 = vmatpush3.bf16.msra.mxu0 %v6894_v16  ;;  %v1047_v16 = vadd.s32 224, %v7728_v37  ;;  %vm1461_vm4 = vcmp.ge.s32.totalorder %v1237_v30, 1  ;;  %v1062_v53 = vand.u32 15, %v1020_v39  ;;  %v1024_v30 = vadd.s32 40, %v7728_v37 }
 0x1ec   : > { %6173 = vmatprep.subr.bf16.mxu0 %v8507_v52 }
 0x1ed   : > { %6110 = vmatmul.mubr.msk.bf16.gmra.mrb[48].mxu0 %vm8510_vm14, %v9621_v17  ;;  %v1251_v57 = vand.u32 15, %v1047_v16  ;;  %v9638_v16 = vmov 0  ;;  %v6898_v17 = vld [vmem:[#allocation8 + $0x1d8] sm:$0xff]  }
 0x1ee   : > { %6113 = vmatprep.mubr.msk.bf16.mxu0 %vm8515_vm3, %v9628_v11  ;;  %vm8560_vm3 = vmpackc.low %vm9476_vm6, %vm1461_vm4  ;;  %vm1465_vm4 = vcmp.ge.s32.totalorder %v1265_v20, 1  ;;  %v1090_v20 = vand.u32 15, %v1024_v30 }
 0x1ef   : > { %vm1463_vm0 = vcmp.ge.s32.totalorder %v1251_v57, 1  ;;  %v9639_v16 = vsel %vm8560_vm3, 4294967295, %v9638_v16  ;;  %v1022_v57 = vadd.s32 24, %v7728_v37 }
 0x1f0   : > { %9640 = vst [vmem:[#allocation51_spill] sm:$0xff] %v9639_v16 }
 0x1f1   : > { %6306 = vmatmul.mubr.msk.bf16.gmra.mrb[20].mxu1 %vm8536_vm12, %v9636_v31  ;;  %v1076_v16 = vand.u32 15, %v1022_v57  ;;  %v1026_v57 = vadd.s32 56, %v7728_v37 }
 0x1f2   : > { %6309 = vmatprep.mubr.msk.bf16.mxu1 %vm8541_vm1, %v9637_v7 }
 0x1f5   : > { %6114 = vmatmul.mubr.msk.bf16.gmra.mrb[52].mxu0 %vm8536_vm12, %v9629_v60  ;;  %vm8565_vm12 = vmpackc.low %vm9476_vm6, %vm1463_vm0  ;;  %vm1468_vm0 = vcmp.le.s32.totalorder %v1062_v53, 14 }
 0x1f6   : > { %6117 = vmatprep.mubr.msk.bf16.mxu0 %vm8541_vm1, %v9636_v31  ;;  %v9642_v1 = vsel %vm8565_vm12, 4294967295, %v9641_v1  ;;  %vm8584_vm1 = vmpackc.low %vm9476_vm6, %vm1465_vm4  ;;  %vm1470_vm4 = vcmp.le.s32.totalorder %v1076_v16, 14  ;;  %v9652_v31 = vld [vmem:[#allocation19_spill] sm:$0xff] }
 0x1f7   : > { %9643 = vst [vmem:[#allocation52_spill] sm:$0xff] %v9642_v1  ;;  %v9646_v38 = vsel %vm8584_vm1, 4294967295, %v9645_v38  ;;  %v9650_v1 = vld [vmem:[#allocation17_spill] sm:$0xff]  ;;  %v9653_v60 = vrot.slane %v9652_v31, 1 }
 0x1f8   : > { %9647 = vst [vmem:[#allocation53_spill] sm:$0xff] %v9646_v38  ;;  %v2180_v53 = vrot.slane %v9650_v1, 1  ;;  %v9655_v38 = vld [vmem:[#allocation32_spill] sm:$0xff] }
 0x1f9   : > { %6310 = vmatmul.mubr.msk.bf16.gmra.mrb[24].mxu1 %vm8560_vm3, %v9644_v10 }
 0x1fa   : > { %6313 = vmatprep.mubr.msk.bf16.mxu1 %vm8565_vm12, %v8181_v51 }
 0x1fd   : > { %6118 = vmatmul.mubr.msk.bf16.gmra.mrb[56].mxu0 %vm8560_vm3, %v9637_v7  ;;  %vm8589_vm3 = vmpackc.low %vm1468_vm0, %vm9476_vm6  ;;  %v9484_v7 = vmov 0.0|0.0   ;;  %vm9654_vm0 = vcmp.lt.s32.totalorder %v7728_v37, 7  ;;  %vm1472_vm6 = vcmp.le.s32.totalorder %v1090_v20, 14  ;;  %v9662_v20 = vld [vmem:[#allocation28_spill] sm:$0xff] }
 0x1fe   : > { %6121 = vmatprep.mubr.msk.bf16.mxu0 %vm8565_vm12, %v9644_v10  ;;  %v9651_v10 = vld [vmem:[#allocation33_spill] sm:$0xff]  ;;  %v2233_v30 = vsel %vm9654_vm0, %v2180_v53, %v9653_v60  ;;  %vm9657_vm12 = vmmov 1   ;;  %v6896_v60 = vld [vmem:[#allocation8 + $0x1c8] sm:$0xff]  }
 0x1ff   : > { %vm8614_vm14 = vmpackc.low %vm1470_vm4, %vm9657_vm12 }
 0x200   : > { %vm8621_vm10 = vmpackc.low %vm1472_vm6, %vm9657_vm12 }
 0x201   : > { %6314 = vmatmul.mubr.msk.bf16.gmra.mrb[28].mxu1 %vm8584_vm1, %v8183_v36  ;;  %v1028_v36 = vadd.s32 72, %v7728_v37 }
 0x202   : > { %6333 = vmatprep.mubr.msk.bf16.mxu1 %vm8589_vm3, %v9651_v10 }
 0x203   : > { %v1118_v11 = vand.u32 15, %v1028_v36  ;;  %v6897_v36 = vld [vmem:[#allocation8 + $0x1d0] sm:$0xff]  }
 0x205   : > { %6122 = vmatmul.mubr.msk.bf16.gmra.mrb[60].mxu0 %vm8584_vm1, %v8181_v51  ;;  %vm9656_vm1 = vmmov %vm9654_vm0  ;;  %vm1476_vm6 = vcmp.le.s32.totalorder %v1118_v11, 14 }
 0x206   : > { %6141 = vmatprep.mubr.bf16.mxu0 %v9484_v7  ;;  %v2234_v51 = vsel %vm9656_vm1, %v9655_v38, %v2180_v53  ;;  %v1104_v7 = vand.u32 15, %v1026_v57  ;;  %v8630_v53 = vpack.c.bf16 %v9650_v1, %v9662_v20  ;;  %v6901_v38 = vld [vmem:[#allocation8 + $0x88] sm:$0xff]   ;;  %v9664_v57 = vld [vmem:[#allocation36_spill] sm:$0xff]  ;;  %v1032_v1 = vadd.s32 104, %v7728_v37  ;;  %vm8647_vm0 = vmpackc.low %vm1476_vm6, %vm9657_vm12 }
 0x207   : > { %v8618_v16 = vpack.c.bf16 %v2233_v30, %v2234_v51  ;;  %v9663_v51 = vld [vmem:[#allocation14_spill] sm:$0xff]  ;;  %v1030_v30 = vadd.s32 88, %v7728_v37 }
 0x208   : > { %vm1474_vm1 = vcmp.le.s32.totalorder %v1104_v7, 14  ;;  %v1146_v11 = vand.u32 15, %v1032_v1  ;;  %v6906_v1 = vld [vmem:[#allocation8 + $0xa0] sm:$0xff]  }
 0x209   : > { %6334 = vmatmul.mubr.msk.bf16.vlgmr.msra.gmra.mrb[0].mxu1 %vm8614_vm14, %v8618_v16  ;;  %vm8642_vm4 = vmpackc.low %vm1474_vm1, %vm9657_vm12  ;;  %v1132_v48 = vand.u32 15, %v1030_v30  ;;  %v1036_v30 = vadd.s32 136, %v7728_v37 }
 0x20a   : > { %6366 = vmatpush3.bf16.msra.mxu1 %v8505_v15  ;;  %6337 = vmatprep.mubr.msk.bf16.mxu1 %vm8621_vm10, %v9664_v57  ;;  %v6903_v15 = vld [vmem:[#allocation8 + $0x90] sm:$0xff]   ;;  %vm1480_vm6 = vcmp.le.s32.totalorder %v1146_v11, 14  ;;  %v6902_v11 = vld [vmem:[#allocation8 + $0x1e8] sm:$0xff]  }
 0x20b   : > { %6367 = vmatprep.subr.bf16.mxu1 %v6896_v60  ;;  %vm1478_vm1 = vcmp.le.s32.totalorder %v1132_v48, 14  ;;  %vm8671_vm2 = vmpackc.low %vm1480_vm6, %vm9657_vm12 }
 0x20c   : > { %vm8666_vm5 = vmpackc.low %vm1478_vm1, %vm9657_vm12 }
 0x20d   : > { %6142 = vmatmul.mubr.bf16.vlgmr.msra.gmra.mrb[32].mxu0 %v9663_v51 }
 0x20e   : > { %6145 = vmatprep.mubr.bf16.mxu0 %v8630_v53  ;;  %6174 = vmatpush3.bf16.msra.mxu0 %v8507_v52  ;;  %v9669_v52 = vld [vmem:[#allocation18_spill] sm:$0xff] }
 0x20f   : > { %6175 = vmatprep.subr.bf16.mxu0 %v6901_v38  ;;  %6368 = vmatpush3.bf16.msra.mxu1 %v6896_v60  ;;  %v8656_v33 = vpack.c.bf16 %v9670_v47, %v9669_v52  ;;  %v6904_v60 = vld [vmem:[#allocation8 + $0x98] sm:$0xff]   ;;  %v6899_v47 = vld [vmem:[#allocation8 + $0x1e0] sm:$0xff]  }
 0x210   : > { %6369 = vmatprep.subr.bf16.mxu1 %v6897_v36 }
 0x211   : > { %6338 = vmatmul.mubr.msk.bf16.gmra.mrb[4].mxu1 %vm8642_vm4, %v8197_v14 }
 0x212   : > { %6176 = vmatpush3.bf16.msra.mxu0 %v6901_v38  ;;  %6341 = vmatprep.mubr.msk.bf16.mxu1 %vm8647_vm0, %v8209_v56  ;;  %v1034_v38 = vadd.s32 120, %v7728_v37 }
 0x213   : > { %6177 = vmatprep.subr.bf16.mxu0 %v6903_v15  ;;  %6370 = vmatpush3.bf16.msra.mxu1 %v6897_v36  ;;  %v1174_v36 = vand.u32 15, %v1036_v30  ;;  %v6909_v30 = vld [vmem:[#allocation8 + $0xb0] sm:$0xff]  }
 0x214   : > { %6371 = vmatprep.subr.bf16.mxu1 %v6898_v17  ;;  %v1160_v48 = vand.u32 15, %v1034_v38  ;;  %v6905_v38 = vld [vmem:[#allocation8 + $0x1f0] sm:$0xff]  }
 0x215   : > { %6146 = vmatmul.mubr.bf16.gmra.mrb[36].mxu0 %v9671_v26  ;;  %vm1484_vm6 = vcmp.le.s32.totalorder %v1174_v36, 14  ;;  %v6908_v36 = vld [vmem:[#allocation8 + $0x1f8] sm:$0xff]  }
 0x216   : > { %6149 = vmatprep.mubr.bf16.mxu0 %v8656_v33  ;;  %6178 = vmatpush3.bf16.msra.mxu0 %v6903_v15  ;;  %v6907_v15 = vld [vmem:[#allocation8 + $0xa8] sm:$0xff]   ;;  %vm1482_vm1 = vcmp.le.s32.totalorder %v1160_v48, 14  ;;  %vm8691_vm13 = vmpackc.low %vm1484_vm6, %vm9657_vm12 }
 0x217   : > { %6179 = vmatprep.subr.bf16.mxu0 %v6904_v60  ;;  %6372 = vmatpush3.bf16.msra.mxu1 %v6898_v17  ;;  %v1038_v17 = vadd.s32 152, %v7728_v37  ;;  %vm8686_vm15 = vmpackc.low %vm1482_vm1, %vm9657_vm12 }
 0x218   : > { %6373 = vmatprep.subr.bf16.mxu1 %v6899_v47 }
 0x219   : > { %6342 = vmatmul.mubr.msk.bf16.gmra.mrb[8].mxu1 %vm8666_vm5, %v8236_v46  ;;  %v1188_v48 = vand.u32 15, %v1038_v17  ;;  %v6911_v17 = vld [vmem:[#allocation8 + $0x180] sm:$0xff]  }
 0x21a   : > { %6180 = vmatpush3.bf16.msra.mxu0 %v6904_v60  ;;  %6345 = vmatprep.mubr.msk.bf16.mxu1 %vm8671_vm2, %v8245_v2  ;;  %v1040_v60 = vadd.s32 168, %v7728_v37 }
 0x21b   : > { %6181 = vmatprep.subr.bf16.mxu0 %v6906_v1  ;;  %6374 = vmatpush3.bf16.msra.mxu1 %v6899_v47  ;;  %vm1486_vm1 = vcmp.le.s32.totalorder %v1188_v48, 14 }
 0x21c   : > { %6375 = vmatprep.subr.bf16.mxu1 %v6902_v11  ;;  %v1202_v47 = vand.u32 15, %v1040_v60  ;;  %v6916_v60 = vld [vmem:[#allocation8 + $0x100] sm:$0xff]   ;;  %vm8706_vm11 = vmpackc.low %vm1486_vm1, %vm9657_vm12 }
 0x21d   : > { %6150 = vmatmul.mubr.bf16.gmra.mrb[40].mxu0 %v8228_v45  ;;  %v9681_v29 = vsel %vm8706_vm11, 4294967295, %v9680_v29 }
 0x21e   : > { %6153 = vmatprep.mubr.bf16.mxu0 %v8249_v59  ;;  %6182 = vmatpush3.bf16.msra.mxu0 %v6906_v1  ;;  %v6910_v1 = vld [vmem:[#allocation8 + $0xb8] sm:$0xff]   ;;  %vm1488_vm6 = vcmp.le.s32.totalorder %v1202_v47, 14  ;;  %v1048_v47 = vadd.s32 232, %v7728_v37 }
 0x21f   : > { %6183 = vmatprep.subr.bf16.mxu0 %v6907_v15  ;;  %6376 = vmatpush3.bf16.msra.mxu1 %v6902_v11  ;;  %v1042_v11 = vadd.s32 184, %v7728_v37  ;;  %vm8711_vm9 = vmpackc.low %vm1488_vm6, %vm9657_vm12 }
 0x220   : > { %6377 = vmatprep.subr.bf16.mxu1 %v6905_v38  ;;  %v9683_v43 = vsel %vm8711_vm9, 4294967295, %v9682_v43 }
 0x221   : > { %6346 = vmatmul.mubr.msk.bf16.gmra.mrb[12].mxu1 %vm8686_vm15, %v8269_v18  ;;  %v1216_v48 = vand.u32 15, %v1042_v11 }
 0x222   : > { %6184 = vmatpush3.bf16.msra.mxu0 %v6907_v15  ;;  %6349 = vmatprep.mubr.msk.bf16.mxu1 %vm8691_vm13, %v8293_v27  ;;  %v1044_v15 = vadd.s32 200, %v7728_v37 }
 0x223   : > { %6185 = vmatprep.subr.bf16.mxu0 %v6909_v30  ;;  %6378 = vmatpush3.bf16.msra.mxu1 %v6905_v38  ;;  %vm1490_vm1 = vcmp.le.s32.totalorder %v1216_v48, 14  ;;  %v1050_v48 = vadd.s32 248, %v7728_v37 }
 0x224   : > { %6379 = vmatprep.subr.bf16.mxu1 %v6908_v36  ;;  %v1230_v38 = vand.u32 15, %v1044_v15  ;;  %vm8726_vm8 = vmpackc.low %vm1490_vm1, %vm9657_vm12  ;;  %v1258_v15 = vand.u32 15, %v1048_v47 }
 0x225   : > { %6154 = vmatmul.mubr.bf16.gmra.mrb[44].mxu0 %v8273_v35  ;;  %v1272_v47 = vand.u32 15, %v1050_v48  ;;  %v9695_v48 = vpack.c.bf16 %v8441_v63, %v8377_v49  ;;  %v6919_v63 = vld [vmem:[#allocation8 + $0x110] sm:$0xff]  }
 0x226   : > { %6157 = vmatprep.mubr.bf16.mxu0 %v8289_v58  ;;  %6186 = vmatpush3.bf16.msra.mxu0 %v6909_v30  ;;  %v1046_v30 = vadd.s32 216, %v7728_v37  ;;  %vm1492_vm6 = vcmp.le.s32.totalorder %v1230_v38, 14  ;;  %v9688_v38 = vmov 0  ;;  %v6917_v37 = vld [vmem:[#allocation8 + $0x108] sm:$0xff]  }
 0x227   : > { %6187 = vmatprep.subr.bf16.mxu0 %v6910_v1  ;;  %6380 = vmatpush3.bf16.msra.mxu1 %v6908_v36  ;;  %vm8731_vm7 = vmpackc.low %vm1492_vm6, %vm9657_vm12  ;;  %vm1496_vm6 = vcmp.le.s32.totalorder %v1258_v15, 14  ;;  %v9694_v15 = vpack.c.bf16 %v8428_v62, %v8423_v0  ;;  %v6913_v62 = vld [vmem:[#allocation8 + $0x190] sm:$0xff]  }
 0x228   : > { %6413 = vmatprep.subr.bf16.mxu1 %v6911_v17  ;;  %v1244_v11 = vand.u32 15, %v1046_v30  ;;  %v9690_v30 = vmov 0 }
 0x229   : > { %6350 = vmatmul.mubr.msk.bf16.gmra.mrb[16].mxu1 %vm8706_vm11, %v8319_v19  ;;  %vm8750_vm11 = vmpackc.low %vm1496_vm6, %vm9657_vm12  ;;  %vm9697_vm6 = vnez %v9683_v43 }
 0x22a   : > { %6188 = vmatpush3.bf16.msra.mxu0 %v6910_v1  ;;  %6353 = vmatprep.mubr.msk.bf16.mxu1 %vm8711_vm9, %v8335_v32  ;;  %v9686_v1 = vmov 0  ;;  %vm1494_vm1 = vcmp.le.s32.totalorder %v1244_v11, 14  ;;  %v9691_v30 = vsel %vm8750_vm11, 4294967295, %v9690_v30  ;;  %v9692_v11 = vmov 0 }
 0x22b   : > { %6221 = vmatprep.subr.bf16.mxu0 %v6916_v60  ;;  %v9687_v1 = vsel %vm8731_vm7, 4294967295, %v9686_v1  ;;  %vm8745_vm9 = vmpackc.low %vm1494_vm1, %vm9657_vm12  ;;  %vm1498_vm1 = vcmp.le.s32.totalorder %v1272_v47, 14  ;;  %v6912_v47 = vld [vmem:[#allocation8 + $0x188] sm:$0xff]  }
 0x22c   : > { %v9689_v38 = vsel %vm8745_vm9, 4294967295, %v9688_v38 }
 0x22d   : > { %6158 = vmatmul.mubr.bf16.gmra.mrb[48].mxu0 %v8309_v40 }
 0x22e   : > { %6161 = vmatprep.mubr.bf16.mxu0 %v8332_v55 }
 0x231   : > { %6354 = vmatmul.mubr.msk.bf16.gmra.mrb[20].mxu1 %vm8726_vm8, %v8342_v54 }
 0x232   : > { %6357 = vmatprep.mubr.msk.bf16.mxu1 %vm8731_vm7, %v8372_v12  ;;  %vm8763_vm7 = vmpackc.low %vm1498_vm1, %vm9657_vm12  ;;  %vm9696_vm12 = vnez %v9681_v29  ;;  %vm9698_vm1 = vnez %v9687_v1 }
 0x233   : > { %v9693_v11 = vsel %vm8763_vm7, 4294967295, %v9692_v11 }
 0x235   : > { %6162 = vmatmul.mubr.bf16.gmra.mrb[52].mxu0 %v8346_v28 }
 0x236   : > { %6165 = vmatprep.mubr.bf16.mxu0 %v8361_v3 }
 0x239   : > { %6358 = vmatmul.mubr.msk.bf16.gmra.mrb[24].mxu1 %vm8745_vm9, %v8388_v4 }
 0x23a   : > { %6361 = vmatprep.mubr.msk.bf16.mxu1 %vm8750_vm11, %v8407_v42 }
 0x23d   : > { %6166 = vmatmul.mubr.bf16.gmra.mrb[56].mxu0 %v8383_v44 }
 0x23e   : > { %6169 = vmatprep.mubr.bf16.mxu0 %v8411_v24 }
 0x241   : > { %6362 = vmatmul.mubr.msk.bf16.gmra.mrb[28].mxu1 %vm8763_vm7, %v9694_v15  ;;  %v6914_v15 = vld [vmem:[#allocation8 + $0x198] sm:$0xff]  }
 0x242   : > { %6381 = vmatprep.mubr.bf16.mxu1 %v8630_v53 }
 0x245   : > { %6170 = vmatmul.mubr.bf16.gmra.mrb[60].mxu0 %v8435_v23 }
 0x246   : > { %6189 = vmatprep.mubr.msk.bf16.mxu0 %vm8589_vm3, %v9695_v48  ;;  %v6923_v48 = vld [vmem:[#allocation8 + $0x128] sm:$0xff]  }
 0x249   : > { %6382 = vmatmul.mubr.bf16.vlgmr.msra.gmra.mrb[0].mxu1 %v9671_v26 }
 0x24a   : > { %6414 = vmatpush3.bf16.msra.mxu1 %v6911_v17  ;;  %6385 = vmatprep.mubr.bf16.mxu1 %v8656_v33  ;;  %v6920_v17 = vld [vmem:[#allocation8 + $0x118] sm:$0xff]  }
 0x24b   : > { %6415 = vmatprep.subr.bf16.mxu1 %v6912_v47 }
 0x24d   : > { %6190 = vmatmul.mubr.msk.bf16.vlgmr.msra.gmra.mrb[32].mxu0 %vm8614_vm14, %v9651_v10  ;;  %v6915_v10 = vld [vmem:[#allocation8 + $0x1a0] sm:$0xff]  }
 0x24e   : > { %6193 = vmatprep.mubr.msk.bf16.mxu0 %vm8621_vm10, %v8618_v16  ;;  %6222 = vmatpush3.bf16.msra.mxu0 %v6916_v60  ;;  %v6918_v60 = vld [vmem:[#allocation8 + $0x1a8] sm:$0xff]  }
 0x24f   : > { %6223 = vmatprep.subr.bf16.mxu0 %v6917_v37  ;;  %6416 = vmatpush3.bf16.msra.mxu1 %v6912_v47  ;;  %v6921_v47 = vld [vmem:[#allocation8 + $0x1b0] sm:$0xff]  }
 0x250   : > { %6417 = vmatprep.subr.bf16.mxu1 %v6913_v62 }
 0x251   : > { %6386 = vmatmul.mubr.bf16.gmra.mrb[4].mxu1 %v8228_v45 }
 0x252   : > { %6224 = vmatpush3.bf16.msra.mxu0 %v6917_v37  ;;  %6389 = vmatprep.mubr.bf16.mxu1 %v8249_v59  ;;  %v6922_v37 = vld [vmem:[#allocation8 + $0x120] sm:$0xff]  }
 0x253   : > { %6225 = vmatprep.subr.bf16.mxu0 %v6919_v63  ;;  %6418 = vmatpush3.bf16.msra.mxu1 %v6913_v62  ;;  %v6925_v62 = vld [vmem:[#allocation8 + $0x130] sm:$0xff]  }
 0x254   : > { %6419 = vmatprep.subr.bf16.mxu1 %v6914_v15 }
 0x255   : > { %6194 = vmatmul.mubr.msk.bf16.gmra.mrb[36].mxu0 %vm8642_vm4, %v9664_v57 }
 0x256   : > { %6197 = vmatprep.mubr.msk.bf16.mxu0 %vm8647_vm0, %v8197_v14  ;;  %6226 = vmatpush3.bf16.msra.mxu0 %v6919_v63  ;;  %v6924_v63 = vld [vmem:[#allocation8 + $0x1b8] sm:$0xff]  }
 0x257   : > { %6227 = vmatprep.subr.bf16.mxu0 %v6920_v17  ;;  %6420 = vmatpush3.bf16.msra.mxu1 %v6914_v15  ;;  %v6926_v15 = vld [vmem:[#allocation8 + $0x138] sm:$0xff]  }
 0x258   : > { %6421 = vmatprep.subr.bf16.mxu1 %v6915_v10 }
 0x259   : > { %6390 = vmatmul.mubr.bf16.gmra.mrb[8].mxu1 %v8273_v35 }
 0x25a   : > { %6228 = vmatpush3.bf16.msra.mxu0 %v6920_v17  ;;  %6393 = vmatprep.mubr.bf16.mxu1 %v8289_v58  ;;  %v6927_v17 = vld [vmem:[#allocation8 + $0x200] sm:$0xff]  }
 0x25b   : > { %6229 = vmatprep.subr.bf16.mxu0 %v6922_v37  ;;  %6422 = vmatpush3.bf16.msra.mxu1 %v6915_v10  ;;  %v9699_v10 = vmov 0.0|0.0  }
 0x25c   : > { %6423 = vmatprep.subr.bf16.mxu1 %v6918_v60 }
 0x25d   : > { %6198 = vmatmul.mubr.msk.bf16.gmra.mrb[40].mxu0 %vm8666_vm5, %v8209_v56 }
 0x25e   : > { %6201 = vmatprep.mubr.msk.bf16.mxu0 %vm8671_vm2, %v8236_v46  ;;  %6230 = vmatpush3.bf16.msra.mxu0 %v6922_v37  ;;  %v9700_v37 = vpack.c.bf16 %v8452_v61, %v8392_v34  ;;  %v9704_v34 = vld [vmem:[#allocation21_spill] sm:$0xff]  ;;  %v9705_v61 = vld [vmem:[#allocation40_spill] sm:$0xff] }
 0x25f   : > { %6231 = vmatprep.subr.bf16.mxu0 %v6923_v48  ;;  %6424 = vmatpush3.bf16.msra.mxu1 %v6918_v60  ;;  %v9701_v60 = vpack.c.bf16 %v8123_v25, %v8467_v13  ;;  %v6929_v25 = vld [vmem:[#allocation8 + $0x210] sm:$0xff]   ;;  %v9707_v13 = vld [vmem:[#allocation22_spill] sm:$0xff] }
 0x260   : > { %6425 = vmatprep.subr.bf16.mxu1 %v6921_v47 }
 0x261   : > { %6394 = vmatmul.mubr.bf16.gmra.mrb[12].mxu1 %v8309_v40 }
 0x262   : > { %6232 = vmatpush3.bf16.msra.mxu0 %v6923_v48  ;;  %6397 = vmatprep.mubr.bf16.mxu1 %v8332_v55  ;;  %v6928_v48 = vld [vmem:[#allocation8 + $0x208] sm:$0xff]  }
 0x263   : > { %6233 = vmatprep.subr.bf16.mxu0 %v6925_v62  ;;  %6426 = vmatpush3.bf16.msra.mxu1 %v6921_v47  ;;  %v9713_v47 = vld [vmem:[#allocation25_spill] sm:$0xff] }
 0x264   : > { %6427 = vmatprep.subr.bf16.mxu1 %v6924_v63 }
 0x265   : > { %6202 = vmatmul.mubr.msk.bf16.gmra.mrb[44].mxu0 %vm8686_vm15, %v8245_v2 }
 0x266   : > { %6205 = vmatprep.mubr.msk.bf16.mxu0 %vm8691_vm13, %v8269_v18  ;;  %6234 = vmatpush3.bf16.msra.mxu0 %v6925_v62  ;;  %v9714_v62 = vld [vmem:[#allocation24_spill] sm:$0xff] }
 0x267   : > { %6235 = vmatprep.subr.bf16.mxu0 %v6926_v15  ;;  %6428 = vmatpush3.bf16.msra.mxu1 %v6924_v63  ;;  %v9716_v63 = vld [vmem:[#allocation26_spill] sm:$0xff] }
 0x268   : > { %6461 = vmatprep.subr.bf16.mxu1 %v6927_v17 }
 0x269   : > { %6398 = vmatmul.mubr.bf16.gmra.mrb[16].mxu1 %v8346_v28 }
 0x26a   : > { %6236 = vmatpush3.bf16.msra.mxu0 %v6926_v15  ;;  %6401 = vmatprep.mubr.bf16.mxu1 %v8361_v3  ;;  %v6934_v15 = vld [vmem:[#allocation8 + $0x238] sm:$0xff]  }
 0x26d   : > { %6206 = vmatmul.mubr.msk.bf16.gmra.mrb[48].mxu0 %vm9696_vm12, %v8293_v27 }
 0x26e   : > { %6209 = vmatprep.mubr.msk.bf16.mxu0 %vm9697_vm6, %v8319_v19 }
 0x271   : > { %6402 = vmatmul.mubr.bf16.gmra.mrb[20].mxu1 %v8383_v44 }
 0x272   : > { %6405 = vmatprep.mubr.bf16.mxu1 %v8411_v24 }
 0x275   : > { %6210 = vmatmul.mubr.msk.bf16.gmra.mrb[52].mxu0 %vm8726_vm8, %v8335_v32 }
 0x276   : > { %6213 = vmatprep.mubr.msk.bf16.mxu0 %vm9698_vm1, %v8342_v54  ;;  %vm9702_vm1 = vnez %v9573_v8  ;;  %v6930_v8 = vld [vmem:[#allocation8 + $0x218] sm:$0xff]  }
 0x279   : > { %6406 = vmatmul.mubr.bf16.gmra.mrb[24].mxu1 %v8435_v23 }
 0x27a   : > { %6409 = vmatprep.mubr.bf16.mxu1 %v8447_v9 }
 0x27d   : > { %6214 = vmatmul.mubr.msk.bf16.gmra.mrb[56].mxu0 %vm8745_vm9, %v8372_v12  ;;  %vm9706_vm9 = vnez %v9705_v61  ;;  %v9732_v61 = vld [vmem:[#allocation49_spill] sm:$0xff] }
 0x27e   : > { %6217 = vmatprep.mubr.msk.bf16.mxu0 %vm8750_vm11, %v8388_v4  ;;  %vm9703_vm11 = vnez %v9576_v50  ;;  %v9711_v50 = vld [vmem:[#allocation41_spill] sm:$0xff] }
 0x281   : > { %6410 = vmatmul.mubr.bf16.gmra.mrb[28].mxu1 %v9699_v10  ;;  %v9720_v10 = vld [vmem:[#allocation43_spill] sm:$0xff] }
 0x282   : > { %6429 = vmatprep.mubr.msk.bf16.mxu1 %vm9702_vm1, %v9701_v60  ;;  %v9726_v60 = vld [vmem:[#allocation47_spill] sm:$0xff] }
 0x285   : > { %6218 = vmatmul.mubr.msk.bf16.gmra.mrb[60].mxu0 %vm8763_vm7, %v9700_v37  ;;  %v9722_v37 = vld [vmem:[#allocation29_spill] sm:$0xff] }
 0x286   : > { %6237 = vmatprep.mubr.bf16.mxu0 %v9663_v51  ;;  %v9708_v51 = vld [vmem:[#allocation13_spill] sm:$0xff] }
 0x287   : > { %vm9709_vm1 = vnez %v9708_v51  ;;  %v9743_v51 = vld [vmem:[#allocation44_spill] sm:$0xff] }
 0x289   : > { %6430 = vmatmul.mubr.msk.bf16.vlgmr.msra.gmra.mrb[0].mxu1 %vm9703_vm11, %v7891_v5  ;;  %v9710_v5 = vld [vmem:[#allocation23_spill] sm:$0xff]  ;;  %vm9712_vm11 = vnez %v9711_v50  ;;  %v9745_v50 = vld [vmem:[#allocation53_spill] sm:$0xff] }
 0x28a   : > { %6462 = vmatpush3.bf16.msra.mxu1 %v6927_v17  ;;  %6433 = vmatprep.mubr.msk.bf16.mxu1 %vm9706_vm9, %v9704_v34  ;;  %vm9715_vm9 = vnez %v9714_v62  ;;  %v9719_v17 = vld [vmem:[#allocation27_spill] sm:$0xff]  ;;  %v9729_v34 = vld [vmem:[#allocation48_spill] sm:$0xff]  ;;  %v9015_v62 = vld [vmem:[%s9420_s5] ss:$0 sm:$0xff] }
 0x28b   : > { %6463 = vmatprep.subr.bf16.mxu1 %v6928_v48 }
 0x28d   : > { %6238 = vmatmul.mubr.bf16.vlgmr.msra.gmra.mrb[32].mxu0 %v8630_v53  ;;  %v6932_v53 = vld [vmem:[#allocation8 + $0x228] sm:$0xff]  }
 0x28e   : > { %6241 = vmatprep.mubr.bf16.mxu0 %v9671_v26  ;;  %6464 = vmatpush3.bf16.msra.mxu1 %v6928_v48  ;;  %v6931_v26 = vld [vmem:[#allocation8 + $0x220] sm:$0xff]   ;;  %v9728_v48 = vld [vmem:[#allocation31_spill] sm:$0xff] }
 0x28f   : > { %6465 = vmatprep.subr.bf16.mxu1 %v6929_v25 }
 0x291   : > { %6434 = vmatmul.mubr.msk.bf16.gmra.mrb[4].mxu1 %vm9709_vm1, %v9707_v13  ;;  %v9740_v13 = vld [vmem:[#allocation39_spill] sm:$0xff] }
 0x292   : > { %6437 = vmatprep.mubr.msk.bf16.mxu1 %vm9712_vm11, %v9710_v5  ;;  %6466 = vmatpush3.bf16.msra.mxu1 %v6929_v25  ;;  %vm9721_vm11 = vnez %v9720_v10  ;;  %v9735_v25 = vld [vmem:[#allocation50_spill] sm:$0xff] }
 0x293   : > { %6467 = vmatprep.subr.bf16.mxu1 %v6930_v8  ;;  %vm9736_vm7 = vnez %v9735_v25 }
 0x295   : > { %6242 = vmatmul.mubr.bf16.gmra.mrb[36].mxu0 %v8656_v33  ;;  %v9717_v33 = vld [vmem:[#allocation42_spill] sm:$0xff] }
 0x296   : > { %6245 = vmatprep.mubr.bf16.mxu0 %v8228_v45  ;;  %6468 = vmatpush3.bf16.msra.mxu1 %v6930_v8  ;;  %vm9718_vm1 = vnez %v9717_v33  ;;  %v6933_v45 = vld [vmem:[#allocation8 + $0x230] sm:$0xff]   ;;  %v9737_v8 = vld [vmem:[#allocation38_spill] sm:$0xff] }
 0x297   : > { %6469 = vmatprep.subr.bf16.mxu1 %v6931_v26 }
 0x299   : > { %6438 = vmatmul.mubr.msk.bf16.gmra.mrb[8].mxu1 %vm9715_vm9, %v9713_v47 }
 0x29a   : > { %6441 = vmatprep.mubr.msk.bf16.mxu1 %vm9718_vm1, %v9716_v63  ;;  %6470 = vmatpush3.bf16.msra.mxu1 %v6931_v26  ;;  %vm9727_vm1 = vnez %v9726_v60 }
 0x29b   : > { %6471 = vmatprep.subr.bf16.mxu1 %v6932_v53 }
 0x29d   : > { %6246 = vmatmul.mubr.bf16.gmra.mrb[40].mxu0 %v8249_v59  ;;  %v9723_v59 = vld [vmem:[#allocation46_spill] sm:$0xff] }
 0x29e   : > { %6249 = vmatprep.mubr.bf16.mxu0 %v8273_v35  ;;  %6472 = vmatpush3.bf16.msra.mxu1 %v6932_v53  ;;  %vm9724_vm9 = vnez %v9723_v59  ;;  %v9725_v35 = vld [vmem:[#allocation30_spill] sm:$0xff] }
 0x29f   : > { %6473 = vmatprep.subr.bf16.mxu1 %v6933_v45 }
 0x2a1   : > { %6442 = vmatmul.mubr.msk.bf16.gmra.mrb[12].mxu1 %vm9721_vm11, %v9719_v17  ;;  %vm9730_vm11 = vnez %v9729_v34 }
 0x2a2   : > { %6445 = vmatprep.mubr.msk.bf16.mxu1 %vm9724_vm9, %v9722_v37  ;;  %6474 = vmatpush3.bf16.msra.mxu1 %v6933_v45  ;;  %vm9733_vm9 = vnez %v9732_v61  ;;  %v9020_v45 = vld [vmem:[%s9421_s6] ss:$0 sm:$0xff] }
 0x2a3   : > { %6475 = vmatprep.subr.bf16.mxu1 %v6934_v15 }
 0x2a5   : > { %6250 = vmatmul.mubr.bf16.gmra.mrb[44].mxu0 %v8289_v58  ;;  %v9731_v58 = vld [vmem:[#allocation34_spill] sm:$0xff] }
 0x2a6   : > { %6253 = vmatprep.mubr.bf16.mxu0 %v8309_v40  ;;  %6476 = vmatpush3.bf16.msra.mxu1 %v6934_v15  ;;  %v9734_v40 = vld [vmem:[#allocation35_spill] sm:$0xff] }
 0x2a9   : > { %6446 = vmatmul.mubr.msk.bf16.gmra.mrb[16].mxu1 %vm9727_vm1, %v9725_v35 }
 0x2aa   : > { %6449 = vmatprep.mubr.msk.bf16.mxu1 %vm9730_vm11, %v9728_v48 }
 0x2ad   : > { %6254 = vmatmul.mubr.bf16.gmra.mrb[48].mxu0 %v8332_v55  ;;  %v9738_v55 = vld [vmem:[#allocation51_spill] sm:$0xff] }
 0x2ae   : > { %6257 = vmatprep.mubr.bf16.mxu0 %v8346_v28  ;;  %vm9739_vm1 = vnez %v9738_v55  ;;  %v9741_v28 = vld [vmem:[#allocation52_spill] sm:$0xff] }
 0x2af   : > { %vm9742_vm11 = vnez %v9741_v28 }
 0x2b1   : > { %6450 = vmatmul.mubr.msk.bf16.gmra.mrb[20].mxu1 %vm9733_vm9, %v9731_v58  ;;  %vm9746_vm9 = vnez %v9745_v50 }
 0x2b2   : > { %6453 = vmatprep.mubr.msk.bf16.mxu1 %vm9736_vm7, %v9734_v40  ;;  %vm9747_vm7 = vnez %v9687_v1 }
 0x2b5   : > { %6258 = vmatmul.mubr.bf16.gmra.mrb[52].mxu0 %v8361_v3  ;;  %v9744_v3 = vld [vmem:[#allocation16_spill] sm:$0xff] }
 0x2b6   : > { %6261 = vmatprep.mubr.bf16.mxu0 %v8383_v44  ;;  %v5611_v5 = vpack.c.bf16 %v9744_v3, %v9743_v51 }
 0x2b9   : > { %6454 = vmatmul.mubr.msk.bf16.gmra.mrb[24].mxu1 %vm9739_vm1, %v9737_v8 }
 0x2ba   : > { %6457 = vmatprep.mubr.msk.bf16.mxu1 %vm9742_vm11, %v9740_v13 }
 0x2bd   : > { %6262 = vmatmul.mubr.bf16.gmra.mrb[56].mxu0 %v8411_v24 }
 0x2be   : > { %6265 = vmatprep.mubr.bf16.mxu0 %v8435_v23 }
 0x2c1   : > { %6458 = vmatmul.mubr.msk.bf16.gmra.mrb[28].mxu1 %vm9746_vm9, %v5611_v5  ;;  %v9042_v5 = vld [vmem:[%s7585_s19 + $0x8] sm:$0xff]  }
 0x2c2   : > { %6477 = vmatprep.mubr.msk.bf16.mxu1 %vm8589_vm3, %v8618_v16 }
 0x2c5   : > { %6266 = vmatmul.mubr.bf16.gmra.mrb[60].mxu0 %v8447_v9 }
 0x2c9   : > { %6478 = vmatmul.mubr.msk.bf16.vlgmr.msra.gmra.mrb[0].mxu1 %vm8614_vm14, %v9664_v57 }
 0x2ca   : > { %6481 = vmatprep.mubr.msk.bf16.mxu1 %vm8621_vm10, %v8197_v14  ;;  %v9749_v14 = vld [vmem:[#allocation45_spill] sm:$0xff] }
 0x2cb   : > { %v9750_v29 = vpack.c.bf16 %v9749_v14, %v8423_v0 }
 0x2d1   : > { %6482 = vmatmul.mubr.msk.bf16.gmra.mrb[4].mxu1 %vm8642_vm4, %v8209_v56  ;;  %v9752_v56 = vld [vmem:[#allocation32_spill] sm:$0xff] }
 0x2d2   : > { %6485 = vmatprep.mubr.msk.bf16.mxu1 %vm8647_vm0, %v8236_v46  ;;  %v9753_v46 = vld [vmem:[#allocation15_spill] sm:$0xff] }
 0x2d9   : > { %6486 = vmatmul.mubr.msk.bf16.gmra.mrb[8].mxu1 %vm8666_vm5, %v8245_v2 }
 0x2da   : > { %6489 = vmatprep.mubr.msk.bf16.mxu1 %vm8671_vm2, %v8269_v18  ;;  %vm9754_vm2 = vcmp.lt.s32.totalorder %v9753_v46, 7 }
 0x2db   : > { %v4395_v2 = vsel %vm9754_vm2, %v8377_v49, %v9752_v56  ;;  %v9046_v56 = vld [vmem:[%s7585_s19] sm:$0xff]  }
 0x2dc   : > { %v5667_v18 = vpack.c.bf16 %v4395_v2, %v8377_v49 }
 0x2e1   : > { %6490 = vmatmul.mubr.msk.bf16.gmra.mrb[12].mxu1 %vm8686_vm15, %v8293_v27  ;;  %vm9748_vm15 = vnez %v9689_v38 }
 0x2e2   : > { %6493 = vmatprep.mubr.msk.bf16.mxu1 %vm8691_vm13, %v8319_v19  ;;  %vm9751_vm13 = vnez %v9691_v30 }
 0x2e9   : > { %6494 = vmatmul.mubr.msk.bf16.gmra.mrb[16].mxu1 %vm9696_vm12, %v8335_v32 }
 0x2ea   : > { %6497 = vmatprep.mubr.msk.bf16.mxu1 %vm9697_vm6, %v8342_v54 }
 0x2f1   : > { %6498 = vmatmul.mubr.msk.bf16.gmra.mrb[20].mxu1 %vm8726_vm8, %v8372_v12  ;;  %vm9755_vm8 = vnez %v9693_v11 }
 0x2f2   : > { %6501 = vmatprep.mubr.msk.bf16.mxu1 %vm9747_vm7, %v8388_v4 }
 0x2f9   : > { %6502 = vmatmul.mubr.msk.bf16.gmra.mrb[24].mxu1 %vm9748_vm15, %v8407_v42 }
 0x2fa   : > { %6505 = vmatprep.mubr.msk.bf16.mxu1 %vm9751_vm13, %v9750_v29 }
 0x301   : > { %6506 = vmatmul.mubr.msk.bf16.gmra.mrb[28].mxu1 %vm9755_vm8, %v5667_v18 }
 0x360   : > { %v6239_v27 = vpop.f32.mrb[32].mxu0 }
 0x361   : > { %v2757_v43 = vpop.f32.mrb[33].mxu0 }
 0x362   : > { %v6240_v6 = vpop.f32.mrb[34].mxu0 }
 0x363   : > { %v2760_v19 = vpop.f32.mrb[35].mxu0 }
 0x368   : > { %v6243_v32 = vpop.f32.mrb[36].mxu0 }
 0x369   : > { %v2773_v54 = vpop.f32.mrb[37].mxu0 }
 0x36a   : > { %v6244_v12 = vpop.f32.mrb[38].mxu0 }
 0x36b   : > { %v8962_v44 = vpop.f32.mrb[39].mxu0 }
 0x370   : > { %v8964_v22 = vpop.f32.mrb[40].mxu0 }
 0x371   : > { %v8966_v4 = vpop.f32.mrb[41].mxu0 }
 0x372   : > { %v8968_v21 = vpop.f32.mrb[42].mxu0 }
 0x373   : > { %v8970_v42 = vpop.f32.mrb[43].mxu0 }
 0x378   : > { %v8972_v49 = vpop.f32.mrb[44].mxu0 }
 0x379   : > { %v8974_v24 = vpop.f32.mrb[45].mxu0 }
 0x37a   : > { %v8976_v0 = vpop.f32.mrb[46].mxu0 }
 0x37b   : > { %v8978_v23 = vpop.f32.mrb[47].mxu0 }
 0x380   : > { %v8980_v9 = vpop.f32.mrb[48].mxu0 }
 0x381   : > { %v8982_v41 = vpop.f32.mrb[49].mxu0 }
 0x382   : > { %v8984_v39 = vpop.f32.mrb[50].mxu0 }
 0x383   : > { %v8986_v16 = vpop.f32.mrb[51].mxu0 }
 0x388   : > { %v8988_v31 = vpop.f32.mrb[52].mxu0 }
 0x389   : > { %v8990_v57 = vpop.f32.mrb[53].mxu0 }
 0x38a   : > { %v8992_v20 = vpop.f32.mrb[54].mxu0 }
 0x38b   : > { %v8994_v7 = vpop.f32.mrb[55].mxu0 }
 0x390   : > { %v8996_v52 = vpop.f32.mrb[56].mxu0 }
 0x391   : > { %v8998_v36 = vpop.f32.mrb[57].mxu0 }
 0x392   : > { %v9000_v1 = vpop.f32.mrb[58].mxu0 }
 0x393   : > { %v9002_v38 = vpop.f32.mrb[59].mxu0 }
 0x398   : > { %v9004_v30 = vpop.f32.mrb[60].mxu0 }
 0x399   : > { %v9006_v11 = vpop.f32.mrb[61].mxu0 }
 0x39a   : > { %v9008_v26 = vpop.f32.mrb[62].mxu0 }
 0x39b   : > { %v9010_v53 = vpop.f32.mrb[63].mxu0 }
 0x39c   : > { %v6479_v47 = vpop.f32.mrb[0].mxu1 }
 0x39d   : > { %v6509_v63 = vadd.f32 %v6479_v47, %v6239_v27  ;;  %v4543_v33 = vpop.f32.mrb[1].mxu1  ;;  %v9050_v27 = vld [vmem:[%s7585_s19 + $0x18] sm:$0xff]  }
 0x39e   : > { %v6510_v15 = vadd.f32 %v4543_v33, %v2757_v43  ;;  %v6480_v17 = vpop.f32.mrb[2].mxu1 }
 0x39f   : > { %v4711_v10 = vmul.f32 %v6509_v63, %v9015_v62  ;;  %v6511_v37 = vadd.f32 %v6480_v17, %v6240_v6  ;;  %v4546_v59 = vpop.f32.mrb[3].mxu1  ;;  %v5717_v63 = vunpack.c.h.bf16 %v9042_v5 }
 0x3a0   : > { %v4709_v35 = vmul.f32 %v6510_v15, %v9015_v62  ;;  %v6512_v60 = vadd.f32 %v4546_v59, %v2760_v19  ;;  %v5716_v19 = vunpack.c.l.bf16 %v9042_v5  ;;  %v9075_v59 = vld [vmem:[%s7585_s19 + $0x28] sm:$0xff]  }
 0x3a1   : > { %v9025_v48 = vadd.f32 %v9020_v45, %v4711_v10  ;;  %v4712_v34 = vmul.f32 %v6511_v37, %v9015_v62  ;;  %v5724_v10 = vunpack.c.l.bf16 %v9050_v27 }
 0x3a2   : > { %v9029_v58 = vadd.f32 %v9020_v45, %v4709_v35  ;;  %v4710_v61 = vmul.f32 %v6512_v60, %v9015_v62 }
 0x3a3   : > { %v5673_v40 = vmul.f32 -1.442695, %v9025_v48  ;;  %v9034_v25 = vadd.f32 %v9020_v45, %v4712_v34 }
 0x3a4   : > { %v5671_v8 = vmul.f32 -1.442695, %v9029_v58  ;;  %v9038_v55 = vadd.f32 %v9020_v45, %v4710_v61  ;;  %v6483_v13 = vpop.f32.mrb[4].mxu1 }
 0x3a5   : > { %7063 = vpow2.f32 %v5673_v40  ;;  %v5674_v28 = vmul.f32 -1.442695, %v9034_v25  ;;  %v6513_v51 = vadd.f32 %v6483_v13, %v6243_v32  ;;  %v4559_v3 = vpop.f32.mrb[5].mxu1 }
 0x3a6   : > { %7065 = vpow2.f32 %v5671_v8  ;;  %v5672_v50 = vmul.f32 -1.442695, %v9038_v55  ;;  %v6514_v14 = vadd.f32 %v4559_v3, %v2773_v54  ;;  %v6484_v29 = vpop.f32.mrb[6].mxu1  ;;  %v9059_v54 = vld [vmem:[%s7585_s19 + $0x10] sm:$0xff]   ;;  %v9084_v8 = vld [vmem:[%s7585_s19 + $0x20] sm:$0xff]  }
 0x3a7   : > { %7067 = vpow2.f32 %v5674_v28  ;;  %v4715_v46 = vmul.f32 %v6513_v51, %v9015_v62  ;;  %v6515_v2 = vadd.f32 %v6484_v29, %v6244_v12  ;;  %v4562_v18 = vpop.f32.mrb[7].mxu1  ;;  %v5712_v12 = vunpack.c.l.bf16 %v9046_v56 }
 0x3a8   : > { %7069 = vpow2.f32 %v5672_v50  ;;  %v4713_v43 = vmul.f32 %v6514_v14, %v9015_v62  ;;  %v6516_v6 = vadd.f32 %v4562_v18, %v8962_v44  ;;  %v5713_v44 = vunpack.c.h.bf16 %v9046_v56 }
 0x3a9   : > { %v9056_v32 = vadd.f32 %v9020_v45, %v4715_v46  ;;  %v4716_v47 = vmul.f32 %v6515_v2, %v9015_v62  ;;  %v5720_v60 = vunpack.c.l.bf16 %v9059_v54 }
 0x3aa   : > { %v9065_v33 = vadd.f32 %v9020_v45, %v4713_v43  ;;  %v4714_v15 = vmul.f32 %v6516_v6, %v9015_v62 }
 0x3ab   : > { %v5677_v17 = vmul.f32 -1.442695, %v9056_v32  ;;  %v9072_v37 = vadd.f32 %v9020_v45, %v4716_v47 }
 0x3ac   : > { %v5675_v35 = vmul.f32 -1.442695, %v9065_v33  ;;  %v9081_v61 = vadd.f32 %v9020_v45, %v4714_v15  ;;  %v6487_v40 = vpop.f32.mrb[8].mxu1 }
 0x3ad   : > { %7071 = vpow2.f32 %v5677_v17  ;;  %v5678_v13 = vmul.f32 -1.442695, %v9072_v37  ;;  %v6517_v51 = vadd.f32 %v6487_v40, %v8964_v22  ;;  %v4575_v3 = vpop.f32.mrb[9].mxu1 }
 0x3ae   : > { %7073 = vpow2.f32 %v5675_v35  ;;  %v5676_v50 = vmul.f32 -1.442695, %v9081_v61  ;;  %v6518_v29 = vadd.f32 %v4575_v3, %v8966_v4  ;;  %v6488_v46 = vpop.f32.mrb[10].mxu1 }
 0x3af   : > { %v7064_v2 = vpop.eup %7063  ;;  %7075 = vpow2.f32 %v5678_v13  ;;  %v4719_v18 = vmul.f32 %v6517_v51, %v9015_v62  ;;  %v6519_v6 = vadd.f32 %v6488_v46, %v8968_v21  ;;  %v4578_v47 = vpop.f32.mrb[11].mxu1 }
 0x3b0   : > { %v7066_v22 = vpop.eup %7065  ;;  %v4878_v15 = vadd.f32 1.0, %v7064_v2  ;;  %7077 = vpow2.f32 %v5676_v50  ;;  %v4717_v17 = vmul.f32 %v6518_v29, %v9015_v62  ;;  %v6520_v35 = vadd.f32 %v4578_v47, %v8970_v42  ;;  %v9107_v29 = vld [vmem:[%s7585_s19 + $0x38] sm:$0xff]  }
 0x3b1   : > { %v7068_v4 = vpop.eup %7067  ;;  %v4876_v40 = vadd.f32 1.0, %v7066_v22  ;;  %v9098_v13 = vadd.f32 %v9020_v45, %v4719_v18  ;;  %v4720_v51 = vmul.f32 %v6519_v6, %v9015_v62  ;;  %v9114_v6 = vld [vmem:[%s7585_s19 + $0x30] sm:$0xff]  }
 0x3b2   : > { %v7070_v21 = vpop.eup %7069  ;;  %7079 = vrcp.f32 %v4878_v15  ;;  %v4879_v46 = vadd.f32 1.0, %v7068_v4  ;;  %v9103_v2 = vadd.f32 %v9020_v45, %v4717_v17  ;;  %v4718_v50 = vmul.f32 %v6520_v35, %v9015_v62 }
 0x3b3   : > { %7081 = vrcp.f32 %v4876_v40  ;;  %v4877_v42 = vadd.f32 1.0, %v7070_v21  ;;  %v5681_v47 = vmul.f32 -1.442695, %v9098_v13  ;;  %v9111_v18 = vadd.f32 %v9020_v45, %v4720_v51 }
 0x3b4   : > { %7083 = vrcp.f32 %v4879_v46  ;;  %v5679_v22 = vmul.f32 -1.442695, %v9103_v2  ;;  %v9118_v15 = vadd.f32 %v9020_v45, %v4718_v50  ;;  %v6491_v35 = vpop.f32.mrb[12].mxu1 }
 0x3b5   : > { %7085 = vrcp.f32 %v4877_v42  ;;  %v5682_v4 = vmul.f32 -1.442695, %v9111_v18  ;;  %v6521_v40 = vadd.f32 %v6491_v35, %v8972_v49  ;;  %v4591_v51 = vpop.f32.mrb[13].mxu1 }
 0x3b6   : > { %7087 = vpow2.f32 %v5681_v47  ;;  %v5680_v3 = vmul.f32 -1.442695, %v9118_v15  ;;  %v6522_v46 = vadd.f32 %v4591_v51, %v8974_v24  ;;  %v6492_v50 = vpop.f32.mrb[14].mxu1 }
 0x3b7   : > { %v7072_v14 = vpop.eup %7071  ;;  %7089 = vpow2.f32 %v5679_v22  ;;  %v4723_v17 = vmul.f32 %v6521_v40, %v9015_v62  ;;  %v6523_v42 = vadd.f32 %v6492_v50, %v8976_v0  ;;  %v4594_v49 = vpop.f32.mrb[15].mxu1 }
 0x3b8   : > { %v7074_v35 = vpop.eup %7073  ;;  %v4882_v21 = vadd.f32 1.0, %v7072_v14  ;;  %7091 = vpow2.f32 %v5682_v4  ;;  %v4721_v47 = vmul.f32 %v6522_v46, %v9015_v62  ;;  %v6524_v24 = vadd.f32 %v4594_v49, %v8978_v23 }
 0x3b9   : > { %v7076_v51 = vpop.eup %7075  ;;  %v4880_v43 = vadd.f32 1.0, %v7074_v35  ;;  %7093 = vpow2.f32 %v5680_v3  ;;  %v9133_v22 = vadd.f32 %v9020_v45, %v4723_v17  ;;  %v4724_v40 = vmul.f32 %v6523_v42, %v9015_v62 }
 0x3ba   : > { %v7078_v0 = vpop.eup %7077  ;;  %7095 = vrcp.f32 %v4882_v21  ;;  %v4883_v50 = vadd.f32 1.0, %v7076_v51  ;;  %v9137_v28 = vadd.f32 %v9020_v45, %v4721_v47  ;;  %v4722_v14 = vmul.f32 %v6524_v24, %v9015_v62 }
 0x3bb   : > { %7097 = vrcp.f32 %v4880_v43  ;;  %v4881_v4 = vadd.f32 1.0, %v7078_v0  ;;  %v5685_v23 = vmul.f32 -1.442695, %v9133_v22  ;;  %v9143_v3 = vadd.f32 %v9020_v45, %v4724_v40 }
 0x3bc   : > { %v7080_v17 = vpop.eup %7079  ;;  %7099 = vrcp.f32 %v4883_v50  ;;  %v5683_v46 = vmul.f32 -1.442695, %v9137_v28  ;;  %v9147_v21 = vadd.f32 %v9020_v45, %v4722_v14  ;;  %v6495_v49 = vpop.f32.mrb[16].mxu1 }
 0x3bd   : > { %v7082_v35 = vpop.eup %7081  ;;  %v4974_v47 = vmul.f32 %v7080_v17, %v9025_v48  ;;  %7101 = vrcp.f32 %v4881_v4  ;;  %v5686_v43 = vmul.f32 -1.442695, %v9143_v3  ;;  %v6525_v24 = vadd.f32 %v6495_v49, %v8980_v9  ;;  %v4607_v51 = vpop.f32.mrb[17].mxu1 }
 0x3be   : > { %v7084_v40 = vpop.eup %7083  ;;  %v4972_v0 = vmul.f32 %v7082_v35, %v9029_v58  ;;  %7103 = vpow2.f32 %v5685_v23  ;;  %v5684_v50 = vmul.f32 -1.442695, %v9147_v21  ;;  %v6526_v14 = vadd.f32 %v4607_v51, %v8982_v41  ;;  %v6496_v42 = vpop.f32.mrb[18].mxu1 }
 0x3bf   : > { %v7086_v34 = vpop.eup %7085  ;;  %v5070_v48 = vadd.f32 %v5716_v19, %v4974_v47  ;;  %v4975_v4 = vmul.f32 %v7084_v40, %v9034_v25  ;;  %7105 = vpow2.f32 %v5683_v46  ;;  %v4727_v9 = vmul.f32 %v6525_v24, %v9015_v62  ;;  %v4610_v17 = vpop.f32.mrb[19].mxu1 }
 0x3c0   : > { %v7088_v49 = vpop.eup %7087  ;;  %v5068_v58 = vadd.f32 %v5712_v12, %v4972_v0  ;;  %v4973_v23 = vmul.f32 %v7086_v34, %v9038_v55  ;;  %7107 = vpow2.f32 %v5686_v43  ;;  %v4725_v41 = vmul.f32 %v6526_v14, %v9015_v62 }
 0x3c1   : > { %v7090_v35 = vpop.eup %7089  ;;  %5102 = vst [vmem:[%s9166_s23 + $0x10] sm:$0xff] %v5070_v48  ;;  %v5071_v25 = vadd.f32 %v5717_v63, %v4975_v4  ;;  %v4886_v19 = vadd.f32 1.0, %v7088_v49  ;;  %7109 = vpow2.f32 %v5684_v50  ;;  %v9172_v12 = vadd.f32 %v9020_v45, %v4727_v9 }
 0x3c2   : > { %v7092_v55 = vpop.eup %7091  ;;  %5100 = vst [vmem:[%s9166_s23] sm:$0xff] %v5068_v58  ;;  %v5069_v34 = vadd.f32 %v5713_v44, %v4973_v23  ;;  %v4884_v46 = vadd.f32 1.0, %v7090_v35  ;;  %v9178_v47 = vadd.f32 %v9020_v45, %v4725_v41  ;;  %v6527_v43 = vadd.f32 %v6496_v42, %v8984_v39 }
 0x3c3   : > { %v7094_v24 = vpop.eup %7093  ;;  %5103 = vst [vmem:[%s9166_s23 + $0x18] sm:$0xff] %v5071_v25  ;;  %7111 = vrcp.f32 %v4886_v19  ;;  %v4887_v5 = vadd.f32 1.0, %v7092_v55  ;;  %v5689_v63 = vmul.f32 -1.442695, %v9172_v12  ;;  %v6528_v51 = vadd.f32 %v4610_v17, %v8986_v16 }
 0x3c4   : > { %v7096_v40 = vpop.eup %7095  ;;  %5101 = vst [vmem:[%s9166_s23 + $0x8] sm:$0xff] %v5069_v34  ;;  %7113 = vrcp.f32 %v4884_v46  ;;  %v4885_v0 = vadd.f32 1.0, %v7094_v24  ;;  %v5687_v56 = vmul.f32 -1.442695, %v9178_v47  ;;  %v4728_v44 = vmul.f32 %v6527_v43, %v9015_v62  ;;  %v6499_v50 = vpop.f32.mrb[20].mxu1 }
 0x3c5   : > { %v7098_v14 = vpop.eup %7097  ;;  %v4978_v39 = vmul.f32 %v7096_v40, %v9056_v32  ;;  %7115 = vrcp.f32 %v4887_v5  ;;  %v4726_v42 = vmul.f32 %v6528_v51, %v9015_v62  ;;  %v6529_v48 = vadd.f32 %v6499_v50, %v8988_v31  ;;  %v4623_v4 = vpop.f32.mrb[21].mxu1 }
 0x3c6   : > { %v7100_v9 = vpop.eup %7099  ;;  %v4976_v16 = vmul.f32 %v7098_v14, %v9065_v33  ;;  %7117 = vrcp.f32 %v4885_v0  ;;  %v9192_v17 = vadd.f32 %v9020_v45, %v4728_v44  ;;  %v6530_v49 = vadd.f32 %v4623_v4, %v8990_v57  ;;  %v6500_v58 = vpop.f32.mrb[22].mxu1 }
 0x3c7   : > { %v7102_v23 = vpop.eup %7101  ;;  %v5074_v32 = vadd.f32 %v5724_v10, %v4978_v39  ;;  %v4979_v41 = vmul.f32 %v7100_v9, %v9072_v37  ;;  %7119 = vpow2.f32 %v5689_v63  ;;  %v9199_v31 = vadd.f32 %v9020_v45, %v4726_v42  ;;  %v4626_v33 = vpop.f32.mrb[23].mxu1 }
 0x3c8   : > { %v7104_v35 = vpop.eup %7103  ;;  %v5072_v25 = vadd.f32 %v5720_v60, %v4976_v16  ;;  %v4977_v19 = vmul.f32 %v7102_v23, %v9081_v61  ;;  %7121 = vpow2.f32 %v5687_v56  ;;  %v5690_v57 = vmul.f32 -1.442695, %v9192_v17 }
 0x3c9   : > { %v7106_v55 = vpop.eup %7105  ;;  %5106 = vst [vmem:[%s9166_s23 + $0x30] sm:$0xff] %v5074_v32  ;;  %v9756_v10 = vunpack.c.h.bf16 %v9050_v27  ;;  %v4890_v34 = vadd.f32 1.0, %v7104_v35  ;;  %v5688_v46 = vmul.f32 -1.442695, %v9199_v31  ;;  %v4731_v43 = vmul.f32 %v6529_v48, %v9015_v62 }
 0x3ca   : > { %v7108_v24 = vpop.eup %7107  ;;  %5104 = vst [vmem:[%s9166_s23 + $0x20] sm:$0xff] %v5072_v25  ;;  %v9757_v60 = vunpack.c.h.bf16 %v9059_v54  ;;  %v4888_v5 = vadd.f32 1.0, %v7106_v55  ;;  %7123 = vpow2.f32 %v5690_v57  ;;  %v4729_v63 = vmul.f32 %v6530_v49, %v9015_v62 }
 0x3cb   : > { %v5075_v37 = vadd.f32 %v9756_v10, %v4979_v41  ;;  %v7110_v51 = vpop.eup %7109  ;;  %7125 = vrcp.f32 %v4890_v34  ;;  %v4891_v27 = vadd.f32 1.0, %v7108_v24  ;;  %v9216_v40 = vadd.f32 %v9020_v45, %v4731_v43 }
 0x3cc   : > { %v5073_v61 = vadd.f32 %v9757_v60, %v4977_v19  ;;  %v6531_v0 = vadd.f32 %v6500_v58, %v8992_v20  ;;  %7127 = vrcp.f32 %v4888_v5  ;;  %v4889_v56 = vadd.f32 1.0, %v7110_v51  ;;  %v6503_v50 = vpop.f32.mrb[24].mxu1 }
 0x3cd   : > { %5107 = vst [vmem:[%s9166_s23 + $0x38] sm:$0xff] %v5075_v37  ;;  %v9221_v44 = vadd.f32 %v9020_v45, %v4729_v63  ;;  %v6532_v54 = vadd.f32 %v4626_v33, %v8994_v7  ;;  %v7112_v14 = vpop.eup %7111  ;;  %7129 = vrcp.f32 %v4891_v27  ;;  %v5693_v39 = vmul.f32 -1.442695, %v9216_v40  ;;  %v4639_v4 = vpop.f32.mrb[25].mxu1 }
 0x3ce   : > { %5105 = vst [vmem:[%s9166_s23 + $0x28] sm:$0xff] %v5073_v61  ;;  %v4732_v42 = vmul.f32 %v6531_v0, %v9015_v62  ;;  %v6533_v48 = vadd.f32 %v6503_v50, %v8996_v52  ;;  %v7114_v9 = vpop.eup %7113  ;;  %v4982_v20 = vmul.f32 %v7112_v14, %v9098_v13  ;;  %7131 = vrcp.f32 %v4889_v56  ;;  %v6504_v58 = vpop.f32.mrb[26].mxu1 }
 0x3cf   : > { %v5691_v16 = vmul.f32 -1.442695, %v9221_v44  ;;  %v4730_v49 = vmul.f32 %v6532_v54, %v9015_v62  ;;  %v7116_v7 = vpop.eup %7115  ;;  %v4980_v23 = vmul.f32 %v7114_v9, %v9103_v2  ;;  %7133 = vpow2.f32 %v5688_v46  ;;  %v4642_v41 = vpop.f32.mrb[27].mxu1 }
 0x3d0   : > { %v9232_v32 = vadd.f32 %v9020_v45, %v4732_v42  ;;  %v4735_v52 = vmul.f32 %v6533_v48, %v9015_v62  ;;  %v7118_v33 = vpop.eup %7117  ;;  %v9758_v13 = vunpack.c.l.bf16 %v9075_v59  ;;  %v4983_v25 = vmul.f32 %v7116_v7, %v9111_v18 }
 0x3d1   : > { %7135 = vpow2.f32 %v5693_v39  ;;  %v9239_v19 = vadd.f32 %v9020_v45, %v4730_v49  ;;  %v7120_v2 = vpop.eup %7119  ;;  %v9759_v57 = vunpack.c.l.bf16 %v9084_v8  ;;  %v4981_v10 = vmul.f32 %v7118_v33, %v9118_v15 }
 0x3d2   : > { %v5078_v35 = vadd.f32 %v9758_v13, %v4982_v20  ;;  %7137 = vpow2.f32 %v5691_v16  ;;  %v5694_v37 = vmul.f32 -1.442695, %v9232_v32  ;;  %v7122_v34 = vpop.eup %7121  ;;  %v9760_v46 = vunpack.c.h.bf16 %v9075_v59  ;;  %v9268_v20 = vld [vmem:[%s7585_s19 + $0x48] sm:$0xff]  }
 0x3d3   : > { %v5076_v55 = vadd.f32 %v9759_v57, %v4980_v23  ;;  %v4894_v18 = vadd.f32 1.0, %v7120_v2  ;;  %v5692_v24 = vmul.f32 -1.442695, %v9239_v19  ;;  %v9250_v60 = vadd.f32 %v9020_v45, %v4735_v52 }
 0x3d4   : > { %5110 = vst [vmem:[%s9166_s23 + $0x50] sm:$0xff] %v5078_v35  ;;  %v5079_v43 = vadd.f32 %v9760_v46, %v4983_v25  ;;  %v9761_v61 = vunpack.c.h.bf16 %v9084_v8  ;;  %v4892_v15 = vadd.f32 1.0, %v7122_v34  ;;  %7139 = vpow2.f32 %v5694_v37  ;;  %v7124_v51 = vpop.eup %7123  ;;  %v6507_v56 = vpop.f32.mrb[28].mxu1  ;;  %v9284_v35 = vld [vmem:[%s7585_s19 + $0x40] sm:$0xff]  }
 0x3d5   : > { %5108 = vst [vmem:[%s9166_s23 + $0x40] sm:$0xff] %v5076_v55  ;;  %v6534_v63 = vadd.f32 %v4639_v4, %v8998_v36  ;;  %7141 = vrcp.f32 %v4894_v18  ;;  %v5697_v59 = vmul.f32 -1.442695, %v9250_v60  ;;  %v6535_v27 = vadd.f32 %v6504_v58, %v9000_v1  ;;  %v7126_v54 = vpop.eup %7125  ;;  %v4655_v36 = vpop.f32.mrb[29].mxu1 }
 0x3d6   : > { %v5077_v5 = vadd.f32 %v9761_v61, %v4981_v10  ;;  %5111 = vst [vmem:[%s9166_s23 + $0x58] sm:$0xff] %v5079_v43  ;;  %v6536_v0 = vadd.f32 %v4642_v41, %v9002_v38  ;;  %7143 = vrcp.f32 %v4892_v15  ;;  %v4895_v8 = vadd.f32 1.0, %v7124_v51  ;;  %v7128_v39 = vpop.eup %7127  ;;  %v6508_v38 = vpop.f32.mrb[30].mxu1 }
 0x3d7   : > { %v4733_v50 = vmul.f32 %v6534_v63, %v9015_v62  ;;  %v6537_v14 = vadd.f32 %v6507_v56, %v9004_v30  ;;  %v4986_v42 = vmul.f32 %v7126_v54, %v9133_v22  ;;  %7145 = vpow2.f32 %v5692_v24  ;;  %v7130_v4 = vpop.eup %7129  ;;  %v4658_v22 = vpop.f32.mrb[31].mxu1 }
 0x3d8   : > { %5109 = vst [vmem:[%s9166_s23 + $0x48] sm:$0xff] %v5077_v5  ;;  %v4736_v48 = vmul.f32 %v6535_v27, %v9015_v62  ;;  %v4734_v1 = vmul.f32 %v6536_v0, %v9015_v62  ;;  %v4984_v9 = vmul.f32 %v7128_v39, %v9137_v28  ;;  %7147 = vrcp.f32 %v4895_v8  ;;  %v7132_v49 = vpop.eup %7131 }
 0x3d9   : > { %v9271_v30 = vadd.f32 %v9020_v45, %v4733_v50  ;;  %v4739_v16 = vmul.f32 %v6537_v14, %v9015_v62  ;;  %v9762_v58 = vunpack.c.l.bf16 %v9107_v29  ;;  %v4987_v23 = vmul.f32 %v7130_v4, %v9143_v3  ;;  %v7134_v52 = vpop.eup %7133  ;;  %v5784_v4 = vld [vmem:[%s7585_s19 + $0x58] sm:$0xff]  }
 0x3da   : > { %7149 = vpow2.f32 %v5697_v59  ;;  %v9278_v28 = vadd.f32 %v9020_v45, %v4736_v48  ;;  %v9763_v41 = vunpack.c.l.bf16 %v9114_v6  ;;  %v4985_v13 = vmul.f32 %v7132_v49, %v9147_v21  ;;  %v5783_v49 = vld [vmem:[%s7585_s19 + $0x50] sm:$0xff]  }
 0x3db   : > { %v5082_v7 = vadd.f32 %v9762_v58, %v4986_v42  ;;  %v5695_v25 = vmul.f32 -1.442695, %v9271_v30  ;;  %v9288_v2 = vadd.f32 %v9020_v45, %v4734_v1  ;;  %v7136_v3 = vpop.eup %7135  ;;  %v9764_v57 = vunpack.c.h.bf16 %v9107_v29 }
 0x3dc   : > { %v5080_v33 = vadd.f32 %v9763_v41, %v4984_v9  ;;  %v5748_v10 = vunpack.c.l.bf16 %v9268_v20  ;;  %v4893_v37 = vadd.f32 1.0, %v7134_v52  ;;  %v9295_v34 = vadd.f32 %v9020_v45, %v4739_v16  ;;  %v7138_v21 = vpop.eup %7137 }
 0x3dd   : > { %5114 = vst [vmem:[%s9166_s23 + $0x70] sm:$0xff] %v5082_v7  ;;  %v5083_v55 = vadd.f32 %v9764_v57, %v4987_v23  ;;  %v9765_v46 = vunpack.c.h.bf16 %v9114_v6  ;;  %v4898_v18 = vadd.f32 1.0, %v7136_v3  ;;  %7151 = vpow2.f32 %v5695_v25 }
 0x3de   : > { %5112 = vst [vmem:[%s9166_s23 + $0x60] sm:$0xff] %v5080_v33  ;;  %v5698_v24 = vmul.f32 -1.442695, %v9278_v28  ;;  %v5744_v29 = vunpack.c.l.bf16 %v9284_v35  ;;  %7153 = vrcp.f32 %v4893_v37  ;;  %v4896_v61 = vadd.f32 1.0, %v7138_v21  ;;  %v7140_v15 = vpop.eup %7139 }
 0x3df   : > { %v5081_v43 = vadd.f32 %v9765_v46, %v4985_v13  ;;  %5115 = vst [vmem:[%s9166_s23 + $0x78] sm:$0xff] %v5083_v55  ;;  %v6538_v5 = vadd.f32 %v4655_v36, %v9006_v11  ;;  %7155 = vrcp.f32 %v4898_v18  ;;  %v5696_v63 = vmul.f32 -1.442695, %v9288_v2  ;;  %v7142_v59 = vpop.eup %7141 }
 0x3e0   : > { %v6539_v51 = vadd.f32 %v6508_v38, %v9008_v26  ;;  %v6540_v6 = vadd.f32 %v4658_v22, %v9010_v53  ;;  %7157 = vrcp.f32 %v4896_v61  ;;  %v4899_v27 = vadd.f32 1.0, %v7140_v15  ;;  %v7144_v54 = vpop.eup %7143 }
 0x3e1   : > { %5113 = vst [vmem:[%s9166_s23 + $0x68] sm:$0xff] %v5081_v43  ;;  %v5701_v0 = vmul.f32 -1.442695, %v9295_v34  ;;  %v4737_v56 = vmul.f32 %v6538_v5, %v9015_v62  ;;  %v4990_v8 = vmul.f32 %v7142_v59, %v9172_v12  ;;  %7159 = vpow2.f32 %v5698_v24  ;;  %v7146_v14 = vpop.eup %7145  ;;  %v5786_v24 = vld [vmem:[%s7585_s19 + $0x68] sm:$0xff]   ;;  %v5785_v59 = vld [vmem:[%s7585_s19 + $0x60] sm:$0xff]  }
 0x3e2   : > { %v4740_v11 = vmul.f32 %v6539_v51, %v9015_v62  ;;  %v4738_v50 = vmul.f32 %v6540_v6, %v9015_v62  ;;  %v4988_v26 = vmul.f32 %v7144_v54, %v9178_v47  ;;  %v5749_v53 = vunpack.c.h.bf16 %v9268_v20  ;;  %v7148_v39 = vpop.eup %7147 }
 0x3e3   : > { %7161 = vrcp.f32 %v4899_v27  ;;  %v9316_v36 = vadd.f32 %v9020_v45, %v4737_v56  ;;  %v5086_v42 = vadd.f32 %v5748_v10, %v4990_v8  ;;  %v4897_v12 = vadd.f32 1.0, %v7146_v14 }
 0x3e4   : > { %7163 = vpow2.f32 %v5696_v63  ;;  %v9319_v48 = vadd.f32 %v9020_v45, %v4740_v11  ;;  %v7150_v62 = vpop.eup %7149  ;;  %v5084_v1 = vadd.f32 %v5744_v29, %v4988_v26  ;;  %v4991_v38 = vmul.f32 %v7148_v39, %v9192_v17 }
 0x3e5   : > { %7165 = vpow2.f32 %v5701_v0  ;;  %v5699_v47 = vmul.f32 -1.442695, %v9316_v36  ;;  %5118 = vst [vmem:[%s9166_s23 + $0x90] sm:$0xff] %v5086_v42  ;;  %v4902_v9 = vadd.f32 1.0, %v7150_v62  ;;  %v9327_v16 = vadd.f32 %v9020_v45, %v4738_v50 }
 0x3e6   : > { %7167 = vrcp.f32 %v4897_v12  ;;  %v5702_v20 = vmul.f32 -1.442695, %v9319_v48  ;;  %5116 = vst [vmem:[%s9166_s23 + $0x80] sm:$0xff] %v5084_v1  ;;  %v5087_v22 = vadd.f32 %v5749_v53, %v4991_v38  ;;  %v5745_v17 = vunpack.c.h.bf16 %v9284_v35  ;;  %v5788_v12 = vld [vmem:[%s7585_s19 + $0x78] sm:$0xff]   ;;  %v5787_v38 = vld [vmem:[%s7585_s19 + $0x70] sm:$0xff]  }
 0x3e7   : > { %7169 = vpow2.f32 %v5699_v47  ;;  %v7152_v58 = vpop.eup %7151  ;;  %v5700_v7 = vmul.f32 -1.442695, %v9327_v16  ;;  %v5756_v52 = vunpack.c.l.bf16 %v5784_v4  ;;  %v5752_v13 = vunpack.c.l.bf16 %v5783_v49 }
 0x3e8   : > { %7171 = vrcp.f32 %v4902_v9  ;;  %v7154_v23 = vpop.eup %7153  ;;  %5119 = vst [vmem:[%s9166_s23 + $0x98] sm:$0xff] %v5087_v22  ;;  %v4900_v41 = vadd.f32 1.0, %v7152_v58  ;;  %v5757_v10 = vunpack.c.h.bf16 %v5784_v4  ;;  %v5764_v6 = vunpack.c.l.bf16 %v5786_v24 }
 0x3e9   : > { %7173 = vpow2.f32 %v5702_v20  ;;  %v7156_v33 = vpop.eup %7155  ;;  %v4989_v45 = vmul.f32 %v7154_v23, %v9199_v31  ;;  %v5760_v11 = vunpack.c.l.bf16 %v5785_v59  ;;  %v5765_v42 = vunpack.c.h.bf16 %v5786_v24 }
 0x3ea   : > { %7175 = vpow2.f32 %v5700_v7  ;;  %v7158_v25 = vpop.eup %7157  ;;  %v4994_v3 = vmul.f32 %v7156_v33, %v9216_v40  ;;  %v5753_v40 = vunpack.c.h.bf16 %v5783_v49  ;;  %v5761_v1 = vunpack.c.h.bf16 %v5785_v59 }
 0x3eb   : > { %7177 = vrcp.f32 %v4900_v41  ;;  %v7160_v35 = vpop.eup %7159  ;;  %v5085_v57 = vadd.f32 %v5745_v17, %v4989_v45  ;;  %v4992_v55 = vmul.f32 %v7158_v25, %v9221_v44  ;;  %v5772_v4 = vunpack.c.l.bf16 %v5788_v12 }
 0x3ec   : > { %v5090_v21 = vadd.f32 %v5756_v52, %v4994_v3  ;;  %v4903_v46 = vadd.f32 1.0, %v7160_v35  ;;  %v5768_v49 = vunpack.c.l.bf16 %v5787_v38  ;;  %v5773_v23 = vunpack.c.h.bf16 %v5788_v12 }
 0x3ed   : > { %v7162_v37 = vpop.eup %7161  ;;  %5117 = vst [vmem:[%s9166_s23 + $0x88] sm:$0xff] %v5085_v57  ;;  %v5088_v31 = vadd.f32 %v5752_v13, %v4992_v55  ;;  %v5769_v41 = vunpack.c.h.bf16 %v5787_v38 }
 0x3ee   : > { %v7164_v43 = vpop.eup %7163  ;;  %v4995_v18 = vmul.f32 %v7162_v37, %v9232_v32  ;;  %5122 = vst [vmem:[%s9166_s23 + $0xb0] sm:$0xff] %v5090_v21  ;;  %7179 = vrcp.f32 %v4903_v46 }
 0x3ef   : > { %v7166_v29 = vpop.eup %7165  ;;  %v4901_v61 = vadd.f32 1.0, %v7164_v43  ;;  %5120 = vst [vmem:[%s9166_s23 + $0xa0] sm:$0xff] %v5088_v31 }
 0x3f0   : > { %v7168_v5 = vpop.eup %7167  ;;  %v5091_v44 = vadd.f32 %v5757_v10, %v4995_v18  ;;  %v4906_v15 = vadd.f32 1.0, %v7166_v29 }
 0x3f1   : > { %v7170_v63 = vpop.eup %7169  ;;  %v4993_v51 = vmul.f32 %v7168_v5, %v9239_v19  ;;  %7181 = vrcp.f32 %v4901_v61 }
 0x3f2   : > { %v7172_v27 = vpop.eup %7171  ;;  %5123 = vst [vmem:[%s9166_s23 + $0xb8] sm:$0xff] %v5091_v44  ;;  %7183 = vrcp.f32 %v4906_v15  ;;  %v4904_v32 = vadd.f32 1.0, %v7170_v63 }
 0x3f3   : > { %v7174_v0 = vpop.eup %7173  ;;  %v5089_v56 = vadd.f32 %v5753_v40, %v4993_v51  ;;  %v4998_v54 = vmul.f32 %v7172_v27, %v9250_v60 }
 0x3f4   : > { %v7176_v8 = vpop.eup %7175  ;;  %7185 = vrcp.f32 %v4904_v32  ;;  %v4907_v50 = vadd.f32 1.0, %v7174_v0 }
 0x3f5   : > { %v7178_v19 = vpop.eup %7177  ;;  %5121 = vst [vmem:[%s9166_s23 + $0xa8] sm:$0xff] %v5089_v56  ;;  %v5094_v14 = vadd.f32 %v5764_v6, %v4998_v54  ;;  %v4905_v26 = vadd.f32 1.0, %v7176_v8 }
 0x3f6   : > { %v4996_v53 = vmul.f32 %v7178_v19, %v9271_v30  ;;  %7187 = vrcp.f32 %v4907_v50 }
 0x3f7   : > { %5126 = vst [vmem:[%s9166_s23 + $0xd0] sm:$0xff] %v5094_v14  ;;  %7189 = vrcp.f32 %v4905_v26 }
 0x3f8   : > { %v5092_v39 = vadd.f32 %v5760_v11, %v4996_v53  ;;  %v7180_v60 = vpop.eup %7179 }
 0x3f9   : > { %v4999_v62 = vmul.f32 %v7180_v60, %v9278_v28 }
 0x3fa   : > { %5124 = vst [vmem:[%s9166_s23 + $0xc0] sm:$0xff] %v5092_v39 }
 0x3fb   : > { %v7182_v47 = vpop.eup %7181  ;;  %v5095_v30 = vadd.f32 %v5765_v42, %v4999_v62 }
 0x3fc   : > { %v7184_v9 = vpop.eup %7183  ;;  %v4997_v20 = vmul.f32 %v7182_v47, %v9288_v2 }
 0x3fd   : > { %v5002_v22 = vmul.f32 %v7184_v9, %v9295_v34  ;;  %5127 = vst [vmem:[%s9166_s23 + $0xd8] sm:$0xff] %v5095_v30 }
 0x3fe   : > { %v7186_v58 = vpop.eup %7185  ;;  %v5093_v17 = vadd.f32 %v5761_v1, %v4997_v20 }
 0x3ff   : > { %v5098_v28 = vadd.f32 %v5772_v4, %v5002_v22  ;;  %v5000_v7 = vmul.f32 %v7186_v58, %v9316_v36 }
 0x400   : > { %v7188_v52 = vpop.eup %7187  ;;  %5125 = vst [vmem:[%s9166_s23 + $0xc8] sm:$0xff] %v5093_v17 }
 0x401   : > { %v7190_v2 = vpop.eup %7189  ;;  %5130 = vst [vmem:[%s9166_s23 + $0xf0] sm:$0xff] %v5098_v28  ;;  %v5096_v34 = vadd.f32 %v5768_v49, %v5000_v7  ;;  %v5003_v33 = vmul.f32 %v7188_v52, %v9319_v48 }
 0x402   : > { %v5001_v45 = vmul.f32 %v7190_v2, %v9327_v16 }
 0x403   : > { %5128 = vst [vmem:[%s9166_s23 + $0xe0] sm:$0xff] %v5096_v34  ;;  %v5099_v13 = vadd.f32 %v5773_v23, %v5003_v33 }
 0x404   : > { %v5097_v36 = vadd.f32 %v5769_v41, %v5001_v45 }
 0x405   : > { %5131 = vst [vmem:[%s9166_s23 + $0xf8] sm:$0xff] %v5099_v13 }
 0x406   : > { %5129 = vst [vmem:[%s9166_s23 + $0xe8] sm:$0xff] %v5097_v36 }
 0x407   : > { %7290 = shalt.err (!%p7287_p1)
}
 0x408   : > { %s7291_s15 = scalar_lea.hbm %s9367_s9, 4096  ;;  %s7295_s23 = scalar_lea.hbm %s9422_s7, 8192 }
 0x409   : > { %p7292_p13 = scmp.ne.s32.totalorder %s9367_s9, %s7291_s15  ;;  %p7296_p4 = scmp.lt.u32.totalorder %s9367_s9, %s9422_s7 }
 0x40a   : > { %p7297_p5 = scmp.lt.u32.totalorder %s7295_s23, %s7291_s15  ;;  %p7299_p11 = scmp.lt.u32.totalorder %s7291_s15, %s9367_s9 }
 0x40b   : > { %p7293_p6 = pnand %p7292_p13, %p9766_p0 }
 0x40c   : > { %p7298_p8 = por %p7297_p5, %p7296_p4 }
 0x40d   : > { %p7294_p10 = pneg %p7293_p6 }
 0x40e   : > { %p7300_p2 = por %p7299_p11, %p7298_p8 }
 0x410   : > { %p7301_p3 = pnand %p7300_p2, %p7294_p10 }
 0x412   : > { %7304 = shalt.err (!%p7301_p3)
}
 0x413   : > { %s7358_s30 = smov 128   ;;  %s7359_s29 = smov 8  }
 0x414   : > { %6775 = dma.vmem_to_hbm [thread:$0]  (%p9766_p0), %s9369_s18, 4096, %s9367_s9, %s5133_s28, %s7358_s30, %s7358_s30, %s7359_s29  }
 0x415 PF: > { %s5161_s11 = sand.u32 1, %s7335_s24   ;;  %p9767_p7 = scmp.ne.s32.totalorder %s9516_s8, 0 }
 0x416   : > { %p9768_p9 = scmp.ge.s32.totalorder %s7347_s27, 2  ;;  %s5162_s10 = scalar_lea.sflag [#allocation5], %s5161_s11 }
 0x418   : > { %p6789_p12 = pnand %p9768_p9, %p9767_p7 }
 0x41a   : > { %7330 = dma.done.wait (!%p6789_p12), %s5162_s10, 4096  }
 0x41b   : > { %7332 = vsyncadd (!%p6789_p12), %s5162_s10, 4294963200  ;;  %p21_p1 = scmp.ge.s32.totalorder %s7516_s12, 4   ;;  %s9769_s24 = smov %s7339_s25 }
 0x41c   : > { %s9770_s25 = smov %s7343_s26  ;;  %s9771_s26 = smov %s7532_s17 }
 0x41d   : > { %s9772_s27 = smov %s7516_s12  ;;  %23 = sbr.rel (!%p21_p1) target bundleno = 6 (0x6), region = 109 }
 0x424   :  { %5167 = vsyncpa [#allocation4], 1 }
 0x425   :  { %5169 = vsyncpa [#allocation4 + $0x1], 1 }
 0x426   :  { %5170 = vsyncpa [#allocation7], 1 }
 0x427   :  { %5171 = vsyncpa [#allocation5], 1 }
 0x428   :  { %5173 = vsyncpa [#allocation5 + $0x1], 1 }

</bundles_post_ra>
